<compile_context>
chip_gen: v6e
topology: v6e:2x2x1
jax: 0.10.0
libtpu: 0.0.40
codegen_flags: <defaults>
</compile_context>

<pallas_src>
import math

import jax
import jax.numpy as jnp
from jax import lax
from jax.experimental import pallas as pl
from jax.experimental.pallas import tpu as pltpu


# ----------------------------------------------------------------------------
# Fused encoder kernel: runs the whole conv chain for one batch element.
# refs = [S0, W0, b0, S1, W1, b1, ..., out]
#   S_i : (k*k, HWin, HWout)  0/1 shift-selection matrices (per-tap gather)
#   W_i : (k*k, Cout, Cin)    per-tap weights
#   b_i : (Cout, 1)           bias
# Activation layout: (C, HW)  -> channels on sublanes, positions on lanes.
# ----------------------------------------------------------------------------
def _encoder_kernel(x_ref, *refs):
    o_ref = refs[-1]
    n_layers = (len(refs) - 1) // 3

    a = x_ref[0].astype(jnp.float32)                      # (Cin, H*W)
    for i in range(n_layers):
        s_ref = refs[3 * i]
        w_ref = refs[3 * i + 1]
        b_ref = refs[3 * i + 2]
        taps = s_ref.shape[0]
        acc = None
        for t in range(taps):
            # Spatial gather for tap t via MXU: (C, HWin) @ (HWin, HWout).
            g = jnp.dot(a, s_ref[t], preferred_element_type=jnp.float32)
            # Channel mix for tap t: (Cout, Cin) @ (Cin, HWout).
            c = jnp.dot(w_ref[t], g, preferred_element_type=jnp.float32)
            acc = c if acc is None else acc + c
        # Bias + ReLU epilogue in f32.
        a = jnp.maximum(acc + b_ref[...], 0.0)
    o_ref[0] = a.astype(o_ref.dtype)


# ----------------------------------------------------------------------------
# Host-side setup: layer configs, shift matrices, parameters.
# ----------------------------------------------------------------------------
def _shift_matrices(h, w, k, stride, pad):
    """0/1 matrices S[t, p_in, p_out] = 1 iff input position p_in feeds tap t
    of output position p_out (zero columns where the tap falls in padding)."""
    hout = (h + 2 * pad - k) // stride + 1
    wout = (w + 2 * pad - k) // stride + 1
    p_out = jnp.arange(hout * wout)
    y_out, x_out = p_out // wout, p_out % wout
    p_in = jnp.arange(h * w)
    mats = []
    for di in range(k):
        for dj in range(k):
            y_in = y_out * stride + di - pad
            x_in = x_out * stride + dj - pad
            valid = (y_in >= 0) & (y_in < h) & (x_in >= 0) & (x_in < w)
            src = y_in * w + x_in
            mats.append(
                ((p_in[:, None] == src[None, :]) & valid[None, :]).astype(jnp.float32)
            )
    return jnp.stack(mats), hout, wout


def init_encoder(key, in_channels, intra_channels, h, w):
    """Builds the per-layer params of Encoder(in_channels, intra_channels)."""
    layer_defs = [(in_channels, intra_channels[0], 3, 1, 1)]     # ConvBlock(3,1)
    last = intra_channels[0]
    for ch in intra_channels[1:]:
        layer_defs.append((last, ch, 2, 2, 0))                   # ConvBlock(2,2)
        layer_defs.append((ch, ch, 3, 1, 1))                     # ConvBlock(3,1)
        last = ch

    layers = []
    cur_h, cur_w = h, w
    for (cin, cout, k, s, p) in layer_defs:
        key, kw, kb = jax.random.split(key, 3)
        wgt = jax.random.normal(kw, (k * k, cout, cin), jnp.float32) / math.sqrt(
            k * k * cin
        )
        bias = 0.01 * jax.random.normal(kb, (cout, 1), jnp.float32)
        S, cur_h, cur_w = _shift_matrices(cur_h, cur_w, k, s, p)
        layers.append(
            dict(S=S, w=wgt, b=bias, k=k, stride=s, pad=p, out_hw=(cur_h, cur_w))
        )
    return layers


# ----------------------------------------------------------------------------
# Forward: single pallas_call for the whole encoder.
# ----------------------------------------------------------------------------
def encoder_forward(layers, x_nchw, *, requires_points_num_list=True,
                    points_num_scaler=1.0):
    B, C, H, W = x_nchw.shape
    x_flat = x_nchw.reshape(B, C, H * W)       # NCHW is already (C, HW) per sample

    in_specs = [pl.BlockSpec((1, C, H * W), lambda b: (b, 0, 0))]
    inputs = [x_flat]
    for L in layers:
        in_specs.append(pl.BlockSpec(L["S"].shape, lambda b: (0, 0, 0)))
        in_specs.append(pl.BlockSpec(L["w"].shape, lambda b: (0, 0, 0)))
        in_specs.append(pl.BlockSpec(L["b"].shape, lambda b: (0, 0)))
        inputs += [L["S"], L["w"], L["b"]]

    c_out = layers[-1]["w"].shape[1]
    h_out, w_out = layers[-1]["out_hw"]

    out = pl.pallas_call(
        _encoder_kernel,
        out_shape=jax.ShapeDtypeStruct((B, c_out, h_out * w_out), x_nchw.dtype),
        grid_spec=pltpu.PrefetchScalarGridSpec(
            num_scalar_prefetch=0,
            grid=(B,),
            in_specs=in_specs,
            out_specs=pl.BlockSpec((1, c_out, h_out * w_out), lambda b: (b, 0, 0)),
        ),
        compiler_params=pltpu.CompilerParams(
            dimension_semantics=("parallel",),
        ),
    )(*inputs)
    out = out.reshape(B, c_out, h_out, w_out)

    # points_num_list mirrors the module: per-sample point counts after every
    # block except the last, scaled.  Dense analogue: full grid size per sample.
    points_num_list = None
    if requires_points_num_list:
        points_num_list = []
        n_blocks = 1 + (len(layers) - 1) // 2
        block_last_layer = [0] + [2 * i for i in range(1, n_blocks)]
        for li in block_last_layer[:-1]:
            hh, ww = layers[li]["out_hw"]
            points_num_list.append([int(hh * ww * points_num_scaler)] * B)
    return out, points_num_list


# ----------------------------------------------------------------------------
# Demo / correctness check
# ----------------------------------------------------------------------------
if __name__ == "__main__":
    key = jax.random.PRNGKey(0)
    k_param, k_x = jax.random.split(key)

    IN_CH = 4
    INTRA = (16, 32)
    B, H, W = 2, 16, 16
    SCALER = 0.5

    layers = init_encoder(k_param, IN_CH, INTRA, H, W)
    x = jax.random.normal(k_x, (B, IN_CH, H, W), jnp.float32)

    out, pts = encoder_forward(
        layers, x, requires_points_num_list=True, points_num_scaler=SCALER
    )
    out = jax.block_until_ready(out)

    # Pure-JAX dense reference with the same weights.
    ref = x
    for L in layers:
        k = L["k"]
        kk, cout, cin = L["w"].shape
        w_conv = L["w"].reshape(k, k, cout, cin).transpose(2, 3, 0, 1)   # OIHW
        ref = lax.conv_general_dilated(
            ref, w_conv,
            window_strides=(L["stride"], L["stride"]),
            padding=[(L["pad"], L["pad"]), (L["pad"], L["pad"])],
            dimension_numbers=("NCHW", "OIHW", "NCHW"),
        )
        ref = jnp.maximum(ref + L["b"].reshape(1, cout, 1, 1), 0.0)

    assert out.shape == (B, INTRA[-1], H // 2, W // 2), out.shape
    rel_err = float(jnp.linalg.norm(out - ref) / (jnp.linalg.norm(ref) + 1e-12))
    assert rel_err < 1e-2, f"relative error too large: {rel_err}"
    assert pts == [[int(H * W * SCALER)] * B], pts
    print("KERNEL_OK")
</pallas_src>

<mosaic_0001>
module attributes {stable_mosaic.version = 11 : i64} {
  func.func @_encoder_kernel(%arg0: i32, %arg1: memref<1x4x256xf32, #tpu.memory_space<vmem>>, %arg2: memref<9x256x256xf32, #tpu.memory_space<vmem>>, %arg3: memref<9x16x4xf32, #tpu.memory_space<vmem>>, %arg4: memref<16x1xf32, #tpu.memory_space<vmem>>, %arg5: memref<4x256x64xf32, #tpu.memory_space<vmem>>, %arg6: memref<4x32x16xf32, #tpu.memory_space<vmem>>, %arg7: memref<32x1xf32, #tpu.memory_space<vmem>>, %arg8: memref<9x64x64xf32, #tpu.memory_space<vmem>>, %arg9: memref<9x32x32xf32, #tpu.memory_space<vmem>>, %arg10: memref<32x1xf32, #tpu.memory_space<vmem>>, %arg11: memref<1x32x64xf32, #tpu.memory_space<vmem>>) attributes {dimension_semantics = [#tpu.dimension_semantics<parallel>], iteration_bounds = array<i64: 2>, scalar_prefetch = 0 : i64, scratch_operands = 0 : i64, tpu.core_type = #tpu.core_type<tc>, window_params = [{transform_indices = @transform_0, window_bounds = array<i64: 1, 4, 256>}, {pipeline_mode = #tpu.pipeline_mode<synchronous>, transform_indices = @transform_1, window_bounds = array<i64: 9, 256, 256>}, {pipeline_mode = #tpu.pipeline_mode<synchronous>, transform_indices = @transform_2, window_bounds = array<i64: 9, 16, 4>}, {pipeline_mode = #tpu.pipeline_mode<synchronous>, transform_indices = @transform_3, window_bounds = array<i64: 16, 1>}, {pipeline_mode = #tpu.pipeline_mode<synchronous>, transform_indices = @transform_4, window_bounds = array<i64: 4, 256, 64>}, {pipeline_mode = #tpu.pipeline_mode<synchronous>, transform_indices = @transform_5, window_bounds = array<i64: 4, 32, 16>}, {pipeline_mode = #tpu.pipeline_mode<synchronous>, transform_indices = @transform_6, window_bounds = array<i64: 32, 1>}, {pipeline_mode = #tpu.pipeline_mode<synchronous>, transform_indices = @transform_7, window_bounds = array<i64: 9, 64, 64>}, {pipeline_mode = #tpu.pipeline_mode<synchronous>, transform_indices = @transform_8, window_bounds = array<i64: 9, 32, 32>}, {pipeline_mode = #tpu.pipeline_mode<synchronous>, transform_indices = @transform_9, window_bounds = array<i64: 32, 1>}, {transform_indices = @transform_10, window_bounds = array<i64: 1, 32, 64>}]} {
    %c0 = arith.constant 0 : index
    %c0_0 = arith.constant 0 : index
    %c0_1 = arith.constant 0 : index
    %0 = vector.load %arg1[%c0, %c0_0, %c0_1] : memref<1x4x256xf32, #tpu.memory_space<vmem>>, vector<1x4x256xf32>
    %1 = vector.shape_cast %0 : vector<1x4x256xf32> to vector<4x256xf32>
    %c0_2 = arith.constant 0 : index
    %c0_3 = arith.constant 0 : index
    %c0_4 = arith.constant 0 : index
    %2 = vector.load %arg2[%c0_2, %c0_3, %c0_4] : memref<9x256x256xf32, #tpu.memory_space<vmem>>, vector<1x256x256xf32>
    %3 = vector.shape_cast %2 : vector<1x256x256xf32> to vector<256x256xf32>
    %cst = arith.constant dense<0.000000e+00> : vector<4x256xf32>
    %4 = tpu.matmul %1, %3, %cst {dimension_numbers = #tpu.dot_dimension_numbers<[1], [0], [0], [1], [0, 0, 1, 1], [], []>} : vector<4x256xf32>, vector<256x256xf32>, vector<4x256xf32> -> vector<4x256xf32>
    %c0_5 = arith.constant 0 : index
    %c0_6 = arith.constant 0 : index
    %c0_7 = arith.constant 0 : index
    %5 = vector.load %arg3[%c0_5, %c0_6, %c0_7] : memref<9x16x4xf32, #tpu.memory_space<vmem>>, vector<1x16x4xf32>
    %6 = vector.shape_cast %5 : vector<1x16x4xf32> to vector<16x4xf32>
    %cst_8 = arith.constant dense<0.000000e+00> : vector<16x256xf32>
    %7 = tpu.matmul %6, %4, %cst_8 {dimension_numbers = #tpu.dot_dimension_numbers<[1], [0], [0], [1], [0, 0, 1, 1], [], []>} : vector<16x4xf32>, vector<4x256xf32>, vector<16x256xf32> -> vector<16x256xf32>
    %c1 = arith.constant 1 : index
    %c0_9 = arith.constant 0 : index
    %c0_10 = arith.constant 0 : index
    %8 = vector.load %arg2[%c1, %c0_9, %c0_10] : memref<9x256x256xf32, #tpu.memory_space<vmem>>, vector<1x256x256xf32>
    %9 = vector.shape_cast %8 : vector<1x256x256xf32> to vector<256x256xf32>
    %cst_11 = arith.constant dense<0.000000e+00> : vector<4x256xf32>
    %10 = tpu.matmul %1, %9, %cst_11 {dimension_numbers = #tpu.dot_dimension_numbers<[1], [0], [0], [1], [0, 0, 1, 1], [], []>} : vector<4x256xf32>, vector<256x256xf32>, vector<4x256xf32> -> vector<4x256xf32>
    %c1_12 = arith.constant 1 : index
    %c0_13 = arith.constant 0 : index
    %c0_14 = arith.constant 0 : index
    %11 = vector.load %arg3[%c1_12, %c0_13, %c0_14] : memref<9x16x4xf32, #tpu.memory_space<vmem>>, vector<1x16x4xf32>
    %12 = vector.shape_cast %11 : vector<1x16x4xf32> to vector<16x4xf32>
    %cst_15 = arith.constant dense<0.000000e+00> : vector<16x256xf32>
    %13 = tpu.matmul %12, %10, %cst_15 {dimension_numbers = #tpu.dot_dimension_numbers<[1], [0], [0], [1], [0, 0, 1, 1], [], []>} : vector<16x4xf32>, vector<4x256xf32>, vector<16x256xf32> -> vector<16x256xf32>
    %14 = arith.addf %7, %13 : vector<16x256xf32>
    %c2 = arith.constant 2 : index
    %c0_16 = arith.constant 0 : index
    %c0_17 = arith.constant 0 : index
    %15 = vector.load %arg2[%c2, %c0_16, %c0_17] : memref<9x256x256xf32, #tpu.memory_space<vmem>>, vector<1x256x256xf32>
    %16 = vector.shape_cast %15 : vector<1x256x256xf32> to vector<256x256xf32>
    %cst_18 = arith.constant dense<0.000000e+00> : vector<4x256xf32>
    %17 = tpu.matmul %1, %16, %cst_18 {dimension_numbers = #tpu.dot_dimension_numbers<[1], [0], [0], [1], [0, 0, 1, 1], [], []>} : vector<4x256xf32>, vector<256x256xf32>, vector<4x256xf32> -> vector<4x256xf32>
    %c2_19 = arith.constant 2 : index
    %c0_20 = arith.constant 0 : index
    %c0_21 = arith.constant 0 : index
    %18 = vector.load %arg3[%c2_19, %c0_20, %c0_21] : memref<9x16x4xf32, #tpu.memory_space<vmem>>, vector<1x16x4xf32>
    %19 = vector.shape_cast %18 : vector<1x16x4xf32> to vector<16x4xf32>
    %cst_22 = arith.constant dense<0.000000e+00> : vector<16x256xf32>
    %20 = tpu.matmul %19, %17, %cst_22 {dimension_numbers = #tpu.dot_dimension_numbers<[1], [0], [0], [1], [0, 0, 1, 1], [], []>} : vector<16x4xf32>, vector<4x256xf32>, vector<16x256xf32> -> vector<16x256xf32>
    %21 = arith.addf %14, %20 : vector<16x256xf32>
    %c3 = arith.constant 3 : index
    %c0_23 = arith.constant 0 : index
    %c0_24 = arith.constant 0 : index
    %22 = vector.load %arg2[%c3, %c0_23, %c0_24] : memref<9x256x256xf32, #tpu.memory_space<vmem>>, vector<1x256x256xf32>
    %23 = vector.shape_cast %22 : vector<1x256x256xf32> to vector<256x256xf32>
    %cst_25 = arith.constant dense<0.000000e+00> : vector<4x256xf32>
    %24 = tpu.matmul %1, %23, %cst_25 {dimension_numbers = #tpu.dot_dimension_numbers<[1], [0], [0], [1], [0, 0, 1, 1], [], []>} : vector<4x256xf32>, vector<256x256xf32>, vector<4x256xf32> -> vector<4x256xf32>
    %c3_26 = arith.constant 3 : index
    %c0_27 = arith.constant 0 : index
    %c0_28 = arith.constant 0 : index
    %25 = vector.load %arg3[%c3_26, %c0_27, %c0_28] : memref<9x16x4xf32, #tpu.memory_space<vmem>>, vector<1x16x4xf32>
    %26 = vector.shape_cast %25 : vector<1x16x4xf32> to vector<16x4xf32>
    %cst_29 = arith.constant dense<0.000000e+00> : vector<16x256xf32>
    %27 = tpu.matmul %26, %24, %cst_29 {dimension_numbers = #tpu.dot_dimension_numbers<[1], [0], [0], [1], [0, 0, 1, 1], [], []>} : vector<16x4xf32>, vector<4x256xf32>, vector<16x256xf32> -> vector<16x256xf32>
    %28 = arith.addf %21, %27 : vector<16x256xf32>
    %c4 = arith.constant 4 : index
    %c0_30 = arith.constant 0 : index
    %c0_31 = arith.constant 0 : index
    %29 = vector.load %arg2[%c4, %c0_30, %c0_31] : memref<9x256x256xf32, #tpu.memory_space<vmem>>, vector<1x256x256xf32>
    %30 = vector.shape_cast %29 : vector<1x256x256xf32> to vector<256x256xf32>
    %cst_32 = arith.constant dense<0.000000e+00> : vector<4x256xf32>
    %31 = tpu.matmul %1, %30, %cst_32 {dimension_numbers = #tpu.dot_dimension_numbers<[1], [0], [0], [1], [0, 0, 1, 1], [], []>} : vector<4x256xf32>, vector<256x256xf32>, vector<4x256xf32> -> vector<4x256xf32>
    %c4_33 = arith.constant 4 : index
    %c0_34 = arith.constant 0 : index
    %c0_35 = arith.constant 0 : index
    %32 = vector.load %arg3[%c4_33, %c0_34, %c0_35] : memref<9x16x4xf32, #tpu.memory_space<vmem>>, vector<1x16x4xf32>
    %33 = vector.shape_cast %32 : vector<1x16x4xf32> to vector<16x4xf32>
    %cst_36 = arith.constant dense<0.000000e+00> : vector<16x256xf32>
    %34 = tpu.matmul %33, %31, %cst_36 {dimension_numbers = #tpu.dot_dimension_numbers<[1], [0], [0], [1], [0, 0, 1, 1], [], []>} : vector<16x4xf32>, vector<4x256xf32>, vector<16x256xf32> -> vector<16x256xf32>
    %35 = arith.addf %28, %34 : vector<16x256xf32>
    %c5 = arith.constant 5 : index
    %c0_37 = arith.constant 0 : index
    %c0_38 = arith.constant 0 : index
    %36 = vector.load %arg2[%c5, %c0_37, %c0_38] : memref<9x256x256xf32, #tpu.memory_space<vmem>>, vector<1x256x256xf32>
    %37 = vector.shape_cast %36 : vector<1x256x256xf32> to vector<256x256xf32>
    %cst_39 = arith.constant dense<0.000000e+00> : vector<4x256xf32>
    %38 = tpu.matmul %1, %37, %cst_39 {dimension_numbers = #tpu.dot_dimension_numbers<[1], [0], [0], [1], [0, 0, 1, 1], [], []>} : vector<4x256xf32>, vector<256x256xf32>, vector<4x256xf32> -> vector<4x256xf32>
    %c5_40 = arith.constant 5 : index
    %c0_41 = arith.constant 0 : index
    %c0_42 = arith.constant 0 : index
    %39 = vector.load %arg3[%c5_40, %c0_41, %c0_42] : memref<9x16x4xf32, #tpu.memory_space<vmem>>, vector<1x16x4xf32>
    %40 = vector.shape_cast %39 : vector<1x16x4xf32> to vector<16x4xf32>
    %cst_43 = arith.constant dense<0.000000e+00> : vector<16x256xf32>
    %41 = tpu.matmul %40, %38, %cst_43 {dimension_numbers = #tpu.dot_dimension_numbers<[1], [0], [0], [1], [0, 0, 1, 1], [], []>} : vector<16x4xf32>, vector<4x256xf32>, vector<16x256xf32> -> vector<16x256xf32>
    %42 = arith.addf %35, %41 : vector<16x256xf32>
    %c6 = arith.constant 6 : index
    %c0_44 = arith.constant 0 : index
    %c0_45 = arith.constant 0 : index
    %43 = vector.load %arg2[%c6, %c0_44, %c0_45] : memref<9x256x256xf32, #tpu.memory_space<vmem>>, vector<1x256x256xf32>
    %44 = vector.shape_cast %43 : vector<1x256x256xf32> to vector<256x256xf32>
    %cst_46 = arith.constant dense<0.000000e+00> : vector<4x256xf32>
    %45 = tpu.matmul %1, %44, %cst_46 {dimension_numbers = #tpu.dot_dimension_numbers<[1], [0], [0], [1], [0, 0, 1, 1], [], []>} : vector<4x256xf32>, vector<256x256xf32>, vector<4x256xf32> -> vector<4x256xf32>
    %c6_47 = arith.constant 6 : index
    %c0_48 = arith.constant 0 : index
    %c0_49 = arith.constant 0 : index
    %46 = vector.load %arg3[%c6_47, %c0_48, %c0_49] : memref<9x16x4xf32, #tpu.memory_space<vmem>>, vector<1x16x4xf32>
    %47 = vector.shape_cast %46 : vector<1x16x4xf32> to vector<16x4xf32>
    %cst_50 = arith.constant dense<0.000000e+00> : vector<16x256xf32>
    %48 = tpu.matmul %47, %45, %cst_50 {dimension_numbers = #tpu.dot_dimension_numbers<[1], [0], [0], [1], [0, 0, 1, 1], [], []>} : vector<16x4xf32>, vector<4x256xf32>, vector<16x256xf32> -> vector<16x256xf32>
    %49 = arith.addf %42, %48 : vector<16x256xf32>
    %c7 = arith.constant 7 : index
    %c0_51 = arith.constant 0 : index
    %c0_52 = arith.constant 0 : index
    %50 = vector.load %arg2[%c7, %c0_51, %c0_52] : memref<9x256x256xf32, #tpu.memory_space<vmem>>, vector<1x256x256xf32>
    %51 = vector.shape_cast %50 : vector<1x256x256xf32> to vector<256x256xf32>
    %cst_53 = arith.constant dense<0.000000e+00> : vector<4x256xf32>
    %52 = tpu.matmul %1, %51, %cst_53 {dimension_numbers = #tpu.dot_dimension_numbers<[1], [0], [0], [1], [0, 0, 1, 1], [], []>} : vector<4x256xf32>, vector<256x256xf32>, vector<4x256xf32> -> vector<4x256xf32>
    %c7_54 = arith.constant 7 : index
    %c0_55 = arith.constant 0 : index
    %c0_56 = arith.constant 0 : index
    %53 = vector.load %arg3[%c7_54, %c0_55, %c0_56] : memref<9x16x4xf32, #tpu.memory_space<vmem>>, vector<1x16x4xf32>
    %54 = vector.shape_cast %53 : vector<1x16x4xf32> to vector<16x4xf32>
    %cst_57 = arith.constant dense<0.000000e+00> : vector<16x256xf32>
    %55 = tpu.matmul %54, %52, %cst_57 {dimension_numbers = #tpu.dot_dimension_numbers<[1], [0], [0], [1], [0, 0, 1, 1], [], []>} : vector<16x4xf32>, vector<4x256xf32>, vector<16x256xf32> -> vector<16x256xf32>
    %56 = arith.addf %49, %55 : vector<16x256xf32>
    %c8 = arith.constant 8 : index
    %c0_58 = arith.constant 0 : index
    %c0_59 = arith.constant 0 : index
    %57 = vector.load %arg2[%c8, %c0_58, %c0_59] : memref<9x256x256xf32, #tpu.memory_space<vmem>>, vector<1x256x256xf32>
    %58 = vector.shape_cast %57 : vector<1x256x256xf32> to vector<256x256xf32>
    %cst_60 = arith.constant dense<0.000000e+00> : vector<4x256xf32>
    %59 = tpu.matmul %1, %58, %cst_60 {dimension_numbers = #tpu.dot_dimension_numbers<[1], [0], [0], [1], [0, 0, 1, 1], [], []>} : vector<4x256xf32>, vector<256x256xf32>, vector<4x256xf32> -> vector<4x256xf32>
    %c8_61 = arith.constant 8 : index
    %c0_62 = arith.constant 0 : index
    %c0_63 = arith.constant 0 : index
    %60 = vector.load %arg3[%c8_61, %c0_62, %c0_63] : memref<9x16x4xf32, #tpu.memory_space<vmem>>, vector<1x16x4xf32>
    %61 = vector.shape_cast %60 : vector<1x16x4xf32> to vector<16x4xf32>
    %cst_64 = arith.constant dense<0.000000e+00> : vector<16x256xf32>
    %62 = tpu.matmul %61, %59, %cst_64 {dimension_numbers = #tpu.dot_dimension_numbers<[1], [0], [0], [1], [0, 0, 1, 1], [], []>} : vector<16x4xf32>, vector<4x256xf32>, vector<16x256xf32> -> vector<16x256xf32>
    %63 = arith.addf %56, %62 : vector<16x256xf32>
    %c0_65 = arith.constant 0 : index
    %c0_66 = arith.constant 0 : index
    %64 = vector.load %arg4[%c0_65, %c0_66] : memref<16x1xf32, #tpu.memory_space<vmem>>, vector<16x1xf32>
    %65 = vector.broadcast %64 : vector<16x1xf32> to vector<16x256xf32>
    %66 = arith.addf %63, %65 : vector<16x256xf32>
    %cst_67 = arith.constant 0.000000e+00 : f32
    %67 = vector.broadcast %cst_67 : f32 to vector<16x256xf32>
    %68 = arith.maximumf %66, %67 : vector<16x256xf32>
    %c0_68 = arith.constant 0 : index
    %c0_69 = arith.constant 0 : index
    %c0_70 = arith.constant 0 : index
    %69 = vector.load %arg5[%c0_68, %c0_69, %c0_70] : memref<4x256x64xf32, #tpu.memory_space<vmem>>, vector<1x256x64xf32>
    %70 = vector.shape_cast %69 : vector<1x256x64xf32> to vector<256x64xf32>
    %cst_71 = arith.constant dense<0.000000e+00> : vector<16x64xf32>
    %71 = tpu.matmul %68, %70, %cst_71 {dimension_numbers = #tpu.dot_dimension_numbers<[1], [0], [0], [1], [0, 0, 1, 1], [], []>} : vector<16x256xf32>, vector<256x64xf32>, vector<16x64xf32> -> vector<16x64xf32>
    %c0_72 = arith.constant 0 : index
    %c0_73 = arith.constant 0 : index
    %c0_74 = arith.constant 0 : index
    %72 = vector.load %arg6[%c0_72, %c0_73, %c0_74] : memref<4x32x16xf32, #tpu.memory_space<vmem>>, vector<1x32x16xf32>
    %73 = vector.shape_cast %72 : vector<1x32x16xf32> to vector<32x16xf32>
    %cst_75 = arith.constant dense<0.000000e+00> : vector<32x64xf32>
    %74 = tpu.matmul %73, %71, %cst_75 {dimension_numbers = #tpu.dot_dimension_numbers<[1], [0], [0], [1], [0, 0, 1, 1], [], []>} : vector<32x16xf32>, vector<16x64xf32>, vector<32x64xf32> -> vector<32x64xf32>
    %c1_76 = arith.constant 1 : index
    %c0_77 = arith.constant 0 : index
    %c0_78 = arith.constant 0 : index
    %75 = vector.load %arg5[%c1_76, %c0_77, %c0_78] : memref<4x256x64xf32, #tpu.memory_space<vmem>>, vector<1x256x64xf32>
    %76 = vector.shape_cast %75 : vector<1x256x64xf32> to vector<256x64xf32>
    %cst_79 = arith.constant dense<0.000000e+00> : vector<16x64xf32>
    %77 = tpu.matmul %68, %76, %cst_79 {dimension_numbers = #tpu.dot_dimension_numbers<[1], [0], [0], [1], [0, 0, 1, 1], [], []>} : vector<16x256xf32>, vector<256x64xf32>, vector<16x64xf32> -> vector<16x64xf32>
    %c1_80 = arith.constant 1 : index
    %c0_81 = arith.constant 0 : index
    %c0_82 = arith.constant 0 : index
    %78 = vector.load %arg6[%c1_80, %c0_81, %c0_82] : memref<4x32x16xf32, #tpu.memory_space<vmem>>, vector<1x32x16xf32>
    %79 = vector.shape_cast %78 : vector<1x32x16xf32> to vector<32x16xf32>
    %cst_83 = arith.constant dense<0.000000e+00> : vector<32x64xf32>
    %80 = tpu.matmul %79, %77, %cst_83 {dimension_numbers = #tpu.dot_dimension_numbers<[1], [0], [0], [1], [0, 0, 1, 1], [], []>} : vector<32x16xf32>, vector<16x64xf32>, vector<32x64xf32> -> vector<32x64xf32>
    %81 = arith.addf %74, %80 : vector<32x64xf32>
    %c2_84 = arith.constant 2 : index
    %c0_85 = arith.constant 0 : index
    %c0_86 = arith.constant 0 : index
    %82 = vector.load %arg5[%c2_84, %c0_85, %c0_86] : memref<4x256x64xf32, #tpu.memory_space<vmem>>, vector<1x256x64xf32>
    %83 = vector.shape_cast %82 : vector<1x256x64xf32> to vector<256x64xf32>
    %cst_87 = arith.constant dense<0.000000e+00> : vector<16x64xf32>
    %84 = tpu.matmul %68, %83, %cst_87 {dimension_numbers = #tpu.dot_dimension_numbers<[1], [0], [0], [1], [0, 0, 1, 1], [], []>} : vector<16x256xf32>, vector<256x64xf32>, vector<16x64xf32> -> vector<16x64xf32>
    %c2_88 = arith.constant 2 : index
    %c0_89 = arith.constant 0 : index
    %c0_90 = arith.constant 0 : index
    %85 = vector.load %arg6[%c2_88, %c0_89, %c0_90] : memref<4x32x16xf32, #tpu.memory_space<vmem>>, vector<1x32x16xf32>
    %86 = vector.shape_cast %85 : vector<1x32x16xf32> to vector<32x16xf32>
    %cst_91 = arith.constant dense<0.000000e+00> : vector<32x64xf32>
    %87 = tpu.matmul %86, %84, %cst_91 {dimension_numbers = #tpu.dot_dimension_numbers<[1], [0], [0], [1], [0, 0, 1, 1], [], []>} : vector<32x16xf32>, vector<16x64xf32>, vector<32x64xf32> -> vector<32x64xf32>
    %88 = arith.addf %81, %87 : vector<32x64xf32>
    %c3_92 = arith.constant 3 : index
    %c0_93 = arith.constant 0 : index
    %c0_94 = arith.constant 0 : index
    %89 = vector.load %arg5[%c3_92, %c0_93, %c0_94] : memref<4x256x64xf32, #tpu.memory_space<vmem>>, vector<1x256x64xf32>
    %90 = vector.shape_cast %89 : vector<1x256x64xf32> to vector<256x64xf32>
    %cst_95 = arith.constant dense<0.000000e+00> : vector<16x64xf32>
    %91 = tpu.matmul %68, %90, %cst_95 {dimension_numbers = #tpu.dot_dimension_numbers<[1], [0], [0], [1], [0, 0, 1, 1], [], []>} : vector<16x256xf32>, vector<256x64xf32>, vector<16x64xf32> -> vector<16x64xf32>
    %c3_96 = arith.constant 3 : index
    %c0_97 = arith.constant 0 : index
    %c0_98 = arith.constant 0 : index
    %92 = vector.load %arg6[%c3_96, %c0_97, %c0_98] : memref<4x32x16xf32, #tpu.memory_space<vmem>>, vector<1x32x16xf32>
    %93 = vector.shape_cast %92 : vector<1x32x16xf32> to vector<32x16xf32>
    %cst_99 = arith.constant dense<0.000000e+00> : vector<32x64xf32>
    %94 = tpu.matmul %93, %91, %cst_99 {dimension_numbers = #tpu.dot_dimension_numbers<[1], [0], [0], [1], [0, 0, 1, 1], [], []>} : vector<32x16xf32>, vector<16x64xf32>, vector<32x64xf32> -> vector<32x64xf32>
    %95 = arith.addf %88, %94 : vector<32x64xf32>
    %c0_100 = arith.constant 0 : index
    %c0_101 = arith.constant 0 : index
    %96 = vector.load %arg7[%c0_100, %c0_101] : memref<32x1xf32, #tpu.memory_space<vmem>>, vector<32x1xf32>
    %97 = vector.broadcast %96 : vector<32x1xf32> to vector<32x64xf32>
    %98 = arith.addf %95, %97 : vector<32x64xf32>
    %cst_102 = arith.constant 0.000000e+00 : f32
    %99 = vector.broadcast %cst_102 : f32 to vector<32x64xf32>
    %100 = arith.maximumf %98, %99 : vector<32x64xf32>
    %c0_103 = arith.constant 0 : index
    %c0_104 = arith.constant 0 : index
    %c0_105 = arith.constant 0 : index
    %101 = vector.load %arg8[%c0_103, %c0_104, %c0_105] : memref<9x64x64xf32, #tpu.memory_space<vmem>>, vector<1x64x64xf32>
    %102 = vector.shape_cast %101 : vector<1x64x64xf32> to vector<64x64xf32>
    %cst_106 = arith.constant dense<0.000000e+00> : vector<32x64xf32>
    %103 = tpu.matmul %100, %102, %cst_106 {dimension_numbers = #tpu.dot_dimension_numbers<[1], [0], [0], [1], [0, 0, 1, 1], [], []>} : vector<32x64xf32>, vector<64x64xf32>, vector<32x64xf32> -> vector<32x64xf32>
    %c0_107 = arith.constant 0 : index
    %c0_108 = arith.constant 0 : index
    %c0_109 = arith.constant 0 : index
    %104 = vector.load %arg9[%c0_107, %c0_108, %c0_109] : memref<9x32x32xf32, #tpu.memory_space<vmem>>, vector<1x32x32xf32>
    %105 = vector.shape_cast %104 : vector<1x32x32xf32> to vector<32x32xf32>
    %cst_110 = arith.constant dense<0.000000e+00> : vector<32x64xf32>
    %106 = tpu.matmul %105, %103, %cst_110 {dimension_numbers = #tpu.dot_dimension_numbers<[1], [0], [0], [1], [0, 0, 1, 1], [], []>} : vector<32x32xf32>, vector<32x64xf32>, vector<32x64xf32> -> vector<32x64xf32>
    %c1_111 = arith.constant 1 : index
    %c0_112 = arith.constant 0 : index
    %c0_113 = arith.constant 0 : index
    %107 = vector.load %arg8[%c1_111, %c0_112, %c0_113] : memref<9x64x64xf32, #tpu.memory_space<vmem>>, vector<1x64x64xf32>
    %108 = vector.shape_cast %107 : vector<1x64x64xf32> to vector<64x64xf32>
    %cst_114 = arith.constant dense<0.000000e+00> : vector<32x64xf32>
    %109 = tpu.matmul %100, %108, %cst_114 {dimension_numbers = #tpu.dot_dimension_numbers<[1], [0], [0], [1], [0, 0, 1, 1], [], []>} : vector<32x64xf32>, vector<64x64xf32>, vector<32x64xf32> -> vector<32x64xf32>
    %c1_115 = arith.constant 1 : index
    %c0_116 = arith.constant 0 : index
    %c0_117 = arith.constant 0 : index
    %110 = vector.load %arg9[%c1_115, %c0_116, %c0_117] : memref<9x32x32xf32, #tpu.memory_space<vmem>>, vector<1x32x32xf32>
    %111 = vector.shape_cast %110 : vector<1x32x32xf32> to vector<32x32xf32>
    %cst_118 = arith.constant dense<0.000000e+00> : vector<32x64xf32>
    %112 = tpu.matmul %111, %109, %cst_118 {dimension_numbers = #tpu.dot_dimension_numbers<[1], [0], [0], [1], [0, 0, 1, 1], [], []>} : vector<32x32xf32>, vector<32x64xf32>, vector<32x64xf32> -> vector<32x64xf32>
    %113 = arith.addf %106, %112 : vector<32x64xf32>
    %c2_119 = arith.constant 2 : index
    %c0_120 = arith.constant 0 : index
    %c0_121 = arith.constant 0 : index
    %114 = vector.load %arg8[%c2_119, %c0_120, %c0_121] : memref<9x64x64xf32, #tpu.memory_space<vmem>>, vector<1x64x64xf32>
    %115 = vector.shape_cast %114 : vector<1x64x64xf32> to vector<64x64xf32>
    %cst_122 = arith.constant dense<0.000000e+00> : vector<32x64xf32>
    %116 = tpu.matmul %100, %115, %cst_122 {dimension_numbers = #tpu.dot_dimension_numbers<[1], [0], [0], [1], [0, 0, 1, 1], [], []>} : vector<32x64xf32>, vector<64x64xf32>, vector<32x64xf32> -> vector<32x64xf32>
    %c2_123 = arith.constant 2 : index
    %c0_124 = arith.constant 0 : index
    %c0_125 = arith.constant 0 : index
    %117 = vector.load %arg9[%c2_123, %c0_124, %c0_125] : memref<9x32x32xf32, #tpu.memory_space<vmem>>, vector<1x32x32xf32>
    %118 = vector.shape_cast %117 : vector<1x32x32xf32> to vector<32x32xf32>
    %cst_126 = arith.constant dense<0.000000e+00> : vector<32x64xf32>
    %119 = tpu.matmul %118, %116, %cst_126 {dimension_numbers = #tpu.dot_dimension_numbers<[1], [0], [0], [1], [0, 0, 1, 1], [], []>} : vector<32x32xf32>, vector<32x64xf32>, vector<32x64xf32> -> vector<32x64xf32>
    %120 = arith.addf %113, %119 : vector<32x64xf32>
    %c3_127 = arith.constant 3 : index
    %c0_128 = arith.constant 0 : index
    %c0_129 = arith.constant 0 : index
    %121 = vector.load %arg8[%c3_127, %c0_128, %c0_129] : memref<9x64x64xf32, #tpu.memory_space<vmem>>, vector<1x64x64xf32>
    %122 = vector.shape_cast %121 : vector<1x64x64xf32> to vector<64x64xf32>
    %cst_130 = arith.constant dense<0.000000e+00> : vector<32x64xf32>
    %123 = tpu.matmul %100, %122, %cst_130 {dimension_numbers = #tpu.dot_dimension_numbers<[1], [0], [0], [1], [0, 0, 1, 1], [], []>} : vector<32x64xf32>, vector<64x64xf32>, vector<32x64xf32> -> vector<32x64xf32>
    %c3_131 = arith.constant 3 : index
    %c0_132 = arith.constant 0 : index
    %c0_133 = arith.constant 0 : index
    %124 = vector.load %arg9[%c3_131, %c0_132, %c0_133] : memref<9x32x32xf32, #tpu.memory_space<vmem>>, vector<1x32x32xf32>
    %125 = vector.shape_cast %124 : vector<1x32x32xf32> to vector<32x32xf32>
    %cst_134 = arith.constant dense<0.000000e+00> : vector<32x64xf32>
    %126 = tpu.matmul %125, %123, %cst_134 {dimension_numbers = #tpu.dot_dimension_numbers<[1], [0], [0], [1], [0, 0, 1, 1], [], []>} : vector<32x32xf32>, vector<32x64xf32>, vector<32x64xf32> -> vector<32x64xf32>
    %127 = arith.addf %120, %126 : vector<32x64xf32>
    %c4_135 = arith.constant 4 : index
    %c0_136 = arith.constant 0 : index
    %c0_137 = arith.constant 0 : index
    %128 = vector.load %arg8[%c4_135, %c0_136, %c0_137] : memref<9x64x64xf32, #tpu.memory_space<vmem>>, vector<1x64x64xf32>
    %129 = vector.shape_cast %128 : vector<1x64x64xf32> to vector<64x64xf32>
    %cst_138 = arith.constant dense<0.000000e+00> : vector<32x64xf32>
    %130 = tpu.matmul %100, %129, %cst_138 {dimension_numbers = #tpu.dot_dimension_numbers<[1], [0], [0], [1], [0, 0, 1, 1], [], []>} : vector<32x64xf32>, vector<64x64xf32>, vector<32x64xf32> -> vector<32x64xf32>
    %c4_139 = arith.constant 4 : index
    %c0_140 = arith.constant 0 : index
    %c0_141 = arith.constant 0 : index
    %131 = vector.load %arg9[%c4_139, %c0_140, %c0_141] : memref<9x32x32xf32, #tpu.memory_space<vmem>>, vector<1x32x32xf32>
    %132 = vector.shape_cast %131 : vector<1x32x32xf32> to vector<32x32xf32>
    %cst_142 = arith.constant dense<0.000000e+00> : vector<32x64xf32>
    %133 = tpu.matmul %132, %130, %cst_142 {dimension_numbers = #tpu.dot_dimension_numbers<[1], [0], [0], [1], [0, 0, 1, 1], [], []>} : vector<32x32xf32>, vector<32x64xf32>, vector<32x64xf32> -> vector<32x64xf32>
    %134 = arith.addf %127, %133 : vector<32x64xf32>
    %c5_143 = arith.constant 5 : index
    %c0_144 = arith.constant 0 : index
    %c0_145 = arith.constant 0 : index
    %135 = vector.load %arg8[%c5_143, %c0_144, %c0_145] : memref<9x64x64xf32, #tpu.memory_space<vmem>>, vector<1x64x64xf32>
    %136 = vector.shape_cast %135 : vector<1x64x64xf32> to vector<64x64xf32>
    %cst_146 = arith.constant dense<0.000000e+00> : vector<32x64xf32>
    %137 = tpu.matmul %100, %136, %cst_146 {dimension_numbers = #tpu.dot_dimension_numbers<[1], [0], [0], [1], [0, 0, 1, 1], [], []>} : vector<32x64xf32>, vector<64x64xf32>, vector<32x64xf32> -> vector<32x64xf32>
    %c5_147 = arith.constant 5 : index
    %c0_148 = arith.constant 0 : index
    %c0_149 = arith.constant 0 : index
    %138 = vector.load %arg9[%c5_147, %c0_148, %c0_149] : memref<9x32x32xf32, #tpu.memory_space<vmem>>, vector<1x32x32xf32>
    %139 = vector.shape_cast %138 : vector<1x32x32xf32> to vector<32x32xf32>
    %cst_150 = arith.constant dense<0.000000e+00> : vector<32x64xf32>
    %140 = tpu.matmul %139, %137, %cst_150 {dimension_numbers = #tpu.dot_dimension_numbers<[1], [0], [0], [1], [0, 0, 1, 1], [], []>} : vector<32x32xf32>, vector<32x64xf32>, vector<32x64xf32> -> vector<32x64xf32>
    %141 = arith.addf %134, %140 : vector<32x64xf32>
    %c6_151 = arith.constant 6 : index
    %c0_152 = arith.constant 0 : index
    %c0_153 = arith.constant 0 : index
    %142 = vector.load %arg8[%c6_151, %c0_152, %c0_153] : memref<9x64x64xf32, #tpu.memory_space<vmem>>, vector<1x64x64xf32>
    %143 = vector.shape_cast %142 : vector<1x64x64xf32> to vector<64x64xf32>
    %cst_154 = arith.constant dense<0.000000e+00> : vector<32x64xf32>
    %144 = tpu.matmul %100, %143, %cst_154 {dimension_numbers = #tpu.dot_dimension_numbers<[1], [0], [0], [1], [0, 0, 1, 1], [], []>} : vector<32x64xf32>, vector<64x64xf32>, vector<32x64xf32> -> vector<32x64xf32>
    %c6_155 = arith.constant 6 : index
    %c0_156 = arith.constant 0 : index
    %c0_157 = arith.constant 0 : index
    %145 = vector.load %arg9[%c6_155, %c0_156, %c0_157] : memref<9x32x32xf32, #tpu.memory_space<vmem>>, vector<1x32x32xf32>
    %146 = vector.shape_cast %145 : vector<1x32x32xf32> to vector<32x32xf32>
    %cst_158 = arith.constant dense<0.000000e+00> : vector<32x64xf32>
    %147 = tpu.matmul %146, %144, %cst_158 {dimension_numbers = #tpu.dot_dimension_numbers<[1], [0], [0], [1], [0, 0, 1, 1], [], []>} : vector<32x32xf32>, vector<32x64xf32>, vector<32x64xf32> -> vector<32x64xf32>
    %148 = arith.addf %141, %147 : vector<32x64xf32>
    %c7_159 = arith.constant 7 : index
    %c0_160 = arith.constant 0 : index
    %c0_161 = arith.constant 0 : index
    %149 = vector.load %arg8[%c7_159, %c0_160, %c0_161] : memref<9x64x64xf32, #tpu.memory_space<vmem>>, vector<1x64x64xf32>
    %150 = vector.shape_cast %149 : vector<1x64x64xf32> to vector<64x64xf32>
    %cst_162 = arith.constant dense<0.000000e+00> : vector<32x64xf32>
    %151 = tpu.matmul %100, %150, %cst_162 {dimension_numbers = #tpu.dot_dimension_numbers<[1], [0], [0], [1], [0, 0, 1, 1], [], []>} : vector<32x64xf32>, vector<64x64xf32>, vector<32x64xf32> -> vector<32x64xf32>
    %c7_163 = arith.constant 7 : index
    %c0_164 = arith.constant 0 : index
    %c0_165 = arith.constant 0 : index
    %152 = vector.load %arg9[%c7_163, %c0_164, %c0_165] : memref<9x32x32xf32, #tpu.memory_space<vmem>>, vector<1x32x32xf32>
    %153 = vector.shape_cast %152 : vector<1x32x32xf32> to vector<32x32xf32>
    %cst_166 = arith.constant dense<0.000000e+00> : vector<32x64xf32>
    %154 = tpu.matmul %153, %151, %cst_166 {dimension_numbers = #tpu.dot_dimension_numbers<[1], [0], [0], [1], [0, 0, 1, 1], [], []>} : vector<32x32xf32>, vector<32x64xf32>, vector<32x64xf32> -> vector<32x64xf32>
    %155 = arith.addf %148, %154 : vector<32x64xf32>
    %c8_167 = arith.constant 8 : index
    %c0_168 = arith.constant 0 : index
    %c0_169 = arith.constant 0 : index
    %156 = vector.load %arg8[%c8_167, %c0_168, %c0_169] : memref<9x64x64xf32, #tpu.memory_space<vmem>>, vector<1x64x64xf32>
    %157 = vector.shape_cast %156 : vector<1x64x64xf32> to vector<64x64xf32>
    %cst_170 = arith.constant dense<0.000000e+00> : vector<32x64xf32>
    %158 = tpu.matmul %100, %157, %cst_170 {dimension_numbers = #tpu.dot_dimension_numbers<[1], [0], [0], [1], [0, 0, 1, 1], [], []>} : vector<32x64xf32>, vector<64x64xf32>, vector<32x64xf32> -> vector<32x64xf32>
    %c8_171 = arith.constant 8 : index
    %c0_172 = arith.constant 0 : index
    %c0_173 = arith.constant 0 : index
    %159 = vector.load %arg9[%c8_171, %c0_172, %c0_173] : memref<9x32x32xf32, #tpu.memory_space<vmem>>, vector<1x32x32xf32>
    %160 = vector.shape_cast %159 : vector<1x32x32xf32> to vector<32x32xf32>
    %cst_174 = arith.constant dense<0.000000e+00> : vector<32x64xf32>
    %161 = tpu.matmul %160, %158, %cst_174 {dimension_numbers = #tpu.dot_dimension_numbers<[1], [0], [0], [1], [0, 0, 1, 1], [], []>} : vector<32x32xf32>, vector<32x64xf32>, vector<32x64xf32> -> vector<32x64xf32>
    %162 = arith.addf %155, %161 : vector<32x64xf32>
    %c0_175 = arith.constant 0 : index
    %c0_176 = arith.constant 0 : index
    %163 = vector.load %arg10[%c0_175, %c0_176] : memref<32x1xf32, #tpu.memory_space<vmem>>, vector<32x1xf32>
    %164 = vector.broadcast %163 : vector<32x1xf32> to vector<32x64xf32>
    %165 = arith.addf %162, %164 : vector<32x64xf32>
    %cst_177 = arith.constant 0.000000e+00 : f32
    %166 = vector.broadcast %cst_177 : f32 to vector<32x64xf32>
    %167 = arith.maximumf %165, %166 : vector<32x64xf32>
    %c0_178 = arith.constant 0 : index
    %c0_179 = arith.constant 0 : index
    %c0_180 = arith.constant 0 : index
    %168 = vector.load %arg11[%c0_178, %c0_179, %c0_180] : memref<1x32x64xf32, #tpu.memory_space<vmem>>, vector<1x32x64xf32>
    %169 = vector.shape_cast %168 : vector<1x32x64xf32> to vector<32x64xf32>
    %170 = vector.shape_cast %167 : vector<32x64xf32> to vector<1x32x64xf32>
    tpu.vector_store %arg11[%c0_178, %c0_179, %c0_180], %170 {strides = array<i32>} : memref<1x32x64xf32, #tpu.memory_space<vmem>>, vector<1x32x64xf32>,
    return
  }
  func.func @transform_0(%arg0: i32) -> (i32, i32, i32) {
    %c0_i32 = arith.constant 0 : i32
    %c0_i32_0 = arith.constant 0 : i32
    %c0_i32_1 = arith.constant 0 : i32
    return %arg0, %c0_i32, %c0_i32_0 : i32, i32, i32
  }
  func.func @transform_1(%arg0: i32) -> (i32, i32, i32) {
    %c0_i32 = arith.constant 0 : i32
    %c0_i32_0 = arith.constant 0 : i32
    %c0_i32_1 = arith.constant 0 : i32
    %c0_i32_2 = arith.constant 0 : i32
    return %c0_i32, %c0_i32_0, %c0_i32_1 : i32, i32, i32
  }
  func.func @transform_2(%arg0: i32) -> (i32, i32, i32) {
    %c0_i32 = arith.constant 0 : i32
    %c0_i32_0 = arith.constant 0 : i32
    %c0_i32_1 = arith.constant 0 : i32
    %c0_i32_2 = arith.constant 0 : i32
    return %c0_i32, %c0_i32_0, %c0_i32_1 : i32, i32, i32
  }
  func.func @transform_3(%arg0: i32) -> (i32, i32) {
    %c0_i32 = arith.constant 0 : i32
    %c0_i32_0 = arith.constant 0 : i32
    %c0_i32_1 = arith.constant 0 : i32
    return %c0_i32, %c0_i32_0 : i32, i32
  }
  func.func @transform_4(%arg0: i32) -> (i32, i32, i32) {
    %c0_i32 = arith.constant 0 : i32
    %c0_i32_0 = arith.constant 0 : i32
    %c0_i32_1 = arith.constant 0 : i32
    %c0_i32_2 = arith.constant 0 : i32
    return %c0_i32, %c0_i32_0, %c0_i32_1 : i32, i32, i32
  }
  func.func @transform_5(%arg0: i32) -> (i32, i32, i32) {
    %c0_i32 = arith.constant 0 : i32
    %c0_i32_0 = arith.constant 0 : i32
    %c0_i32_1 = arith.constant 0 : i32
    %c0_i32_2 = arith.constant 0 : i32
    return %c0_i32, %c0_i32_0, %c0_i32_1 : i32, i32, i32
  }
  func.func @transform_6(%arg0: i32) -> (i32, i32) {
    %c0_i32 = arith.constant 0 : i32
    %c0_i32_0 = arith.constant 0 : i32
    %c0_i32_1 = arith.constant 0 : i32
    return %c0_i32, %c0_i32_0 : i32, i32
  }
  func.func @transform_7(%arg0: i32) -> (i32, i32, i32) {
    %c0_i32 = arith.constant 0 : i32
    %c0_i32_0 = arith.constant 0 : i32
    %c0_i32_1 = arith.constant 0 : i32
    %c0_i32_2 = arith.constant 0 : i32
    return %c0_i32, %c0_i32_0, %c0_i32_1 : i32, i32, i32
  }
  func.func @transform_8(%arg0: i32) -> (i32, i32, i32) {
    %c0_i32 = arith.constant 0 : i32
    %c0_i32_0 = arith.constant 0 : i32
    %c0_i32_1 = arith.constant 0 : i32
    %c0_i32_2 = arith.constant 0 : i32
    return %c0_i32, %c0_i32_0, %c0_i32_1 : i32, i32, i32
  }
  func.func @transform_9(%arg0: i32) -> (i32, i32) {
    %c0_i32 = arith.constant 0 : i32
    %c0_i32_0 = arith.constant 0 : i32
    %c0_i32_1 = arith.constant 0 : i32
    return %c0_i32, %c0_i32_0 : i32, i32
  }
  func.func @transform_10(%arg0: i32) -> (i32, i32, i32) {
    %c0_i32 = arith.constant 0 : i32
    %c0_i32_0 = arith.constant 0 : i32
    %c0_i32_1 = arith.constant 0 : i32
    return %arg0, %c0_i32, %c0_i32_0 : i32, i32, i32
  }
}

</mosaic_0001>

<bundles_post_ra>
// kernel: tpu_custom_call.1
= control target key start
LH: loop header
LB: loop body
LE: loop exit
PB: predicated region body
PF: predicated region fallthrough
CT: control target
= control target key end

     0   :  { %s7734_s0 = inlined_call_operand.hbm [shape: f32[2,4,256], index: 0, kind: input, shape index: {}]   ;;  %s7735_s1 = inlined_call_operand.hbm [shape: f32[9,256,256], index: 1, kind: input, shape index: {}]   ;;  %s7736_s2 = inlined_call_operand.vmem [shape: f32[9,16,4], index: 2, kind: input, shape index: {}]   ;;  %s7737_s3 = inlined_call_operand.vmem [shape: f32[16,1], index: 3, kind: input, shape index: {}]   ;;  %s7738_s4 = inlined_call_operand.vmem [shape: f32[4,256,64], index: 4, kind: input, shape index: {}]   ;;  %s7739_s5 = inlined_call_operand.vmem [shape: f32[4,32,16], index: 5, kind: input, shape index: {}]   ;;  %s7740_s6 = inlined_call_operand.vmem [shape: f32[32,1], index: 6, kind: input, shape index: {}]   ;;  %s7741_s7 = inlined_call_operand.hbm [shape: f32[9,64,64], index: 7, kind: input, shape index: {}]   ;;  %s7742_s8 = inlined_call_operand.hbm [shape: f32[9,32,32], index: 8, kind: input, shape index: {}]   ;;  %s7743_s9 = inlined_call_operand.vmem [shape: f32[32,1], index: 9, kind: input, shape index: {}]   ;;  %s7744_s10 = inlined_call_operand.hbm [shape: f32[2,32,64], index: 10, kind: output, shape index: {}]  }
   0x1   :  { %7750 = sst [smem:[#allocation17_spill]] %s7735_s1 }
   0x2   :  { %7751 = sst [smem:[#allocation18_spill]] %s7741_s7 }
   0x3   :  { %7752 = sst [smem:[#allocation19_spill]] %s7742_s8 }
   0x4   :  { %15 = vsyncpa [#allocation3], 0 }
   0x5   :  { %17 = vsyncpa [#allocation3 + $0x1], 0 }
   0x6   :  { %18 = vsyncpa [#allocation6], 0 }
   0x7   :  { %19 = vsyncpa [#allocation9], 0 }
   0x8   :  { %20 = vsyncpa [#allocation4], 0 }
   0x9   :  { %22 = vsyncpa [#allocation4 + $0x1], 0  ;;  %s6686_s13 = smov 0   ;;  %s6688_s14 = smov 0  }
   0xa   :  { %s6690_s15 = smov 0   ;;  %s6692_s16 = smov 0  }
   0xb LB: > { %7753 = sst [smem:[#allocation15_spill]] %s6612_s15  ;;  %s6707_s17 = sadd.s32 4294967295, %s6616_s16   ;;  %s6616_s16 = sphi %s6692_s16, %s7778_s16   ;;  %s6612_s15 = sphi %s6690_s15, %s7775_s15   ;;  %s6608_s14 = sphi %s6688_s14, %s7777_s14   ;;  %s6604_s13 = sphi %s6686_s13, %s7776_s13  }
   0xc   : > { %s5359_s18 = sadd.s32 4294967294, %s6616_s16   ;;  %p48_p0 = scmp.ne.s32.totalorder %s6608_s14, %s6604_s13 }
   0xd   : > { %p7745_p1 = scmp.eq.s32.totalorder %s6707_s17, 0  ;;  %p267_p3 = scmp.eq.s32.totalorder %s5359_s18, 1 }
   0xe   : > { %p5360_p5 = scmp.ge.s32.totalorder %s6616_s16, 1  ;;  %p274_p7 = scmp.lt.s32.totalorder %s6616_s16, 3 }
   0xf   : > { %p6716_p4 = por %p7745_p1, %p48_p0  ;;  %p6721_p6 = por %p267_p3, %p48_p0 }
  0x10   : > { %p6726_p8 = pnand %p5360_p5, %p274_p7  ;;  %s6618_s22 = smov [#allocation5]  }
  0x11   : > { %s7754_s19 = scalar_select %p6716_p4, 1, 0 }
  0x12   : > { %s7755_s20 = scalar_select %p6721_p6, 1, 0 }
  0x13   : > { %s7756_s21 = scalar_select %p6726_p8, 1, 0 }
  0x14   : > { %s286_s23 = sshll.u32 %s6618_s22, 4  ;;  %p6365_p9 = pneg %p6726_p8  ;;  %s287_s23 = int_to_ptr.vmem [resolvable:$true] %s286_s23 }
  0x15   : > { %s6619_s25 = smov [#allocation7]   ;;  %s6449_s27 = scalar_lea.vmem %s287_s23, 73728 }
  0x16   : > { %p6735_p11 = pnand %p6365_p9, %p7745_p1  ;;  %s314_s26 = sshll.u32 %s6619_s25, 4  ;;  %s315_s26 = int_to_ptr.vmem [resolvable:$true] %s314_s26 }
  0x17   : > { %p6450_p13 = scmp.ne.s32.totalorder %s287_s23, %s6449_s27  ;;  %p6457_p5 = scmp.lt.s32.totalorder %s287_s23, %s287_s23 }
  0x18   : > { %p6440_p12 = pneg %p6735_p11  ;;  %p6458_p7 = scmp.lt.s32.totalorder %s6449_s27, %s6449_s27 }
  0x1a   : > { %p6452_p0 = pnand %p6450_p13, %p6440_p12  ;;  %p6459_p10 = por %p6458_p7, %p6457_p5 }
  0x1c   : > { %p6453_p3 = pneg %p6452_p0 }
  0x1e   : > { %p6460_p9 = pnand %p6459_p10, %p6453_p3 }
  0x20   : > { %6463 = shalt.err (!%p6460_p9)
}
  0x21   : > { %s6620_s28 = smov 256   ;;  %s6621_s29 = smov 16  }
  0x22   : > { %s7758_s1 = sld [smem:[#allocation17_spill]]  ;;  %s6475_s12 = scalar_lea.vmem %s315_s26, 9216 }
  0x23   : > { %p6476_p1 = scmp.ne.s32.totalorder %s315_s26, %s6475_s12  ;;  %p6483_p2 = scmp.lt.s32.totalorder %s315_s26, %s315_s26 }
  0x24   : > { %p6484_p6 = scmp.lt.s32.totalorder %s6475_s12, %s6475_s12 }
  0x25   : > { %p6478_p13 = pnand %p6476_p1, %p6440_p12 }
  0x26   : > { %p6485_p5 = por %p6484_p6, %p6483_p2 }
  0x27   : > { %p6479_p0 = pneg %p6478_p13 }
  0x28   : > { %6368 = dma.hbm_to_vmem [thread:$0]  (!%p6735_p11), %s7758_s1, 73728, %s287_s23, [#allocation6], %s6620_s28, %s6620_s28, %s6621_s29  }
  0x29   : > { %p6486_p10 = pnand %p6485_p5, %p6479_p0 }
  0x2b   : > { %6489 = shalt.err (!%p6486_p10)
}
  0x2c   : > { %s6622_s18 = smov 128   ;;  %s6623_s22 = smov 8  }
  0x2d   : > { %s7759_s7 = sld [smem:[#allocation18_spill]]  ;;  %s6624_s23 = smov [#allocation8]  }
  0x2e   : > { %s327_s28 = sshll.u32 %s6624_s23, 4  ;;  %s6758_s29 = sadd.s32 1, %s6616_s16   ;;  %s328_s28 = int_to_ptr.vmem [resolvable:$true] %s327_s28 }
  0x2f   : > { %s6501_s30 = scalar_lea.vmem %s328_s28, 4608  ;;  %p6509_p3 = scmp.lt.s32.totalorder %s328_s28, %s328_s28 }
  0x30   : > { %p6502_p1 = scmp.ne.s32.totalorder %s328_s28, %s6501_s30  ;;  %p6510_p7 = scmp.lt.s32.totalorder %s6501_s30, %s6501_s30 }
  0x32   : > { %p6504_p2 = pnand %p6502_p1, %p6440_p12  ;;  %p6511_p9 = por %p6510_p7, %p6509_p3 }
  0x33   : > { %6371 = dma.hbm_to_vmem [thread:$0]  (!%p6735_p11), %s7759_s7, 9216, %s315_s26, [#allocation6], %s6622_s18, %s6622_s18, %s6623_s22  }
  0x34   : > { %p6505_p6 = pneg %p6504_p2 }
  0x36   : > { %p6512_p13 = pnand %p6511_p9, %p6505_p6 }
  0x38   : > { %6515 = shalt.err (!%p6512_p13)
}
  0x39   : > { %s7760_s8 = sld [smem:[#allocation19_spill]]  ;;  %s32_s12 = ssub.s32 %s6616_s16, %s6758_s29 }
  0x3a   : > { %s35_s25 = sadd.s32 1, %s6612_s15  ;;  %p33_p12 = scmp.eq.s32.totalorder %s32_s12, 0 }
  0x3b   : > { %p42_p0 = scmp.ne.s32.totalorder %s6612_s15, %s6608_s14  ;;  %p43_p5 = scmp.eq.s32.totalorder %s6616_s16, 0 }
  0x3c   : > { %p6386_p10 = scmp.lt.s32.totalorder %s6616_s16, 2  ;;  %p7762_p2 = scmp.eq.s32.totalorder %s6707_s17, 1 }
  0x3d   : > { %s6776_s24 = scalar_select %p33_p12, %s6612_s15, %s35_s25  }
  0x3e   : > { %p44_p1 = por %p43_p5, %p42_p0  ;;  %p6780_p6 = por %p7762_p2, %p42_p0 }
  0x3f   : > { %6374 = dma.hbm_to_vmem [thread:$0]  (!%p6735_p11), %s7760_s8, 4608, %s328_s28, [#allocation9], %s6622_s18, %s6622_s18, %s6623_s22  }
  0x40   : > { %7761 = sst [smem:[#allocation16_spill]] %s6776_s24  ;;  %s344_s23 = sand.u32 1, %s6612_s15  }
  0x41   : > { %s7763_s27 = scalar_select %p6780_p6, 1, 0 }
  0x42   : > { %s5627_s30 = sshll.u32 %s6616_s16, 7  ;;  %s5365_s11 = sshll.u32 %s344_s23, 3 }
  0x43   : > { %s6789_s18 = scalar_lea.hbm %s7734_s0, %s5627_s30  ;;  %s348_s22 = scalar_lea.vmem [#allocation2], %s5365_s11 }
  0x44   : > { %s356_s28 = sshll.u32 %s348_s22, 4  ;;  %p6791_p11 = pnand %p6386_p10, %p44_p1  ;;  %s357_s28 = int_to_ptr.vmem [resolvable:$true] %s356_s28 }
  0x45   : > { %s345_s25 = scalar_lea.sflag [#allocation3], %s344_s23  ;;  %s6516_s7 = scalar_lea.hbm %s6789_s18, 128 }
  0x46   : > { %p6517_p3 = scmp.ne.s32.totalorder %s6789_s18, %s6516_s7  ;;  %p6518_p7 = pneg %p6791_p11 }
  0x47   : > { %s6521_s26 = scalar_lea.hbm %s7734_s0, 256  ;;  %p6522_p12 = scmp.lt.s32.totalorder %s6789_s18, %s7734_s0 }
  0x48   : > { %p6519_p9 = pnand %p6518_p7, %p6517_p3  ;;  %p6523_p0 = scmp.lt.s32.totalorder %s6521_s26, %s6516_s7 }
  0x4a   : > { %p6520_p13 = pneg %p6519_p9  ;;  %p6524_p5 = por %p6523_p0, %p6522_p12 }
  0x4c   : > { %p6525_p10 = pnand %p6524_p5, %p6520_p13 }
  0x4e   : > { %6528 = shalt.err (!%p6525_p10)
}
  0x4f   : > { %s6529_s22 = scalar_lea.vmem %s357_s28, 128  ;;  %s6625_s23 = smov [#allocation2]  }
  0x50   : > { %p6530_p1 = scmp.ne.s32.totalorder %s357_s28, %s6529_s22  ;;  %s6534_s24 = sshll.u32 %s6625_s23, 4  ;;  %s6535_s24 = int_to_ptr.vmem [resolvable:$false] %s6534_s24 }
  0x51   : > { %s6536_s15 = scalar_lea.vmem %s6535_s24, 256  ;;  %p6537_p3 = scmp.lt.s32.totalorder %s357_s28, %s6535_s24 }
  0x52   : > { %p6532_p2 = pnand %p6530_p1, %p6518_p7  ;;  %p6538_p9 = scmp.lt.s32.totalorder %s6536_s15, %s6529_s22 }
  0x54   : > { %p6533_p6 = pneg %p6532_p2  ;;  %p6539_p4 = por %p6538_p9, %p6537_p3 }
  0x56   : > { %p6540_p8 = pnand %p6539_p4, %p6533_p6 }
  0x58   : > { %6543 = shalt.err (!%p6540_p8)
}
  0x59   : > { %6378 = dma.hbm_to_vmem [thread:$0]  (!%p6791_p11), %s6789_s18, 128, %s357_s28, %s345_s25  }
  0x5a   : > { %p7765_p13 = scmp.ne.s32.totalorder %s7756_s21, 0 }
  0x5b   : > { %s6812_s7 = sand.u32 (!%p7765_p13), 1, %s6608_s14   ;;  %p7766_p7 = scmp.ne.s32.totalorder (!%p7765_p13), %s7754_s19, 0 }
  0x5c   : > { %365 = sbr.rel (%p7765_p13) target bundleno = 5076 (0x13d4), region = 60  ;;  %s5369_s8 = sshll.u32 (!%p7765_p13), %s6812_s7, 3 }
  0x5d   : > { %s368_s1 = scalar_lea.sflag (!%p7765_p13), [#allocation3], %s6812_s7  ;;  %s6816_s24 = scalar_lea.vmem (!%p7765_p13), [#allocation2], %s5369_s8 }
  0x61   : > { %6587 = dma.done.wait (%p7766_p7), %s368_s1, 128  }
  0x62   : > { %6589 = vsyncadd (%p7766_p7), %s368_s1, 4294967168  ;;  %p7767_p4 = scmp.eq.s32.totalorder %s6707_s17, 0 }
  0x64   : > { %6591 = dma.done.wait (%p7767_p4), [#allocation6], 82944   ;;  %p7768_p8 = pmov %p7767_p4 }
  0x65   : > { %p7769_p6 = pmov %p7767_p4 }
  0x66   : > { %6593 = vsyncadd (%p7768_p8), [#allocation6], 4294884352 }
  0x67   : > { %6595 = dma.done.wait (%p7769_p6), [#allocation9], 4608   ;;  %p7770_p11 = pmov %p7767_p4 }
  0x68   : > { %v452_v0 = vld [vmem:[#allocation5 + $0xf8] sm:$0xff]  ;;  %v451_v2 = vld [vmem:[#allocation5 + $0xf0] sm:$0xff]  ;;  %v450_v4 = vld [vmem:[#allocation5 + $0xe8] sm:$0xff]  ;;  %vm707_vm0 = vcmask 1043456   ;;  %vm700_vm1 = vcmask 31744   ;;  %vm2748_vm2 = vcmask 130048  }
  0x69   : > { %6597 = vsyncadd (%p7770_p11), [#allocation9], 4294962688  ;;  %v593_v1 = vld [vmem:[#allocation5 + $0x2f8] sm:$0xff]  ;;  %488 = vmatprep.subr.mxu0 %v452_v0  ;;  %v592_v3 = vld [vmem:[#allocation5 + $0x2f0] sm:$0xff]  ;;  %vm3411_vm3 = vcmask 523264   ;;  %vm3612_vm4 = vcmask 261120  }
  0x6a   : > { %626 = vmatprep.subr.mxu1 %v593_v1  ;;  %v591_v5 = vld [vmem:[#allocation5 + $0x2e8] sm:$0xff]  ;;  %489 = vmatpush1.msra.mxu0 %v451_v2  ;;  %v449_v6 = vld [vmem:[#allocation5 + $0xe0] sm:$0xff]  ;;  %v448_v8 = vld [vmem:[#allocation5 + $0xd8] sm:$0xff]  ;;  %s5373_s15 = sshll.u32 %s6812_s7, 5  ;;  %s5628_s18 = sshll.u32 %s6707_s17, 9 }
  0x6b   : > { %627 = vmatpush1.msra.mxu1 %v592_v3  ;;  %v590_v7 = vld [vmem:[#allocation5 + $0x2e0] sm:$0xff]  ;;  %490 = vmatprep.subr.mxu0 %v450_v4  ;;  %v589_v9 = vld [vmem:[#allocation5 + $0x2d8] sm:$0xff]  ;;  %v447_v10 = vld [vmem:[#allocation5 + $0xd0] sm:$0xff]  ;;  %s419_s19 = scalar_lea.vmem [#allocation10], %s5373_s15  ;;  %s5244_s17 = scalar_lea.sflag [#allocation4], %s6812_s7 }
  0x6c   : > { %628 = vmatprep.subr.mxu1 %v591_v5  ;;  %v588_v11 = vld [vmem:[#allocation5 + $0x2d0] sm:$0xff]  ;;  %491 = vmatpush1.msra.mxu0 %v449_v6  ;;  %v446_v12 = vld [vmem:[#allocation5 + $0xc8] sm:$0xff]  ;;  %v445_v14 = vld [vmem:[#allocation5 + $0xc0] sm:$0xff]  ;;  %s5257_s21 = sshll.u32 %s419_s19, 4  ;;  %p7771_p0 = scmp.ne.s32.totalorder %s7763_s27, 0  ;;  %s7683_s21 = int_to_ptr.vmem [resolvable:$true] %s5257_s21 }
  0x6d   : > { %629 = vmatpush1.msra.mxu1 %v590_v7  ;;  %v587_v13 = vld [vmem:[#allocation5 + $0x2c8] sm:$0xff]  ;;  %492 = vmatprep.subr.mxu0 %v448_v8  ;;  %v586_v15 = vld [vmem:[#allocation5 + $0x2c0] sm:$0xff]  ;;  %v444_v16 = vld [vmem:[#allocation5 + $0xb8] sm:$0xff]  ;;  %s6544_s25 = scalar_lea.vmem %s7683_s21, 512  ;;  %s6628_s30 = smov [#allocation10]  }
  0x6e   : > { %630 = vmatprep.subr.mxu1 %v589_v9  ;;  %493 = vmatpush1.msra.mxu0 %v447_v10  ;;  %v585_v17 = vld [vmem:[#allocation5 + $0x2b8] sm:$0xff]  ;;  %v443_v18 = vld [vmem:[#allocation5 + $0xb0] sm:$0xff]  ;;  %v442_v20 = vld [vmem:[#allocation5 + $0xa8] sm:$0xff]  ;;  %p6545_p12 = scmp.ne.s32.totalorder %s7683_s21, %s6544_s25  ;;  %s6548_s26 = sshll.u32 %s6628_s30, 4  ;;  %s6549_s26 = int_to_ptr.vmem [resolvable:$false] %s6548_s26 }
  0x6f   : > { %631 = vmatpush1.msra.mxu1 %v588_v11  ;;  %494 = vmatprep.subr.mxu0 %v446_v12  ;;  %v584_v19 = vld [vmem:[#allocation5 + $0x2b0] sm:$0xff]  ;;  %v583_v21 = vld [vmem:[#allocation5 + $0x2a8] sm:$0xff]  ;;  %v441_v22 = vld [vmem:[#allocation5 + $0xa0] sm:$0xff]  ;;  %s6550_s11 = scalar_lea.vmem %s6549_s26, 1024  ;;  %p6551_p1 = scmp.lt.s32.totalorder %s7683_s21, %s6549_s26 }
  0x70   : > { %632 = vmatprep.subr.mxu1 %v587_v13  ;;  %495 = vmatpush1.msra.mxu0 %v445_v14  ;;  %v582_v23 = vld [vmem:[#allocation5 + $0x2a0] sm:$0xff]  ;;  %v440_v24 = vld [vmem:[#allocation5 + $0x98] sm:$0xff]  ;;  %v439_v26 = vld [vmem:[#allocation5 + $0x90] sm:$0xff]  ;;  %p6546_p5 = pnand %p6545_p12, %p7771_p0  ;;  %p6552_p2 = scmp.lt.s32.totalorder %s6550_s11, %s6544_s25 }
  0x71   : > { %633 = vmatpush1.msra.mxu1 %v586_v15  ;;  %496 = vmatprep.subr.mxu0 %v444_v16  ;;  %v581_v25 = vld [vmem:[#allocation5 + $0x298] sm:$0xff]  ;;  %v580_v27 = vld [vmem:[#allocation5 + $0x290] sm:$0xff]  ;;  %v438_v28 = vld [vmem:[#allocation5 + $0x88] sm:$0xff] }
  0x72   : > { %634 = vmatprep.subr.mxu1 %v585_v17  ;;  %497 = vmatpush1.msra.mxu0 %v443_v18  ;;  %v579_v29 = vld [vmem:[#allocation5 + $0x288] sm:$0xff]  ;;  %v437_v30 = vld [vmem:[#allocation5 + $0x80] sm:$0xff]  ;;  %v436_v32 = vld [vmem:[#allocation5 + $0x78] sm:$0xff]  ;;  %p6547_p10 = pneg %p6546_p5  ;;  %p6553_p3 = por %p6552_p2, %p6551_p1 }
  0x73   : > { %635 = vmatpush1.msra.mxu1 %v584_v19  ;;  %498 = vmatprep.subr.mxu0 %v442_v20  ;;  %v578_v31 = vld [vmem:[#allocation5 + $0x280] sm:$0xff]  ;;  %v577_v33 = vld [vmem:[#allocation5 + $0x278] sm:$0xff]  ;;  %v435_v34 = vld [vmem:[#allocation5 + $0x70] sm:$0xff] }
  0x74   : > { %636 = vmatprep.subr.mxu1 %v583_v21  ;;  %499 = vmatpush1.msra.mxu0 %v441_v22  ;;  %v576_v35 = vld [vmem:[#allocation5 + $0x270] sm:$0xff]  ;;  %v434_v36 = vld [vmem:[#allocation5 + $0x68] sm:$0xff]  ;;  %v433_v38 = vld [vmem:[#allocation5 + $0x60] sm:$0xff]  ;;  %p6554_p9 = pnand %p6553_p3, %p6547_p10 }
  0x75   : > { %637 = vmatpush1.msra.mxu1 %v582_v23  ;;  %500 = vmatprep.subr.mxu0 %v440_v24  ;;  %v575_v37 = vld [vmem:[#allocation5 + $0x268] sm:$0xff]  ;;  %v574_v39 = vld [vmem:[#allocation5 + $0x260] sm:$0xff]  ;;  %v432_v40 = vld [vmem:[#allocation5 + $0x58] sm:$0xff] }
  0x76   : > { %638 = vmatprep.subr.mxu1 %v581_v25  ;;  %501 = vmatpush1.msra.mxu0 %v439_v26  ;;  %v573_v41 = vld [vmem:[#allocation5 + $0x258] sm:$0xff]  ;;  %v431_v42 = vld [vmem:[#allocation5 + $0x50] sm:$0xff]  ;;  %v430_v44 = vld [vmem:[#allocation5 + $0x48] sm:$0xff] }
  0x77   : > { %639 = vmatpush1.msra.mxu1 %v580_v27  ;;  %502 = vmatprep.subr.mxu0 %v438_v28  ;;  %v572_v43 = vld [vmem:[#allocation5 + $0x250] sm:$0xff]  ;;  %v571_v45 = vld [vmem:[#allocation5 + $0x248] sm:$0xff]  ;;  %v429_v46 = vld [vmem:[#allocation5 + $0x40] sm:$0xff] }
  0x78   : > { %640 = vmatprep.subr.mxu1 %v579_v29  ;;  %503 = vmatpush1.msra.mxu0 %v437_v30  ;;  %v570_v47 = vld [vmem:[#allocation5 + $0x240] sm:$0xff]  ;;  %v428_v48 = vld [vmem:[#allocation5 + $0x38] sm:$0xff]  ;;  %v427_v50 = vld [vmem:[#allocation5 + $0x30] sm:$0xff] }
  0x79   : > { %641 = vmatpush1.msra.mxu1 %v578_v31  ;;  %504 = vmatprep.subr.mxu0 %v436_v32  ;;  %v569_v49 = vld [vmem:[#allocation5 + $0x238] sm:$0xff]  ;;  %v568_v51 = vld [vmem:[#allocation5 + $0x230] sm:$0xff]  ;;  %v426_v52 = vld [vmem:[#allocation5 + $0x28] sm:$0xff] }
  0x7a   : > { %642 = vmatprep.subr.mxu1 %v577_v33  ;;  %505 = vmatpush1.msra.mxu0 %v435_v34  ;;  %v567_v53 = vld [vmem:[#allocation5 + $0x228] sm:$0xff]  ;;  %v425_v54 = vld [vmem:[#allocation5 + $0x20] sm:$0xff]  ;;  %v424_v56 = vld [vmem:[#allocation5 + $0x18] sm:$0xff] }
  0x7b   : > { %643 = vmatpush1.msra.mxu1 %v576_v35  ;;  %506 = vmatprep.subr.mxu0 %v434_v36  ;;  %v566_v55 = vld [vmem:[#allocation5 + $0x220] sm:$0xff]  ;;  %v565_v57 = vld [vmem:[#allocation5 + $0x218] sm:$0xff]  ;;  %v423_v58 = vld [vmem:[#allocation5 + $0x10] sm:$0xff] }
  0x7c   : > { %644 = vmatprep.subr.mxu1 %v575_v37  ;;  %507 = vmatpush1.msra.mxu0 %v433_v38  ;;  %v564_v59 = vld [vmem:[#allocation5 + $0x210] sm:$0xff]  ;;  %v422_v60 = vld [vmem:[#allocation5 + $0x8] sm:$0xff]  ;;  %v421_v62 = vld [vmem:[#allocation5] sm:$0xff] }
  0x7d   : > { %645 = vmatpush1.msra.mxu1 %v574_v39  ;;  %508 = vmatprep.subr.mxu0 %v432_v40  ;;  %v563_v61 = vld [vmem:[#allocation5 + $0x208] sm:$0xff]  ;;  %v562_v63 = vld [vmem:[#allocation5 + $0x200] sm:$0xff]  ;;  %v484_v0 = vld [vmem:[#allocation5 + $0x1f8] sm:$0xff] }
  0x7e   : > { %646 = vmatprep.subr.mxu1 %v573_v41  ;;  %509 = vmatpush1.msra.mxu0 %v431_v42  ;;  %v625_v1 = vld [vmem:[#allocation5 + $0x3f8] sm:$0xff]  ;;  %v483_v2 = vld [vmem:[#allocation5 + $0x1f0] sm:$0xff]  ;;  %v482_v4 = vld [vmem:[#allocation5 + $0x1e8] sm:$0xff] }
  0x7f   : > { %647 = vmatpush1.msra.mxu1 %v572_v43  ;;  %510 = vmatprep.subr.mxu0 %v430_v44  ;;  %v624_v3 = vld [vmem:[#allocation5 + $0x3f0] sm:$0xff]  ;;  %v623_v5 = vld [vmem:[#allocation5 + $0x3e8] sm:$0xff]  ;;  %v481_v6 = vld [vmem:[#allocation5 + $0x1e0] sm:$0xff] }
  0x80   : > { %648 = vmatprep.subr.mxu1 %v571_v45  ;;  %511 = vmatpush1.msra.mxu0 %v429_v46  ;;  %v622_v7 = vld [vmem:[#allocation5 + $0x3e0] sm:$0xff]  ;;  %v480_v8 = vld [vmem:[#allocation5 + $0x1d8] sm:$0xff]  ;;  %v479_v10 = vld [vmem:[#allocation5 + $0x1d0] sm:$0xff] }
  0x81   : > { %649 = vmatpush1.msra.mxu1 %v570_v47  ;;  %512 = vmatprep.subr.mxu0 %v428_v48  ;;  %v621_v9 = vld [vmem:[#allocation5 + $0x3d8] sm:$0xff]  ;;  %v620_v11 = vld [vmem:[#allocation5 + $0x3d0] sm:$0xff]  ;;  %v478_v12 = vld [vmem:[#allocation5 + $0x1c8] sm:$0xff] }
  0x82   : > { %650 = vmatprep.subr.mxu1 %v569_v49  ;;  %513 = vmatpush1.msra.mxu0 %v427_v50  ;;  %v619_v13 = vld [vmem:[#allocation5 + $0x3c8] sm:$0xff]  ;;  %v477_v14 = vld [vmem:[#allocation5 + $0x1c0] sm:$0xff]  ;;  %v476_v16 = vld [vmem:[#allocation5 + $0x1b8] sm:$0xff] }
  0x83   : > { %651 = vmatpush1.msra.mxu1 %v568_v51  ;;  %514 = vmatprep.subr.mxu0 %v426_v52  ;;  %v618_v15 = vld [vmem:[#allocation5 + $0x3c0] sm:$0xff]  ;;  %v617_v17 = vld [vmem:[#allocation5 + $0x3b8] sm:$0xff]  ;;  %v475_v18 = vld [vmem:[#allocation5 + $0x1b0] sm:$0xff] }
  0x84   : > { %652 = vmatprep.subr.mxu1 %v567_v53  ;;  %515 = vmatpush1.msra.mxu0 %v425_v54  ;;  %v616_v19 = vld [vmem:[#allocation5 + $0x3b0] sm:$0xff]  ;;  %v474_v20 = vld [vmem:[#allocation5 + $0x1a8] sm:$0xff]  ;;  %v473_v22 = vld [vmem:[#allocation5 + $0x1a0] sm:$0xff] }
  0x85   : > { %653 = vmatpush1.msra.mxu1 %v566_v55  ;;  %516 = vmatprep.subr.mxu0 %v424_v56  ;;  %v615_v21 = vld [vmem:[#allocation5 + $0x3a8] sm:$0xff]  ;;  %v614_v23 = vld [vmem:[#allocation5 + $0x3a0] sm:$0xff]  ;;  %v472_v24 = vld [vmem:[#allocation5 + $0x198] sm:$0xff] }
  0x86   : > { %654 = vmatprep.subr.mxu1 %v565_v57  ;;  %517 = vmatpush1.msra.mxu0 %v423_v58  ;;  %v613_v25 = vld [vmem:[#allocation5 + $0x398] sm:$0xff]  ;;  %v471_v26 = vld [vmem:[#allocation5 + $0x190] sm:$0xff]  ;;  %v470_v28 = vld [vmem:[#allocation5 + $0x188] sm:$0xff] }
  0x87   : > { %655 = vmatpush1.msra.mxu1 %v564_v59  ;;  %518 = vmatprep.subr.mxu0 %v422_v60  ;;  %v612_v27 = vld [vmem:[#allocation5 + $0x390] sm:$0xff]  ;;  %v611_v29 = vld [vmem:[#allocation5 + $0x388] sm:$0xff]  ;;  %v469_v30 = vld [vmem:[#allocation5 + $0x180] sm:$0xff] }
  0x88   : > { %656 = vmatprep.subr.mxu1 %v563_v61  ;;  %519 = vmatpush1.msra.mxu0 %v421_v62  ;;  %v610_v31 = vld [vmem:[#allocation5 + $0x380] sm:$0xff]  ;;  %v468_v32 = vld [vmem:[#allocation5 + $0x178] sm:$0xff]  ;;  %v467_v34 = vld [vmem:[#allocation5 + $0x170] sm:$0xff] }
  0x89   : > { %657 = vmatpush1.msra.mxu1 %v562_v63  ;;  %520 = vmatprep.subr.mxu0 %v484_v0  ;;  %v609_v33 = vld [vmem:[#allocation5 + $0x378] sm:$0xff]  ;;  %v608_v35 = vld [vmem:[#allocation5 + $0x370] sm:$0xff]  ;;  %v466_v36 = vld [vmem:[#allocation5 + $0x168] sm:$0xff] }
  0x8a   : > { %658 = vmatprep.subr.mxu1 %v625_v1  ;;  %521 = vmatpush2.msra.mxu0 %v483_v2  ;;  %v607_v37 = vld [vmem:[#allocation5 + $0x368] sm:$0xff]  ;;  %v465_v38 = vld [vmem:[#allocation5 + $0x160] sm:$0xff]  ;;  %v464_v40 = vld [vmem:[#allocation5 + $0x158] sm:$0xff]  ;;  %v6626_v2 = vmov 0.0  }
  0x8b   : > { %659 = vmatpush2.msra.mxu1 %v624_v3  ;;  %522 = vmatprep.subr.mxu0 %v482_v4  ;;  %v606_v39 = vld [vmem:[#allocation5 + $0x360] sm:$0xff]  ;;  %v605_v41 = vld [vmem:[#allocation5 + $0x358] sm:$0xff]  ;;  %v463_v42 = vld [vmem:[#allocation5 + $0x150] sm:$0xff] }
  0x8c   : > { %660 = vmatprep.subr.mxu1 %v623_v5  ;;  %523 = vmatpush2.msra.mxu0 %v481_v6  ;;  %v604_v43 = vld [vmem:[#allocation5 + $0x350] sm:$0xff]  ;;  %v462_v44 = vld [vmem:[#allocation5 + $0x148] sm:$0xff]  ;;  %v461_v46 = vld [vmem:[#allocation5 + $0x140] sm:$0xff] }
  0x8d   : > { %661 = vmatpush2.msra.mxu1 %v622_v7  ;;  %524 = vmatprep.subr.mxu0 %v480_v8  ;;  %v603_v45 = vld [vmem:[#allocation5 + $0x348] sm:$0xff]  ;;  %v602_v47 = vld [vmem:[#allocation5 + $0x340] sm:$0xff]  ;;  %v460_v48 = vld [vmem:[#allocation5 + $0x138] sm:$0xff] }
  0x8e   : > { %662 = vmatprep.subr.mxu1 %v621_v9  ;;  %525 = vmatpush2.msra.mxu0 %v479_v10  ;;  %v601_v49 = vld [vmem:[#allocation5 + $0x338] sm:$0xff]  ;;  %v459_v50 = vld [vmem:[#allocation5 + $0x130] sm:$0xff]  ;;  %v458_v52 = vld [vmem:[#allocation5 + $0x128] sm:$0xff] }
  0x8f   : > { %663 = vmatpush2.msra.mxu1 %v620_v11  ;;  %526 = vmatprep.subr.mxu0 %v478_v12  ;;  %v600_v51 = vld [vmem:[#allocation5 + $0x330] sm:$0xff]  ;;  %v599_v53 = vld [vmem:[#allocation5 + $0x328] sm:$0xff]  ;;  %v457_v54 = vld [vmem:[#allocation5 + $0x120] sm:$0xff] }
  0x90   : > { %664 = vmatprep.subr.mxu1 %v619_v13  ;;  %527 = vmatpush2.msra.mxu0 %v477_v14  ;;  %v598_v55 = vld [vmem:[#allocation5 + $0x320] sm:$0xff]  ;;  %v6831_v56 = vld [vmem:[%s6816_s24] sm:$0xff]  ;;  %v454_v61 = vld [vmem:[#allocation5 + $0x108] sm:$0xff] }
  0x91   : > { %665 = vmatpush2.msra.mxu1 %v618_v15  ;;  %528 = vmatprep.subr.mxu0 %v476_v16  ;;  %v456_v57 = vld [vmem:[#allocation5 + $0x118] sm:$0xff]  ;;  %v455_v59 = vld [vmem:[#allocation5 + $0x110] sm:$0xff]  ;;  %v595_v62 = vld [vmem:[#allocation5 + $0x308] sm:$0xff]  ;;  %v6835_v63 = vcombine.high %v6831_v56, %v6831_v56 }
  0x92   : > { %666 = vmatprep.subr.mxu1 %v617_v17  ;;  %529 = vmatpush2.msra.mxu0 %v475_v18  ;;  %v597_v58 = vld [vmem:[#allocation5 + $0x318] sm:$0xff]  ;;  %v596_v60 = vld [vmem:[#allocation5 + $0x310] sm:$0xff]  ;;  %v453_v0 = vld [vmem:[#allocation5 + $0x100] sm:$0xff] }
  0x93   : > { %667 = vmatpush2.msra.mxu1 %v616_v19  ;;  %530 = vmatprep.subr.mxu0 %v474_v20  ;;  %v594_v1 = vld [vmem:[#allocation5 + $0x300] sm:$0xff]  ;;  %v559_v8 = vld [vmem:[%s7736_s2] sm:$0xff]  ;;  %v912_v9 = vld [vmem:[#allocation5 + $0x4f8] sm:$0xff] }
  0x94   : > { %668 = vmatprep.subr.mxu1 %v615_v21  ;;  %531 = vmatpush2.msra.mxu0 %v473_v22  ;;  %v5374_v7 = vld [vmem:[%s7736_s2 + $0x10] sm:$0xff]  ;;  %v911_v10 = vld [vmem:[#allocation5 + $0x4f0] sm:$0xff]  ;;  %v910_v11 = vld [vmem:[#allocation5 + $0x4e8] sm:$0xff] }
  0x95   : > { %669 = vmatpush2.msra.mxu1 %v614_v23  ;;  %532 = vmatprep.subr.mxu0 %v472_v24  ;;  %v909_v12 = vld [vmem:[#allocation5 + $0x4e0] sm:$0xff]  ;;  %v560_v13 = vld [vmem:[%s7736_s2 + $0x8] sm:$0xff]  ;;  %v5375_v15 = vld [vmem:[%s7736_s2 + $0x18] sm:$0xff] }
  0x96   : > { %670 = vmatprep.subr.mxu1 %v613_v25  ;;  %533 = vmatpush2.msra.mxu0 %v471_v26  ;;  %v908_v14 = vld [vmem:[#allocation5 + $0x4d8] sm:$0xff]  ;;  %v907_v16 = vld [vmem:[#allocation5 + $0x4d0] sm:$0xff]  ;;  %v906_v17 = vld [vmem:[#allocation5 + $0x4c8] sm:$0xff] }
  0x97   : > { %671 = vmatpush2.msra.mxu1 %v612_v27  ;;  %534 = vmatprep.subr.mxu0 %v470_v28  ;;  %v905_v18 = vld [vmem:[#allocation5 + $0x4c0] sm:$0xff]  ;;  %v904_v19 = vld [vmem:[#allocation5 + $0x4b8] sm:$0xff]  ;;  %v903_v20 = vld [vmem:[#allocation5 + $0x4b0] sm:$0xff] }
  0x98   : > { %672 = vmatprep.subr.mxu1 %v611_v29  ;;  %535 = vmatpush2.msra.mxu0 %v469_v30  ;;  %v902_v21 = vld [vmem:[#allocation5 + $0x4a8] sm:$0xff]  ;;  %v901_v22 = vld [vmem:[#allocation5 + $0x4a0] sm:$0xff]  ;;  %v900_v23 = vld [vmem:[#allocation5 + $0x498] sm:$0xff] }
  0x99   : > { %673 = vmatpush2.msra.mxu1 %v610_v31  ;;  %536 = vmatprep.subr.mxu0 %v468_v32  ;;  %v899_v24 = vld [vmem:[#allocation5 + $0x490] sm:$0xff]  ;;  %v898_v25 = vld [vmem:[#allocation5 + $0x488] sm:$0xff]  ;;  %v897_v26 = vld [vmem:[#allocation5 + $0x480] sm:$0xff] }
  0x9a   : > { %674 = vmatprep.subr.mxu1 %v609_v33  ;;  %537 = vmatpush2.msra.mxu0 %v467_v34  ;;  %v896_v27 = vld [vmem:[#allocation5 + $0x478] sm:$0xff]  ;;  %v895_v28 = vld [vmem:[#allocation5 + $0x470] sm:$0xff]  ;;  %v894_v29 = vld [vmem:[#allocation5 + $0x468] sm:$0xff] }
  0x9b   : > { %675 = vmatpush2.msra.mxu1 %v608_v35  ;;  %538 = vmatprep.subr.mxu0 %v466_v36  ;;  %v893_v30 = vld [vmem:[#allocation5 + $0x460] sm:$0xff]  ;;  %v892_v31 = vld [vmem:[#allocation5 + $0x458] sm:$0xff]  ;;  %v891_v32 = vld [vmem:[#allocation5 + $0x450] sm:$0xff] }
  0x9c   : > { %676 = vmatprep.subr.mxu1 %v607_v37  ;;  %539 = vmatpush2.msra.mxu0 %v465_v38  ;;  %v890_v33 = vld [vmem:[#allocation5 + $0x448] sm:$0xff]  ;;  %v889_v34 = vld [vmem:[#allocation5 + $0x440] sm:$0xff]  ;;  %v888_v35 = vld [vmem:[#allocation5 + $0x438] sm:$0xff] }
  0x9d   : > { %677 = vmatpush2.msra.mxu1 %v606_v39  ;;  %540 = vmatprep.subr.mxu0 %v464_v40  ;;  %v887_v36 = vld [vmem:[#allocation5 + $0x430] sm:$0xff]  ;;  %v886_v37 = vld [vmem:[#allocation5 + $0x428] sm:$0xff]  ;;  %v885_v38 = vld [vmem:[#allocation5 + $0x420] sm:$0xff] }
  0x9e   : > { %678 = vmatprep.subr.mxu1 %v605_v41  ;;  %541 = vmatpush2.msra.mxu0 %v463_v42  ;;  %v884_v39 = vld [vmem:[#allocation5 + $0x418] sm:$0xff]  ;;  %v883_v40 = vld [vmem:[#allocation5 + $0x410] sm:$0xff]  ;;  %v882_v41 = vld [vmem:[#allocation5 + $0x408] sm:$0xff] }
  0x9f   : > { %679 = vmatpush2.msra.mxu1 %v604_v43  ;;  %542 = vmatprep.subr.mxu0 %v462_v44  ;;  %v881_v42 = vld [vmem:[#allocation5 + $0x400] sm:$0xff]  ;;  %v944_v43 = vld [vmem:[#allocation5 + $0x5f8] sm:$0xff]  ;;  %v943_v44 = vld [vmem:[#allocation5 + $0x5f0] sm:$0xff] }
  0xa0   : > { %680 = vmatprep.subr.mxu1 %v603_v45  ;;  %543 = vmatpush2.msra.mxu0 %v461_v46  ;;  %v942_v45 = vld [vmem:[#allocation5 + $0x5e8] sm:$0xff]  ;;  %v941_v46 = vld [vmem:[#allocation5 + $0x5e0] sm:$0xff] }
  0xa1   : > { %681 = vmatpush2.msra.mxu1 %v602_v47  ;;  %544 = vmatprep.subr.mxu0 %v460_v48  ;;  %v940_v47 = vld [vmem:[#allocation5 + $0x5d8] sm:$0xff]  ;;  %v939_v48 = vld [vmem:[#allocation5 + $0x5d0] sm:$0xff] }
  0xa2   : > { %682 = vmatprep.subr.mxu1 %v601_v49  ;;  %545 = vmatpush2.msra.mxu0 %v459_v50  ;;  %v938_v49 = vld [vmem:[#allocation5 + $0x5c8] sm:$0xff]  ;;  %v937_v50 = vld [vmem:[#allocation5 + $0x5c0] sm:$0xff] }
  0xa3   : > { %683 = vmatpush2.msra.mxu1 %v600_v51  ;;  %546 = vmatprep.subr.mxu0 %v458_v52  ;;  %v936_v51 = vld [vmem:[#allocation5 + $0x5b8] sm:$0xff]  ;;  %v935_v52 = vld [vmem:[#allocation5 + $0x5b0] sm:$0xff] }
  0xa4   : > { %684 = vmatprep.subr.mxu1 %v599_v53  ;;  %547 = vmatpush2.msra.mxu0 %v457_v54  ;;  %v934_v53 = vld [vmem:[#allocation5 + $0x5a8] sm:$0xff]  ;;  %v933_v54 = vld [vmem:[#allocation5 + $0x5a0] sm:$0xff] }
  0xa5   : > { %685 = vmatpush2.msra.mxu1 %v598_v55  ;;  %548 = vmatprep.subr.mxu0 %v456_v57  ;;  %v932_v55 = vld [vmem:[#allocation5 + $0x598] sm:$0xff]  ;;  %v931_v57 = vld [vmem:[#allocation5 + $0x590] sm:$0xff] }
  0xa6   : > { %686 = vmatprep.subr.mxu1 %v597_v58  ;;  %549 = vmatpush2.msra.mxu0 %v455_v59  ;;  %v930_v58 = vld [vmem:[#allocation5 + $0x588] sm:$0xff]  ;;  %v929_v59 = vld [vmem:[#allocation5 + $0x580] sm:$0xff] }
  0xa7   : > { %687 = vmatpush2.msra.mxu1 %v596_v60  ;;  %550 = vmatprep.subr.mxu0 %v454_v61  ;;  %v928_v60 = vld [vmem:[#allocation5 + $0x578] sm:$0xff]  ;;  %v927_v61 = vld [vmem:[#allocation5 + $0x570] sm:$0xff] }
  0xa8   : > { %688 = vmatprep.subr.mxu1 %v595_v62  ;;  %551 = vmatpush2.msra.mxu0 %v453_v0  ;;  %v926_v62 = vld [vmem:[#allocation5 + $0x568] sm:$0xff]  ;;  %v925_v0 = vld [vmem:[#allocation5 + $0x560] sm:$0xff] }
  0xa9   : > { %552 = vmatprep.mubr.f32.mxu0 %v6835_v63  ;;  %689 = vmatpush2.msra.mxu1 %v594_v1  ;;  %v924_v1 = vld [vmem:[#allocation5 + $0x558] sm:$0xff] }
  0xaa   : > { %690 = vmatprep.mubr.f32.mxu1 %v6835_v63  ;;  %553 = vmatmul.mubr.f32.vlgmr.msra.gmra.mxu0 %v6831_v56 }
  0xab   : > { %691 = vmatmul.mubr.f32.vlgmr.msra.gmra.mxu1 %v6831_v56  ;;  %778 = vmatprep.mubr.f32.mxu0 %v6626_v2 }
  0xac   : > { %867 = vmatprep.mubr.f32.mxu1 %v6626_v2 }
 0x16a   : > { %v554_v3 = vpop.f32.mrf.mxu0 }
 0x16b   : > { %v692_v4 = vpop.f32.mrf.mxu1 }
 0x16c   : > { %v556_v5 = vpop.f32.mrf.mxu0 }
 0x16d   : > { %v694_v6 = vpop.f32.mrf.mxu1  ;;  %5380 = vmatprep.subr.msk.mxu1 %vm707_vm0, %v556_v5  ;;  %v921_v5 = vld [vmem:[#allocation5 + $0x540] sm:$0xff] }
 0x16e   : > { %5376 = vmatprep.subr.msk.mxu0 %vm707_vm0, %v694_v6  ;;  %5381 = vmatpush1.msk.msra.mxu1 %vm707_vm0, %v554_v3  ;;  %v923_v3 = vld [vmem:[#allocation5 + $0x550] sm:$0xff]  ;;  %v920_v6 = vld [vmem:[#allocation5 + $0x538] sm:$0xff] }
 0x16f   : > { %5377 = vmatpush1.msk.msra.mxu0 %vm707_vm0, %v692_v4  ;;  %5382 = vmatmul.mubr.msk.f32.vlgmr.msra.gmra.mxu1 %vm700_vm1, %v559_v8  ;;  %v922_v4 = vld [vmem:[#allocation5 + $0x548] sm:$0xff] }
 0x170   : > { %5378 = vmatmul.mubr.msk.f32.vlgmr.msra.gmra.mxu0 %vm700_vm1, %v5374_v7  ;;  %945 = vmatprep.subr.mxu0 %v912_v9  ;;  %v919_v7 = vld [vmem:[#allocation5 + $0x530] sm:$0xff]  ;;  %v918_v8 = vld [vmem:[#allocation5 + $0x528] sm:$0xff]  ;;  %v917_v9 = vld [vmem:[#allocation5 + $0x520] sm:$0xff] }
 0x171   : > { %784 = vmatprep.mubr.f32.mxu0 %v6626_v2  ;;  %946 = vmatpush1.msra.mxu0 %v911_v10  ;;  %v916_v10 = vld [vmem:[#allocation5 + $0x518] sm:$0xff] }
 0x172   : > { %873 = vmatprep.mubr.f32.mxu1 %v6626_v2  ;;  %947 = vmatprep.subr.mxu0 %v910_v11  ;;  %v915_v11 = vld [vmem:[#allocation5 + $0x510] sm:$0xff] }
 0x173   : > { %948 = vmatpush1.msra.mxu0 %v909_v12  ;;  %5383 = vmatmul.mubr.msk.f32.gmra.mxu1 %vm700_vm1, %v560_v13  ;;  %v914_v12 = vld [vmem:[#allocation5 + $0x508] sm:$0xff]  ;;  %v913_v13 = vld [vmem:[#allocation5 + $0x500] sm:$0xff] }
 0x174   : > { %949 = vmatprep.subr.mxu0 %v908_v14  ;;  %5379 = vmatmul.mubr.msk.f32.gmra.mxu0 %vm700_vm1, %v5375_v15 }
 0x175   : > { %950 = vmatpush1.msra.mxu0 %v907_v16  ;;  %1009 = vmatprep.mubr.f32.mxu0 %v6835_v63 }
 0x176   : > { %951 = vmatprep.subr.mxu0 %v906_v17  ;;  %1095 = vmatprep.mubr.f32.mxu1 %v6626_v2 }
 0x177   : > { %952 = vmatpush1.msra.mxu0 %v905_v18 }
 0x178   : > { %953 = vmatprep.subr.mxu0 %v904_v19 }
 0x179   : > { %954 = vmatpush1.msra.mxu0 %v903_v20 }
 0x17a   : > { %955 = vmatprep.subr.mxu0 %v902_v21 }
 0x17b   : > { %956 = vmatpush1.msra.mxu0 %v901_v22 }
 0x17c   : > { %957 = vmatprep.subr.mxu0 %v900_v23 }
 0x17d   : > { %958 = vmatpush1.msra.mxu0 %v899_v24 }
 0x17e   : > { %959 = vmatprep.subr.mxu0 %v898_v25 }
 0x17f   : > { %960 = vmatpush1.msra.mxu0 %v897_v26  ;;  %v5384_v26 = vld [vmem:[%s7736_s2 + $0x20] sm:$0xff] }
 0x180   : > { %961 = vmatprep.subr.mxu0 %v896_v27  ;;  %v1144_v27 = vld [vmem:[#allocation5 + $0x6f8] sm:$0xff] }
 0x181   : > { %962 = vmatpush1.msra.mxu0 %v895_v28  ;;  %v1143_v28 = vld [vmem:[#allocation5 + $0x6f0] sm:$0xff] }
 0x182   : > { %963 = vmatprep.subr.mxu0 %v894_v29  ;;  %v1142_v29 = vld [vmem:[#allocation5 + $0x6e8] sm:$0xff] }
 0x183   : > { %964 = vmatpush1.msra.mxu0 %v893_v30  ;;  %v1141_v30 = vld [vmem:[#allocation5 + $0x6e0] sm:$0xff] }
 0x184   : > { %965 = vmatprep.subr.mxu0 %v892_v31  ;;  %v5385_v31 = vld [vmem:[%s7736_s2 + $0x28] sm:$0xff] }
 0x185   : > { %966 = vmatpush1.msra.mxu0 %v891_v32  ;;  %v1140_v32 = vld [vmem:[#allocation5 + $0x6d8] sm:$0xff] }
 0x186   : > { %967 = vmatprep.subr.mxu0 %v890_v33  ;;  %v1139_v33 = vld [vmem:[#allocation5 + $0x6d0] sm:$0xff] }
 0x187   : > { %968 = vmatpush1.msra.mxu0 %v889_v34  ;;  %v1138_v34 = vld [vmem:[#allocation5 + $0x6c8] sm:$0xff] }
 0x188   : > { %969 = vmatprep.subr.mxu0 %v888_v35  ;;  %v1137_v35 = vld [vmem:[#allocation5 + $0x6c0] sm:$0xff] }
 0x189   : > { %970 = vmatpush1.msra.mxu0 %v887_v36  ;;  %v1136_v36 = vld [vmem:[#allocation5 + $0x6b8] sm:$0xff] }
 0x18a   : > { %971 = vmatprep.subr.mxu0 %v886_v37  ;;  %v1135_v37 = vld [vmem:[#allocation5 + $0x6b0] sm:$0xff] }
 0x18b   : > { %972 = vmatpush1.msra.mxu0 %v885_v38  ;;  %v1134_v38 = vld [vmem:[#allocation5 + $0x6a8] sm:$0xff] }
 0x18c   : > { %973 = vmatprep.subr.mxu0 %v884_v39  ;;  %v1133_v39 = vld [vmem:[#allocation5 + $0x6a0] sm:$0xff] }
 0x18d   : > { %974 = vmatpush1.msra.mxu0 %v883_v40  ;;  %v1132_v40 = vld [vmem:[#allocation5 + $0x698] sm:$0xff] }
 0x18e   : > { %975 = vmatprep.subr.mxu0 %v882_v41  ;;  %v1131_v41 = vld [vmem:[#allocation5 + $0x690] sm:$0xff] }
 0x18f   : > { %976 = vmatpush1.msra.mxu0 %v881_v42  ;;  %v1130_v42 = vld [vmem:[#allocation5 + $0x688] sm:$0xff] }
 0x190   : > { %977 = vmatprep.subr.mxu0 %v944_v43  ;;  %v1129_v43 = vld [vmem:[#allocation5 + $0x680] sm:$0xff] }
 0x191   : > { %978 = vmatpush2.msra.mxu0 %v943_v44  ;;  %v1128_v44 = vld [vmem:[#allocation5 + $0x678] sm:$0xff] }
 0x192   : > { %979 = vmatprep.subr.mxu0 %v942_v45  ;;  %v1127_v45 = vld [vmem:[#allocation5 + $0x670] sm:$0xff] }
 0x193   : > { %980 = vmatpush2.msra.mxu0 %v941_v46  ;;  %v1126_v46 = vld [vmem:[#allocation5 + $0x668] sm:$0xff] }
 0x194   : > { %981 = vmatprep.subr.mxu0 %v940_v47  ;;  %v1125_v47 = vld [vmem:[#allocation5 + $0x660] sm:$0xff] }
 0x195   : > { %982 = vmatpush2.msra.mxu0 %v939_v48  ;;  %v1124_v48 = vld [vmem:[#allocation5 + $0x658] sm:$0xff] }
 0x196   : > { %983 = vmatprep.subr.mxu0 %v938_v49  ;;  %v1123_v49 = vld [vmem:[#allocation5 + $0x650] sm:$0xff] }
 0x197   : > { %984 = vmatpush2.msra.mxu0 %v937_v50  ;;  %v1122_v50 = vld [vmem:[#allocation5 + $0x648] sm:$0xff] }
 0x198   : > { %985 = vmatprep.subr.mxu0 %v936_v51  ;;  %v1121_v51 = vld [vmem:[#allocation5 + $0x640] sm:$0xff] }
 0x199   : > { %986 = vmatpush2.msra.mxu0 %v935_v52  ;;  %v1120_v52 = vld [vmem:[#allocation5 + $0x638] sm:$0xff] }
 0x19a   : > { %987 = vmatprep.subr.mxu0 %v934_v53  ;;  %v1119_v53 = vld [vmem:[#allocation5 + $0x630] sm:$0xff] }
 0x19b   : > { %988 = vmatpush2.msra.mxu0 %v933_v54  ;;  %v1118_v54 = vld [vmem:[#allocation5 + $0x628] sm:$0xff] }
 0x19c   : > { %989 = vmatprep.subr.mxu0 %v932_v55  ;;  %v1117_v55 = vld [vmem:[#allocation5 + $0x620] sm:$0xff] }
 0x19d   : > { %990 = vmatpush2.msra.mxu0 %v931_v57  ;;  %v1116_v57 = vld [vmem:[#allocation5 + $0x618] sm:$0xff] }
 0x19e   : > { %991 = vmatprep.subr.mxu0 %v930_v58  ;;  %v1115_v58 = vld [vmem:[#allocation5 + $0x610] sm:$0xff] }
 0x19f   : > { %992 = vmatpush2.msra.mxu0 %v929_v59  ;;  %v1114_v59 = vld [vmem:[#allocation5 + $0x608] sm:$0xff] }
 0x1a0   : > { %993 = vmatprep.subr.mxu0 %v928_v60  ;;  %v1113_v60 = vld [vmem:[#allocation5 + $0x600] sm:$0xff] }
 0x1a1   : > { %994 = vmatpush2.msra.mxu0 %v927_v61  ;;  %v1176_v61 = vld [vmem:[#allocation5 + $0x7f8] sm:$0xff] }
 0x1a2   : > { %995 = vmatprep.subr.mxu0 %v926_v62  ;;  %v1175_v62 = vld [vmem:[#allocation5 + $0x7f0] sm:$0xff] }
 0x1a3   : > { %996 = vmatpush2.msra.mxu0 %v925_v0  ;;  %v1174_v0 = vld [vmem:[#allocation5 + $0x7e8] sm:$0xff] }
 0x1a4   : > { %997 = vmatprep.subr.mxu0 %v924_v1  ;;  %v1173_v1 = vld [vmem:[#allocation5 + $0x7e0] sm:$0xff] }
 0x1a5   : > { %998 = vmatpush2.msra.mxu0 %v923_v3  ;;  %v1172_v3 = vld [vmem:[#allocation5 + $0x7d8] sm:$0xff] }
 0x1a6   : > { %999 = vmatprep.subr.mxu0 %v922_v4  ;;  %v1171_v4 = vld [vmem:[#allocation5 + $0x7d0] sm:$0xff] }
 0x1a7   : > { %1000 = vmatpush2.msra.mxu0 %v921_v5  ;;  %v1170_v5 = vld [vmem:[#allocation5 + $0x7c8] sm:$0xff] }
 0x1a8   : > { %1001 = vmatprep.subr.mxu0 %v920_v6  ;;  %v1169_v6 = vld [vmem:[#allocation5 + $0x7c0] sm:$0xff] }
 0x1a9   : > { %1002 = vmatpush2.msra.mxu0 %v919_v7  ;;  %v1168_v7 = vld [vmem:[#allocation5 + $0x7b8] sm:$0xff] }
 0x1aa   : > { %1003 = vmatprep.subr.mxu0 %v918_v8  ;;  %v1167_v8 = vld [vmem:[#allocation5 + $0x7b0] sm:$0xff] }
 0x1ab   : > { %1004 = vmatpush2.msra.mxu0 %v917_v9  ;;  %v1166_v9 = vld [vmem:[#allocation5 + $0x7a8] sm:$0xff] }
 0x1ac   : > { %1005 = vmatprep.subr.mxu0 %v916_v10  ;;  %v1165_v10 = vld [vmem:[#allocation5 + $0x7a0] sm:$0xff] }
 0x1ad   : > { %1006 = vmatpush2.msra.mxu0 %v915_v11  ;;  %v1164_v11 = vld [vmem:[#allocation5 + $0x798] sm:$0xff] }
 0x1ae   : > { %1007 = vmatprep.subr.mxu0 %v914_v12  ;;  %v1163_v12 = vld [vmem:[#allocation5 + $0x790] sm:$0xff] }
 0x1af   : > { %1008 = vmatpush2.msra.mxu0 %v913_v13  ;;  %v1162_v13 = vld [vmem:[#allocation5 + $0x788] sm:$0xff] }
 0x1b0   : > { %1010 = vmatmul.mubr.f32.vlgmr.msra.gmra.mxu0 %v6831_v56 }
 0x1b1   : > { %1327 = vmatprep.mubr.f32.mxu0 %v6626_v2 }
 0x22f   : > { %v869_v15 = vpop.f32.mrf.mxu1 }
 0x230   : > { %v780_v14 = vpop.f32.mrf.mxu0 }
 0x231   : > { %v6869_v16 = vadd.f32 %v869_v15, %v780_v14  ;;  %v871_v18 = vpop.f32.mrf.mxu1  ;;  %v1161_v14 = vld [vmem:[#allocation5 + $0x780] sm:$0xff]  ;;  %v1160_v15 = vld [vmem:[#allocation5 + $0x778] sm:$0xff] }
 0x232   : > { %v782_v17 = vpop.f32.mrf.mxu0 }
 0x233   : > { %v6871_v19 = vadd.f32 %v871_v18, %v782_v17  ;;  %v875_v21 = vpop.f32.mrf.mxu1  ;;  %v1159_v17 = vld [vmem:[#allocation5 + $0x770] sm:$0xff]  ;;  %v1158_v18 = vld [vmem:[#allocation5 + $0x768] sm:$0xff] }
 0x234   : > { %v786_v20 = vpop.f32.mrf.mxu0 }
 0x235   : > { %v6873_v22 = vadd.f32 %v875_v21, %v786_v20  ;;  %v1157_v20 = vld [vmem:[#allocation5 + $0x760] sm:$0xff]  ;;  %v1156_v21 = vld [vmem:[#allocation5 + $0x758] sm:$0xff] }
 0x236   : > { %v6875_v23 = vpop.f32.mrf.mxu0 }
 0x270   : > { %v1011_v24 = vpop.f32.mrf.mxu0 }
 0x272   : > { %v1013_v25 = vpop.f32.mrf.mxu0 }
 0x273   : > { %5386 = vmatprep.subr.msk.mxu1 %vm707_vm0, %v1013_v25  ;;  %v1154_v25 = vld [vmem:[#allocation5 + $0x748] sm:$0xff] }
 0x274   : > { %5387 = vmatpush1.msk.msra.mxu1 %vm707_vm0, %v1011_v24  ;;  %v1155_v24 = vld [vmem:[#allocation5 + $0x750] sm:$0xff] }
 0x275   : > { %5388 = vmatmul.mubr.msk.f32.vlgmr.msra.gmra.mxu1 %vm700_vm1, %v5384_v26  ;;  %1177 = vmatprep.subr.mxu1 %v1144_v27  ;;  %v1153_v26 = vld [vmem:[#allocation5 + $0x740] sm:$0xff]  ;;  %v1152_v27 = vld [vmem:[#allocation5 + $0x738] sm:$0xff] }
 0x276   : > { %1178 = vmatpush1.msra.mxu1 %v1143_v28  ;;  %1101 = vmatprep.mubr.f32.mxu1 %v6626_v2  ;;  %v1151_v28 = vld [vmem:[#allocation5 + $0x730] sm:$0xff] }
 0x277   : > { %1179 = vmatprep.subr.mxu1 %v1142_v29  ;;  %v1150_v29 = vld [vmem:[#allocation5 + $0x728] sm:$0xff] }
 0x278   : > { %1180 = vmatpush1.msra.mxu1 %v1141_v30  ;;  %v1149_v30 = vld [vmem:[#allocation5 + $0x720] sm:$0xff] }
 0x279   : > { %5389 = vmatmul.mubr.msk.f32.gmra.mxu1 %vm700_vm1, %v5385_v31  ;;  %1181 = vmatprep.subr.mxu1 %v1140_v32  ;;  %v1148_v31 = vld [vmem:[#allocation5 + $0x718] sm:$0xff]  ;;  %v1147_v32 = vld [vmem:[#allocation5 + $0x710] sm:$0xff] }
 0x27a   : > { %1182 = vmatpush1.msra.mxu1 %v1139_v33  ;;  %1241 = vmatprep.mubr.f32.mxu1 %v6835_v63  ;;  %v1146_v33 = vld [vmem:[#allocation5 + $0x708] sm:$0xff] }
 0x27b   : > { %1183 = vmatprep.subr.mxu1 %v1138_v34  ;;  %v1145_v34 = vld [vmem:[#allocation5 + $0x700] sm:$0xff] }
 0x27c   : > { %1184 = vmatpush1.msra.mxu1 %v1137_v35  ;;  %v877_v35 = vpop.f32.mrf.mxu1 }
 0x27d   : > { %1185 = vmatprep.subr.mxu1 %v1136_v36 }
 0x27e   : > { %1186 = vmatpush1.msra.mxu1 %v1135_v37 }
 0x27f   : > { %1187 = vmatprep.subr.mxu1 %v1134_v38 }
 0x280   : > { %1188 = vmatpush1.msra.mxu1 %v1133_v39 }
 0x281   : > { %1189 = vmatprep.subr.mxu1 %v1132_v40 }
 0x282   : > { %1190 = vmatpush1.msra.mxu1 %v1131_v41  ;;  %v878_v41 = vadd.f32 %v877_v35, %v6875_v23  ;;  %v5391_v23 = vld [vmem:[%s7736_s2 + $0x38] sm:$0xff]  ;;  %v1393_v35 = vld [vmem:[#allocation5 + $0x980] sm:$0xff] }
 0x283   : > { %1191 = vmatprep.subr.mxu1 %v1130_v42 }
 0x284   : > { %1192 = vmatpush1.msra.mxu1 %v1129_v43 }
 0x285   : > { %1193 = vmatprep.subr.mxu1 %v1128_v44 }
 0x286   : > { %1194 = vmatpush1.msra.mxu1 %v1127_v45 }
 0x287   : > { %1195 = vmatprep.subr.mxu1 %v1126_v46 }
 0x288   : > { %1196 = vmatpush1.msra.mxu1 %v1125_v47  ;;  %v1376_v47 = vld [vmem:[#allocation5 + $0x8f8] sm:$0xff] }
 0x289   : > { %1197 = vmatprep.subr.mxu1 %v1124_v48  ;;  %v1374_v48 = vld [vmem:[#allocation5 + $0x8e8] sm:$0xff] }
 0x28a   : > { %1198 = vmatpush1.msra.mxu1 %v1123_v49  ;;  %v1372_v49 = vld [vmem:[#allocation5 + $0x8d8] sm:$0xff] }
 0x28b   : > { %1199 = vmatprep.subr.mxu1 %v1122_v50  ;;  %v1371_v50 = vld [vmem:[#allocation5 + $0x8d0] sm:$0xff] }
 0x28c   : > { %1200 = vmatpush1.msra.mxu1 %v1121_v51  ;;  %v1370_v51 = vld [vmem:[#allocation5 + $0x8c8] sm:$0xff] }
 0x28d   : > { %1201 = vmatprep.subr.mxu1 %v1120_v52  ;;  %v1369_v52 = vld [vmem:[#allocation5 + $0x8c0] sm:$0xff] }
 0x28e   : > { %1202 = vmatpush1.msra.mxu1 %v1119_v53  ;;  %v1368_v53 = vld [vmem:[#allocation5 + $0x8b8] sm:$0xff] }
 0x28f   : > { %1203 = vmatprep.subr.mxu1 %v1118_v54  ;;  %v1367_v54 = vld [vmem:[#allocation5 + $0x8b0] sm:$0xff] }
 0x290   : > { %1204 = vmatpush1.msra.mxu1 %v1117_v55  ;;  %v1366_v55 = vld [vmem:[#allocation5 + $0x8a8] sm:$0xff] }
 0x291   : > { %1205 = vmatprep.subr.mxu1 %v1116_v57  ;;  %v1365_v57 = vld [vmem:[#allocation5 + $0x8a0] sm:$0xff] }
 0x292   : > { %1206 = vmatpush1.msra.mxu1 %v1115_v58  ;;  %v1364_v58 = vld [vmem:[#allocation5 + $0x898] sm:$0xff] }
 0x293   : > { %1207 = vmatprep.subr.mxu1 %v1114_v59  ;;  %v1363_v59 = vld [vmem:[#allocation5 + $0x890] sm:$0xff] }
 0x294   : > { %1208 = vmatpush1.msra.mxu1 %v1113_v60  ;;  %v1362_v60 = vld [vmem:[#allocation5 + $0x888] sm:$0xff] }
 0x295   : > { %1209 = vmatprep.subr.mxu1 %v1176_v61  ;;  %v1361_v61 = vld [vmem:[#allocation5 + $0x880] sm:$0xff] }
 0x296   : > { %1210 = vmatpush2.msra.mxu1 %v1175_v62  ;;  %v1360_v62 = vld [vmem:[#allocation5 + $0x878] sm:$0xff] }
 0x297   : > { %1211 = vmatprep.subr.mxu1 %v1174_v0  ;;  %v1359_v0 = vld [vmem:[#allocation5 + $0x870] sm:$0xff] }
 0x298   : > { %1212 = vmatpush2.msra.mxu1 %v1173_v1  ;;  %v1358_v1 = vld [vmem:[#allocation5 + $0x868] sm:$0xff] }
 0x299   : > { %1213 = vmatprep.subr.mxu1 %v1172_v3  ;;  %v1357_v3 = vld [vmem:[#allocation5 + $0x860] sm:$0xff] }
 0x29a   : > { %1214 = vmatpush2.msra.mxu1 %v1171_v4  ;;  %v1356_v4 = vld [vmem:[#allocation5 + $0x858] sm:$0xff] }
 0x29b   : > { %1215 = vmatprep.subr.mxu1 %v1170_v5  ;;  %v1355_v5 = vld [vmem:[#allocation5 + $0x850] sm:$0xff] }
 0x29c   : > { %1216 = vmatpush2.msra.mxu1 %v1169_v6  ;;  %v1354_v6 = vld [vmem:[#allocation5 + $0x848] sm:$0xff] }
 0x29d   : > { %1217 = vmatprep.subr.mxu1 %v1168_v7  ;;  %v1353_v7 = vld [vmem:[#allocation5 + $0x840] sm:$0xff] }
 0x29e   : > { %1218 = vmatpush2.msra.mxu1 %v1167_v8  ;;  %v1352_v8 = vld [vmem:[#allocation5 + $0x838] sm:$0xff] }
 0x29f   : > { %1219 = vmatprep.subr.mxu1 %v1166_v9  ;;  %v1351_v9 = vld [vmem:[#allocation5 + $0x830] sm:$0xff] }
 0x2a0   : > { %1220 = vmatpush2.msra.mxu1 %v1165_v10  ;;  %v1350_v10 = vld [vmem:[#allocation5 + $0x828] sm:$0xff] }
 0x2a1   : > { %1221 = vmatprep.subr.mxu1 %v1164_v11  ;;  %v1349_v11 = vld [vmem:[#allocation5 + $0x820] sm:$0xff] }
 0x2a2   : > { %1222 = vmatpush2.msra.mxu1 %v1163_v12  ;;  %v1348_v12 = vld [vmem:[#allocation5 + $0x818] sm:$0xff] }
 0x2a3   : > { %1223 = vmatprep.subr.mxu1 %v1162_v13  ;;  %v1347_v13 = vld [vmem:[#allocation5 + $0x810] sm:$0xff] }
 0x2a4   : > { %1224 = vmatpush2.msra.mxu1 %v1161_v14  ;;  %v1346_v14 = vld [vmem:[#allocation5 + $0x808] sm:$0xff] }
 0x2a5   : > { %1225 = vmatprep.subr.mxu1 %v1160_v15  ;;  %v1345_v15 = vld [vmem:[#allocation5 + $0x800] sm:$0xff] }
 0x2a6   : > { %1226 = vmatpush2.msra.mxu1 %v1159_v17  ;;  %v1408_v17 = vld [vmem:[#allocation5 + $0x9f8] sm:$0xff] }
 0x2a7   : > { %1227 = vmatprep.subr.mxu1 %v1158_v18  ;;  %v1407_v18 = vld [vmem:[#allocation5 + $0x9f0] sm:$0xff] }
 0x2a8   : > { %1228 = vmatpush2.msra.mxu1 %v1157_v20  ;;  %v1406_v20 = vld [vmem:[#allocation5 + $0x9e8] sm:$0xff] }
 0x2a9   : > { %1229 = vmatprep.subr.mxu1 %v1156_v21  ;;  %v1405_v21 = vld [vmem:[#allocation5 + $0x9e0] sm:$0xff] }
 0x2aa   : > { %1230 = vmatpush2.msra.mxu1 %v1155_v24  ;;  %v1404_v24 = vld [vmem:[#allocation5 + $0x9d8] sm:$0xff] }
 0x2ab   : > { %1231 = vmatprep.subr.mxu1 %v1154_v25  ;;  %v1403_v25 = vld [vmem:[#allocation5 + $0x9d0] sm:$0xff] }
 0x2ac   : > { %1232 = vmatpush2.msra.mxu1 %v1153_v26  ;;  %v1402_v26 = vld [vmem:[#allocation5 + $0x9c8] sm:$0xff] }
 0x2ad   : > { %1233 = vmatprep.subr.mxu1 %v1152_v27  ;;  %v1401_v27 = vld [vmem:[#allocation5 + $0x9c0] sm:$0xff] }
 0x2ae   : > { %1234 = vmatpush2.msra.mxu1 %v1151_v28  ;;  %v1400_v28 = vld [vmem:[#allocation5 + $0x9b8] sm:$0xff] }
 0x2af   : > { %1235 = vmatprep.subr.mxu1 %v1150_v29  ;;  %v1399_v29 = vld [vmem:[#allocation5 + $0x9b0] sm:$0xff] }
 0x2b0   : > { %1236 = vmatpush2.msra.mxu1 %v1149_v30  ;;  %v1398_v30 = vld [vmem:[#allocation5 + $0x9a8] sm:$0xff] }
 0x2b1   : > { %1237 = vmatprep.subr.mxu1 %v1148_v31  ;;  %v1397_v31 = vld [vmem:[#allocation5 + $0x9a0] sm:$0xff] }
 0x2b2   : > { %1238 = vmatpush2.msra.mxu1 %v1147_v32  ;;  %v1396_v32 = vld [vmem:[#allocation5 + $0x998] sm:$0xff] }
 0x2b3   : > { %1239 = vmatprep.subr.mxu1 %v1146_v33  ;;  %v1395_v33 = vld [vmem:[#allocation5 + $0x990] sm:$0xff] }
 0x2b4   : > { %1240 = vmatpush2.msra.mxu1 %v1145_v34  ;;  %v1394_v34 = vld [vmem:[#allocation5 + $0x988] sm:$0xff] }
 0x2b5   : > { %1242 = vmatmul.mubr.f32.vlgmr.msra.gmra.mxu1 %v6831_v56 }
 0x2b6   : > { %1559 = vmatprep.mubr.f32.mxu1 %v6626_v2 }
 0x335   : > { %v1097_v36 = vpop.f32.mrf.mxu1 }
 0x336   : > { %v6892_v37 = vadd.f32 %v1097_v36, %v6869_v16  ;;  %v5390_v16 = vld [vmem:[%s7736_s2 + $0x30] sm:$0xff]  ;;  %v1392_v36 = vld [vmem:[#allocation5 + $0x978] sm:$0xff] }
 0x337   : > { %v1099_v38 = vpop.f32.mrf.mxu1 }
 0x338   : > { %v6895_v39 = vadd.f32 %v1099_v38, %v6871_v19  ;;  %v1375_v19 = vld [vmem:[#allocation5 + $0x8f0] sm:$0xff] }
 0x339   : > { %v1103_v40 = vpop.f32.mrf.mxu1  ;;  %v1391_v38 = vld [vmem:[#allocation5 + $0x970] sm:$0xff] }
 0x33a   : > { %v6899_v42 = vadd.f32 %v1103_v40, %v6873_v22  ;;  %v1373_v22 = vld [vmem:[#allocation5 + $0x8e0] sm:$0xff]  ;;  %v1390_v40 = vld [vmem:[#allocation5 + $0x968] sm:$0xff] }
 0x33b   : > { %v1105_v43 = vpop.f32.mrf.mxu1 }
 0x33c   : > { %v6901_v44 = vadd.f32 %v1105_v43, %v878_v41  ;;  %v1389_v41 = vld [vmem:[#allocation5 + $0x960] sm:$0xff]  ;;  %v1388_v43 = vld [vmem:[#allocation5 + $0x958] sm:$0xff] }
 0x375   : > { %v1243_v45 = vpop.f32.mrf.mxu1 }
 0x377   : > { %v1245_v46 = vpop.f32.mrf.mxu1 }
 0x378   : > { %5392 = vmatprep.subr.msk.mxu0 %vm707_vm0, %v1245_v46  ;;  %v1386_v46 = vld [vmem:[#allocation5 + $0x948] sm:$0xff] }
 0x379   : > { %5393 = vmatpush1.msk.msra.mxu0 %vm707_vm0, %v1243_v45  ;;  %v1387_v45 = vld [vmem:[#allocation5 + $0x950] sm:$0xff] }
 0x37a   : > { %5394 = vmatmul.mubr.msk.f32.vlgmr.msra.gmra.mxu0 %vm700_vm1, %v5390_v16  ;;  %1409 = vmatprep.subr.mxu0 %v1376_v47  ;;  %v1385_v16 = vld [vmem:[#allocation5 + $0x940] sm:$0xff]  ;;  %v1384_v47 = vld [vmem:[#allocation5 + $0x938] sm:$0xff] }
 0x37b   : > { %1410 = vmatpush1.msra.mxu0 %v1375_v19  ;;  %1333 = vmatprep.mubr.f32.mxu0 %v6626_v2  ;;  %v1383_v19 = vld [vmem:[#allocation5 + $0x930] sm:$0xff] }
 0x37c   : > { %1411 = vmatprep.subr.mxu0 %v1374_v48  ;;  %v1382_v48 = vld [vmem:[#allocation5 + $0x928] sm:$0xff] }
 0x37d   : > { %1412 = vmatpush1.msra.mxu0 %v1373_v22  ;;  %v1381_v22 = vld [vmem:[#allocation5 + $0x920] sm:$0xff] }
 0x37e   : > { %5395 = vmatmul.mubr.msk.f32.gmra.mxu0 %vm700_vm1, %v5391_v23  ;;  %1413 = vmatprep.subr.mxu0 %v1372_v49  ;;  %v1380_v23 = vld [vmem:[#allocation5 + $0x918] sm:$0xff]  ;;  %v1379_v49 = vld [vmem:[#allocation5 + $0x910] sm:$0xff] }
 0x37f   : > { %1414 = vmatpush1.msra.mxu0 %v1371_v50  ;;  %1473 = vmatprep.mubr.f32.mxu0 %v6835_v63  ;;  %v1378_v50 = vld [vmem:[#allocation5 + $0x908] sm:$0xff] }
 0x380   : > { %1415 = vmatprep.subr.mxu0 %v1370_v51  ;;  %v1377_v51 = vld [vmem:[#allocation5 + $0x900] sm:$0xff] }
 0x381   : > { %1416 = vmatpush1.msra.mxu0 %v1369_v52 }
 0x382   : > { %1417 = vmatprep.subr.mxu0 %v1368_v53 }
 0x383   : > { %1418 = vmatpush1.msra.mxu0 %v1367_v54 }
 0x384   : > { %1419 = vmatprep.subr.mxu0 %v1366_v55 }
 0x385   : > { %1420 = vmatpush1.msra.mxu0 %v1365_v57 }
 0x386   : > { %1421 = vmatprep.subr.mxu0 %v1364_v58 }
 0x387   : > { %1422 = vmatpush1.msra.mxu0 %v1363_v59 }
 0x388   : > { %1423 = vmatprep.subr.mxu0 %v1362_v60 }
 0x389   : > { %1424 = vmatpush1.msra.mxu0 %v1361_v61 }
 0x38a   : > { %1425 = vmatprep.subr.mxu0 %v1360_v62  ;;  %v5396_v62 = vld [vmem:[%s7736_s2 + $0x40] sm:$0xff] }
 0x38b   : > { %1426 = vmatpush1.msra.mxu0 %v1359_v0  ;;  %v1607_v0 = vld [vmem:[#allocation5 + $0xaf0] sm:$0xff] }
 0x38c   : > { %1427 = vmatprep.subr.mxu0 %v1358_v1  ;;  %v1604_v1 = vld [vmem:[#allocation5 + $0xad8] sm:$0xff] }
 0x38d   : > { %1428 = vmatpush1.msra.mxu0 %v1357_v3  ;;  %v1603_v3 = vld [vmem:[#allocation5 + $0xad0] sm:$0xff] }
 0x38e   : > { %1429 = vmatprep.subr.mxu0 %v1356_v4  ;;  %v1602_v4 = vld [vmem:[#allocation5 + $0xac8] sm:$0xff] }
 0x38f   : > { %1430 = vmatpush1.msra.mxu0 %v1355_v5  ;;  %v1601_v5 = vld [vmem:[#allocation5 + $0xac0] sm:$0xff] }
 0x390   : > { %1431 = vmatprep.subr.mxu0 %v1354_v6  ;;  %v1600_v6 = vld [vmem:[#allocation5 + $0xab8] sm:$0xff] }
 0x391   : > { %1432 = vmatpush1.msra.mxu0 %v1353_v7  ;;  %v1599_v7 = vld [vmem:[#allocation5 + $0xab0] sm:$0xff] }
 0x392   : > { %1433 = vmatprep.subr.mxu0 %v1352_v8  ;;  %v1598_v8 = vld [vmem:[#allocation5 + $0xaa8] sm:$0xff] }
 0x393   : > { %1434 = vmatpush1.msra.mxu0 %v1351_v9  ;;  %v1597_v9 = vld [vmem:[#allocation5 + $0xaa0] sm:$0xff] }
 0x394   : > { %1435 = vmatprep.subr.mxu0 %v1350_v10  ;;  %v1596_v10 = vld [vmem:[#allocation5 + $0xa98] sm:$0xff] }
 0x395   : > { %1436 = vmatpush1.msra.mxu0 %v1349_v11  ;;  %v1595_v11 = vld [vmem:[#allocation5 + $0xa90] sm:$0xff] }
 0x396   : > { %1437 = vmatprep.subr.mxu0 %v1348_v12  ;;  %v1594_v12 = vld [vmem:[#allocation5 + $0xa88] sm:$0xff] }
 0x397   : > { %1438 = vmatpush1.msra.mxu0 %v1347_v13  ;;  %v1593_v13 = vld [vmem:[#allocation5 + $0xa80] sm:$0xff] }
 0x398   : > { %1439 = vmatprep.subr.mxu0 %v1346_v14  ;;  %v1592_v14 = vld [vmem:[#allocation5 + $0xa78] sm:$0xff] }
 0x399   : > { %1440 = vmatpush1.msra.mxu0 %v1345_v15  ;;  %v1591_v15 = vld [vmem:[#allocation5 + $0xa70] sm:$0xff] }
 0x39a   : > { %1441 = vmatprep.subr.mxu0 %v1408_v17  ;;  %v1590_v17 = vld [vmem:[#allocation5 + $0xa68] sm:$0xff] }
 0x39b   : > { %1442 = vmatpush2.msra.mxu0 %v1407_v18  ;;  %v1589_v18 = vld [vmem:[#allocation5 + $0xa60] sm:$0xff] }
 0x39c   : > { %1443 = vmatprep.subr.mxu0 %v1406_v20  ;;  %v1588_v20 = vld [vmem:[#allocation5 + $0xa58] sm:$0xff] }
 0x39d   : > { %1444 = vmatpush2.msra.mxu0 %v1405_v21  ;;  %v1587_v21 = vld [vmem:[#allocation5 + $0xa50] sm:$0xff] }
 0x39e   : > { %1445 = vmatprep.subr.mxu0 %v1404_v24  ;;  %v1586_v24 = vld [vmem:[#allocation5 + $0xa48] sm:$0xff] }
 0x39f   : > { %1446 = vmatpush2.msra.mxu0 %v1403_v25  ;;  %v1585_v25 = vld [vmem:[#allocation5 + $0xa40] sm:$0xff] }
 0x3a0   : > { %1447 = vmatprep.subr.mxu0 %v1402_v26  ;;  %v1584_v26 = vld [vmem:[#allocation5 + $0xa38] sm:$0xff] }
 0x3a1   : > { %1448 = vmatpush2.msra.mxu0 %v1401_v27  ;;  %v1583_v27 = vld [vmem:[#allocation5 + $0xa30] sm:$0xff] }
 0x3a2   : > { %1449 = vmatprep.subr.mxu0 %v1400_v28  ;;  %v1582_v28 = vld [vmem:[#allocation5 + $0xa28] sm:$0xff] }
 0x3a3   : > { %1450 = vmatpush2.msra.mxu0 %v1399_v29  ;;  %v1581_v29 = vld [vmem:[#allocation5 + $0xa20] sm:$0xff] }
 0x3a4   : > { %1451 = vmatprep.subr.mxu0 %v1398_v30  ;;  %v1580_v30 = vld [vmem:[#allocation5 + $0xa18] sm:$0xff] }
 0x3a5   : > { %1452 = vmatpush2.msra.mxu0 %v1397_v31  ;;  %v1579_v31 = vld [vmem:[#allocation5 + $0xa10] sm:$0xff] }
 0x3a6   : > { %1453 = vmatprep.subr.mxu0 %v1396_v32  ;;  %v1578_v32 = vld [vmem:[#allocation5 + $0xa08] sm:$0xff] }
 0x3a7   : > { %1454 = vmatpush2.msra.mxu0 %v1395_v33  ;;  %v1577_v33 = vld [vmem:[#allocation5 + $0xa00] sm:$0xff] }
 0x3a8   : > { %1455 = vmatprep.subr.mxu0 %v1394_v34  ;;  %v1640_v34 = vld [vmem:[#allocation5 + $0xbf8] sm:$0xff] }
 0x3a9   : > { %1456 = vmatpush2.msra.mxu0 %v1393_v35  ;;  %v1639_v35 = vld [vmem:[#allocation5 + $0xbf0] sm:$0xff] }
 0x3aa   : > { %1457 = vmatprep.subr.mxu0 %v1392_v36  ;;  %v1638_v36 = vld [vmem:[#allocation5 + $0xbe8] sm:$0xff] }
 0x3ab   : > { %1458 = vmatpush2.msra.mxu0 %v1391_v38  ;;  %v1637_v38 = vld [vmem:[#allocation5 + $0xbe0] sm:$0xff] }
 0x3ac   : > { %1459 = vmatprep.subr.mxu0 %v1390_v40  ;;  %v1636_v40 = vld [vmem:[#allocation5 + $0xbd8] sm:$0xff] }
 0x3ad   : > { %1460 = vmatpush2.msra.mxu0 %v1389_v41  ;;  %v1635_v41 = vld [vmem:[#allocation5 + $0xbd0] sm:$0xff] }
 0x3ae   : > { %1461 = vmatprep.subr.mxu0 %v1388_v43  ;;  %v1634_v43 = vld [vmem:[#allocation5 + $0xbc8] sm:$0xff] }
 0x3af   : > { %1462 = vmatpush2.msra.mxu0 %v1387_v45  ;;  %v1633_v45 = vld [vmem:[#allocation5 + $0xbc0] sm:$0xff] }
 0x3b0   : > { %1463 = vmatprep.subr.mxu0 %v1386_v46  ;;  %v1632_v46 = vld [vmem:[#allocation5 + $0xbb8] sm:$0xff] }
 0x3b1   : > { %1464 = vmatpush2.msra.mxu0 %v1385_v16  ;;  %v1631_v16 = vld [vmem:[#allocation5 + $0xbb0] sm:$0xff] }
 0x3b2   : > { %1465 = vmatprep.subr.mxu0 %v1384_v47  ;;  %v1630_v47 = vld [vmem:[#allocation5 + $0xba8] sm:$0xff] }
 0x3b3   : > { %1466 = vmatpush2.msra.mxu0 %v1383_v19  ;;  %v1629_v19 = vld [vmem:[#allocation5 + $0xba0] sm:$0xff] }
 0x3b4   : > { %1467 = vmatprep.subr.mxu0 %v1382_v48  ;;  %v1628_v48 = vld [vmem:[#allocation5 + $0xb98] sm:$0xff] }
 0x3b5   : > { %1468 = vmatpush2.msra.mxu0 %v1381_v22  ;;  %v1627_v22 = vld [vmem:[#allocation5 + $0xb90] sm:$0xff] }
 0x3b6   : > { %1469 = vmatprep.subr.mxu0 %v1380_v23  ;;  %v1626_v23 = vld [vmem:[#allocation5 + $0xb88] sm:$0xff] }
 0x3b7   : > { %1470 = vmatpush2.msra.mxu0 %v1379_v49  ;;  %v1625_v49 = vld [vmem:[#allocation5 + $0xb80] sm:$0xff] }
 0x3b8   : > { %1471 = vmatprep.subr.mxu0 %v1378_v50  ;;  %v1624_v50 = vld [vmem:[#allocation5 + $0xb78] sm:$0xff] }
 0x3b9   : > { %1472 = vmatpush2.msra.mxu0 %v1377_v51  ;;  %v1623_v51 = vld [vmem:[#allocation5 + $0xb70] sm:$0xff] }
 0x3ba   : > { %1474 = vmatmul.mubr.f32.vlgmr.msra.gmra.mxu0 %v6831_v56 }
 0x3bb   : > { %1791 = vmatprep.mubr.f32.mxu0 %v6626_v2 }
 0x43a   : > { %v1329_v52 = vpop.f32.mrf.mxu0 }
 0x43b   : > { %v6918_v53 = vadd.f32 %v1329_v52, %v6892_v37  ;;  %v1608_v37 = vld [vmem:[#allocation5 + $0xaf8] sm:$0xff]  ;;  %v1622_v52 = vld [vmem:[#allocation5 + $0xb68] sm:$0xff] }
 0x43c   : > { %v1331_v54 = vpop.f32.mrf.mxu0 }
 0x43d   : > { %v6921_v55 = vadd.f32 %v1331_v54, %v6895_v39  ;;  %v1606_v39 = vld [vmem:[#allocation5 + $0xae8] sm:$0xff]  ;;  %v1621_v54 = vld [vmem:[#allocation5 + $0xb60] sm:$0xff] }
 0x43e   : > { %v1335_v57 = vpop.f32.mrf.mxu0 }
 0x43f   : > { %v6924_v58 = vadd.f32 %v1335_v57, %v6899_v42  ;;  %v1605_v42 = vld [vmem:[#allocation5 + $0xae0] sm:$0xff]  ;;  %v1620_v57 = vld [vmem:[#allocation5 + $0xb58] sm:$0xff] }
 0x440   : > { %v1337_v59 = vpop.f32.mrf.mxu0 }
 0x441   : > { %v6927_v60 = vadd.f32 %v1337_v59, %v6901_v44  ;;  %v5397_v44 = vld [vmem:[%s7736_s2 + $0x48] sm:$0xff]  ;;  %v1619_v59 = vld [vmem:[#allocation5 + $0xb50] sm:$0xff] }
 0x47a   : > { %v1475_v61 = vpop.f32.mrf.mxu0 }
 0x47c   : > { %v1477_v56 = vpop.f32.mrf.mxu0 }
 0x47d   : > { %5398 = vmatprep.subr.msk.mxu1 %vm707_vm0, %v1477_v56  ;;  %v1617_v56 = vld [vmem:[#allocation5 + $0xb40] sm:$0xff] }
 0x47e   : > { %5399 = vmatpush1.msk.msra.mxu1 %vm707_vm0, %v1475_v61  ;;  %v1618_v61 = vld [vmem:[#allocation5 + $0xb48] sm:$0xff] }
 0x47f   : > { %5400 = vmatmul.mubr.msk.f32.vlgmr.msra.gmra.mxu1 %vm700_vm1, %v5396_v62  ;;  %1641 = vmatprep.subr.mxu1 %v1608_v37  ;;  %v1616_v62 = vld [vmem:[#allocation5 + $0xb38] sm:$0xff]  ;;  %v1615_v37 = vld [vmem:[#allocation5 + $0xb30] sm:$0xff] }
 0x480   : > { %1642 = vmatpush1.msra.mxu1 %v1607_v0  ;;  %1565 = vmatprep.mubr.f32.mxu1 %v6626_v2  ;;  %v1614_v0 = vld [vmem:[#allocation5 + $0xb28] sm:$0xff] }
 0x481   : > { %1643 = vmatprep.subr.mxu1 %v1606_v39  ;;  %v1613_v39 = vld [vmem:[#allocation5 + $0xb20] sm:$0xff] }
 0x482   : > { %1644 = vmatpush1.msra.mxu1 %v1605_v42  ;;  %v1612_v42 = vld [vmem:[#allocation5 + $0xb18] sm:$0xff] }
 0x483   : > { %5401 = vmatmul.mubr.msk.f32.gmra.mxu1 %vm700_vm1, %v5397_v44  ;;  %1645 = vmatprep.subr.mxu1 %v1604_v1  ;;  %v1611_v44 = vld [vmem:[#allocation5 + $0xb10] sm:$0xff]  ;;  %v1610_v1 = vld [vmem:[#allocation5 + $0xb08] sm:$0xff] }
 0x484   : > { %1646 = vmatpush1.msra.mxu1 %v1603_v3  ;;  %1705 = vmatprep.mubr.f32.mxu1 %v6835_v63  ;;  %v1609_v3 = vld [vmem:[#allocation5 + $0xb00] sm:$0xff] }
 0x485   : > { %1647 = vmatprep.subr.mxu1 %v1602_v4  ;;  %v6942_v4 = vld [vmem:[%s6816_s24] sm:$0xff]  ;;  %s7689_s24 = scalar_lea.hbm %s7744_s10, %s5628_s18 }
 0x486   : > { %1648 = vmatpush1.msra.mxu1 %v1601_v5 }
 0x487   : > { %1649 = vmatprep.subr.mxu1 %v1600_v6 }
 0x488   : > { %1650 = vmatpush1.msra.mxu1 %v1599_v7 }
 0x489   : > { %1651 = vmatprep.subr.mxu1 %v1598_v8 }
 0x48a   : > { %1652 = vmatpush1.msra.mxu1 %v1597_v9 }
 0x48b   : > { %1653 = vmatprep.subr.mxu1 %v1596_v10 }
 0x48c   : > { %1654 = vmatpush1.msra.mxu1 %v1595_v11 }
 0x48d   : > { %1655 = vmatprep.subr.mxu1 %v1594_v12 }
 0x48e   : > { %1656 = vmatpush1.msra.mxu1 %v1593_v13 }
 0x48f   : > { %1657 = vmatprep.subr.mxu1 %v1592_v14 }
 0x490   : > { %1658 = vmatpush1.msra.mxu1 %v1591_v15  ;;  %v5402_v15 = vld [vmem:[%s7736_s2 + $0x50] sm:$0xff] }
 0x491   : > { %1659 = vmatprep.subr.mxu1 %v1590_v17  ;;  %v1839_v17 = vld [vmem:[#allocation5 + $0xcf0] sm:$0xff] }
 0x492   : > { %1660 = vmatpush1.msra.mxu1 %v1589_v18  ;;  %v1836_v18 = vld [vmem:[#allocation5 + $0xcd8] sm:$0xff] }
 0x493   : > { %1661 = vmatprep.subr.mxu1 %v1588_v20  ;;  %v1835_v20 = vld [vmem:[#allocation5 + $0xcd0] sm:$0xff] }
 0x494   : > { %1662 = vmatpush1.msra.mxu1 %v1587_v21  ;;  %v1834_v21 = vld [vmem:[#allocation5 + $0xcc8] sm:$0xff] }
 0x495   : > { %1663 = vmatprep.subr.mxu1 %v1586_v24  ;;  %v1833_v24 = vld [vmem:[#allocation5 + $0xcc0] sm:$0xff] }
 0x496   : > { %1664 = vmatpush1.msra.mxu1 %v1585_v25  ;;  %v1832_v25 = vld [vmem:[#allocation5 + $0xcb8] sm:$0xff] }
 0x497   : > { %1665 = vmatprep.subr.mxu1 %v1584_v26  ;;  %v1831_v26 = vld [vmem:[#allocation5 + $0xcb0] sm:$0xff] }
 0x498   : > { %1666 = vmatpush1.msra.mxu1 %v1583_v27  ;;  %v1830_v27 = vld [vmem:[#allocation5 + $0xca8] sm:$0xff] }
 0x499   : > { %1667 = vmatprep.subr.mxu1 %v1582_v28  ;;  %v1829_v28 = vld [vmem:[#allocation5 + $0xca0] sm:$0xff] }
 0x49a   : > { %1668 = vmatpush1.msra.mxu1 %v1581_v29  ;;  %v1828_v29 = vld [vmem:[#allocation5 + $0xc98] sm:$0xff] }
 0x49b   : > { %1669 = vmatprep.subr.mxu1 %v1580_v30  ;;  %v1827_v30 = vld [vmem:[#allocation5 + $0xc90] sm:$0xff] }
 0x49c   : > { %1670 = vmatpush1.msra.mxu1 %v1579_v31  ;;  %v1826_v31 = vld [vmem:[#allocation5 + $0xc88] sm:$0xff] }
 0x49d   : > { %1671 = vmatprep.subr.mxu1 %v1578_v32  ;;  %v1825_v32 = vld [vmem:[#allocation5 + $0xc80] sm:$0xff] }
 0x49e   : > { %1672 = vmatpush1.msra.mxu1 %v1577_v33  ;;  %v1824_v33 = vld [vmem:[#allocation5 + $0xc78] sm:$0xff] }
 0x49f   : > { %1673 = vmatprep.subr.mxu1 %v1640_v34  ;;  %v1823_v34 = vld [vmem:[#allocation5 + $0xc70] sm:$0xff] }
 0x4a0   : > { %1674 = vmatpush2.msra.mxu1 %v1639_v35  ;;  %v1822_v35 = vld [vmem:[#allocation5 + $0xc68] sm:$0xff] }
 0x4a1   : > { %1675 = vmatprep.subr.mxu1 %v1638_v36  ;;  %v1821_v36 = vld [vmem:[#allocation5 + $0xc60] sm:$0xff] }
 0x4a2   : > { %1676 = vmatpush2.msra.mxu1 %v1637_v38  ;;  %v1820_v38 = vld [vmem:[#allocation5 + $0xc58] sm:$0xff] }
 0x4a3   : > { %1677 = vmatprep.subr.mxu1 %v1636_v40  ;;  %v1819_v40 = vld [vmem:[#allocation5 + $0xc50] sm:$0xff] }
 0x4a4   : > { %1678 = vmatpush2.msra.mxu1 %v1635_v41  ;;  %v1818_v41 = vld [vmem:[#allocation5 + $0xc48] sm:$0xff] }
 0x4a5   : > { %1679 = vmatprep.subr.mxu1 %v1634_v43  ;;  %v1817_v43 = vld [vmem:[#allocation5 + $0xc40] sm:$0xff] }
 0x4a6   : > { %1680 = vmatpush2.msra.mxu1 %v1633_v45  ;;  %v1816_v45 = vld [vmem:[#allocation5 + $0xc38] sm:$0xff] }
 0x4a7   : > { %1681 = vmatprep.subr.mxu1 %v1632_v46  ;;  %v1815_v46 = vld [vmem:[#allocation5 + $0xc30] sm:$0xff] }
 0x4a8   : > { %1682 = vmatpush2.msra.mxu1 %v1631_v16  ;;  %v1814_v16 = vld [vmem:[#allocation5 + $0xc28] sm:$0xff] }
 0x4a9   : > { %1683 = vmatprep.subr.mxu1 %v1630_v47  ;;  %v1813_v47 = vld [vmem:[#allocation5 + $0xc20] sm:$0xff] }
 0x4aa   : > { %1684 = vmatpush2.msra.mxu1 %v1629_v19  ;;  %v1812_v19 = vld [vmem:[#allocation5 + $0xc18] sm:$0xff] }
 0x4ab   : > { %1685 = vmatprep.subr.mxu1 %v1628_v48  ;;  %v1811_v48 = vld [vmem:[#allocation5 + $0xc10] sm:$0xff] }
 0x4ac   : > { %1686 = vmatpush2.msra.mxu1 %v1627_v22  ;;  %v1810_v22 = vld [vmem:[#allocation5 + $0xc08] sm:$0xff] }
 0x4ad   : > { %1687 = vmatprep.subr.mxu1 %v1626_v23  ;;  %v1809_v23 = vld [vmem:[#allocation5 + $0xc00] sm:$0xff] }
 0x4ae   : > { %1688 = vmatpush2.msra.mxu1 %v1625_v49  ;;  %v1872_v49 = vld [vmem:[#allocation5 + $0xdf8] sm:$0xff] }
 0x4af   : > { %1689 = vmatprep.subr.mxu1 %v1624_v50  ;;  %v1871_v50 = vld [vmem:[#allocation5 + $0xdf0] sm:$0xff] }
 0x4b0   : > { %1690 = vmatpush2.msra.mxu1 %v1623_v51  ;;  %v1870_v51 = vld [vmem:[#allocation5 + $0xde8] sm:$0xff] }
 0x4b1   : > { %1691 = vmatprep.subr.mxu1 %v1622_v52  ;;  %v1869_v52 = vld [vmem:[#allocation5 + $0xde0] sm:$0xff] }
 0x4b2   : > { %1692 = vmatpush2.msra.mxu1 %v1621_v54  ;;  %v1868_v54 = vld [vmem:[#allocation5 + $0xdd8] sm:$0xff] }
 0x4b3   : > { %1693 = vmatprep.subr.mxu1 %v1620_v57  ;;  %v1867_v57 = vld [vmem:[#allocation5 + $0xdd0] sm:$0xff] }
 0x4b4   : > { %1694 = vmatpush2.msra.mxu1 %v1619_v59  ;;  %v1866_v59 = vld [vmem:[#allocation5 + $0xdc8] sm:$0xff] }
 0x4b5   : > { %1695 = vmatprep.subr.mxu1 %v1618_v61  ;;  %v1865_v61 = vld [vmem:[#allocation5 + $0xdc0] sm:$0xff] }
 0x4b6   : > { %1696 = vmatpush2.msra.mxu1 %v1617_v56  ;;  %v1864_v56 = vld [vmem:[#allocation5 + $0xdb8] sm:$0xff] }
 0x4b7   : > { %1697 = vmatprep.subr.mxu1 %v1616_v62  ;;  %v1863_v62 = vld [vmem:[#allocation5 + $0xdb0] sm:$0xff] }
 0x4b8   : > { %1698 = vmatpush2.msra.mxu1 %v1615_v37  ;;  %v1862_v37 = vld [vmem:[#allocation5 + $0xda8] sm:$0xff] }
 0x4b9   : > { %1699 = vmatprep.subr.mxu1 %v1614_v0  ;;  %v1861_v0 = vld [vmem:[#allocation5 + $0xda0] sm:$0xff] }
 0x4ba   : > { %1700 = vmatpush2.msra.mxu1 %v1613_v39  ;;  %v1860_v39 = vld [vmem:[#allocation5 + $0xd98] sm:$0xff] }
 0x4bb   : > { %1701 = vmatprep.subr.mxu1 %v1612_v42  ;;  %v1859_v42 = vld [vmem:[#allocation5 + $0xd90] sm:$0xff] }
 0x4bc   : > { %1702 = vmatpush2.msra.mxu1 %v1611_v44  ;;  %v1858_v44 = vld [vmem:[#allocation5 + $0xd88] sm:$0xff] }
 0x4bd   : > { %1703 = vmatprep.subr.mxu1 %v1610_v1  ;;  %v1857_v1 = vld [vmem:[#allocation5 + $0xd80] sm:$0xff] }
 0x4be   : > { %1704 = vmatpush2.msra.mxu1 %v1609_v3  ;;  %v1856_v3 = vld [vmem:[#allocation5 + $0xd78] sm:$0xff] }
 0x4bf   : > { %1706 = vmatmul.mubr.f32.vlgmr.msra.gmra.mxu1 %v6942_v4 }
 0x4c0   : > { %2023 = vmatprep.mubr.f32.mxu1 %v6626_v2 }
 0x53f   : > { %v1561_v5 = vpop.f32.mrf.mxu1 }
 0x540   : > { %v6947_v6 = vadd.f32 %v1561_v5, %v6918_v53  ;;  %v1840_v53 = vld [vmem:[#allocation5 + $0xcf8] sm:$0xff]  ;;  %v1855_v5 = vld [vmem:[#allocation5 + $0xd70] sm:$0xff] }
 0x541   : > { %v1563_v7 = vpop.f32.mrf.mxu1 }
 0x542   : > { %v6950_v8 = vadd.f32 %v1563_v7, %v6921_v55  ;;  %v1838_v55 = vld [vmem:[#allocation5 + $0xce8] sm:$0xff] }
 0x543   : > { %v1567_v9 = vpop.f32.mrf.mxu1  ;;  %v1854_v7 = vld [vmem:[#allocation5 + $0xd68] sm:$0xff] }
 0x544   : > { %v6953_v10 = vadd.f32 %v1567_v9, %v6924_v58  ;;  %v1837_v58 = vld [vmem:[#allocation5 + $0xce0] sm:$0xff] }
 0x545   : > { %v1569_v11 = vpop.f32.mrf.mxu1  ;;  %v1853_v9 = vld [vmem:[#allocation5 + $0xd60] sm:$0xff] }
 0x546   : > { %v6956_v12 = vadd.f32 %v1569_v11, %v6927_v60  ;;  %v5403_v60 = vld [vmem:[%s7736_s2 + $0x58] sm:$0xff]  ;;  %v1852_v11 = vld [vmem:[#allocation5 + $0xd58] sm:$0xff] }
 0x57f   : > { %v1707_v13 = vpop.f32.mrf.mxu1 }
 0x581   : > { %v1709_v14 = vpop.f32.mrf.mxu1 }
 0x582   : > { %5404 = vmatprep.subr.msk.mxu0 %vm707_vm0, %v1709_v14  ;;  %v1850_v14 = vld [vmem:[#allocation5 + $0xd48] sm:$0xff] }
 0x583   : > { %5405 = vmatpush1.msk.msra.mxu0 %vm707_vm0, %v1707_v13  ;;  %v1851_v13 = vld [vmem:[#allocation5 + $0xd50] sm:$0xff] }
 0x584   : > { %5406 = vmatmul.mubr.msk.f32.vlgmr.msra.gmra.mxu0 %vm700_vm1, %v5402_v15  ;;  %1873 = vmatprep.subr.mxu0 %v1840_v53  ;;  %v1849_v15 = vld [vmem:[#allocation5 + $0xd40] sm:$0xff]  ;;  %v1848_v53 = vld [vmem:[#allocation5 + $0xd38] sm:$0xff] }
 0x585   : > { %1874 = vmatpush1.msra.mxu0 %v1839_v17  ;;  %1797 = vmatprep.mubr.f32.mxu0 %v6626_v2  ;;  %v1847_v17 = vld [vmem:[#allocation5 + $0xd30] sm:$0xff] }
 0x586   : > { %1875 = vmatprep.subr.mxu0 %v1838_v55  ;;  %v1846_v55 = vld [vmem:[#allocation5 + $0xd28] sm:$0xff] }
 0x587   : > { %1876 = vmatpush1.msra.mxu0 %v1837_v58  ;;  %v1845_v58 = vld [vmem:[#allocation5 + $0xd20] sm:$0xff] }
 0x588   : > { %5407 = vmatmul.mubr.msk.f32.gmra.mxu0 %vm700_vm1, %v5403_v60  ;;  %1877 = vmatprep.subr.mxu0 %v1836_v18  ;;  %v1844_v60 = vld [vmem:[#allocation5 + $0xd18] sm:$0xff]  ;;  %v1843_v18 = vld [vmem:[#allocation5 + $0xd10] sm:$0xff] }
 0x589   : > { %1878 = vmatpush1.msra.mxu0 %v1835_v20  ;;  %1937 = vmatprep.mubr.f32.mxu0 %v6835_v63  ;;  %v1842_v20 = vld [vmem:[#allocation5 + $0xd08] sm:$0xff] }
 0x58a   : > { %1879 = vmatprep.subr.mxu0 %v1834_v21  ;;  %v1841_v21 = vld [vmem:[#allocation5 + $0xd00] sm:$0xff] }
 0x58b   : > { %1880 = vmatpush1.msra.mxu0 %v1833_v24 }
 0x58c   : > { %1881 = vmatprep.subr.mxu0 %v1832_v25 }
 0x58d   : > { %1882 = vmatpush1.msra.mxu0 %v1831_v26 }
 0x58e   : > { %1883 = vmatprep.subr.mxu0 %v1830_v27 }
 0x58f   : > { %1884 = vmatpush1.msra.mxu0 %v1829_v28 }
 0x590   : > { %1885 = vmatprep.subr.mxu0 %v1828_v29 }
 0x591   : > { %1886 = vmatpush1.msra.mxu0 %v1827_v30 }
 0x592   : > { %1887 = vmatprep.subr.mxu0 %v1826_v31 }
 0x593   : > { %1888 = vmatpush1.msra.mxu0 %v1825_v32 }
 0x594   : > { %1889 = vmatprep.subr.mxu0 %v1824_v33 }
 0x595   : > { %1890 = vmatpush1.msra.mxu0 %v1823_v34  ;;  %v5408_v34 = vld [vmem:[%s7736_s2 + $0x60] sm:$0xff] }
 0x596   : > { %1891 = vmatprep.subr.mxu0 %v1822_v35  ;;  %v2071_v35 = vld [vmem:[#allocation5 + $0xef0] sm:$0xff] }
 0x597   : > { %1892 = vmatpush1.msra.mxu0 %v1821_v36  ;;  %v2068_v36 = vld [vmem:[#allocation5 + $0xed8] sm:$0xff] }
 0x598   : > { %1893 = vmatprep.subr.mxu0 %v1820_v38  ;;  %v2067_v38 = vld [vmem:[#allocation5 + $0xed0] sm:$0xff] }
 0x599   : > { %1894 = vmatpush1.msra.mxu0 %v1819_v40  ;;  %v2066_v40 = vld [vmem:[#allocation5 + $0xec8] sm:$0xff] }
 0x59a   : > { %1895 = vmatprep.subr.mxu0 %v1818_v41  ;;  %v2065_v41 = vld [vmem:[#allocation5 + $0xec0] sm:$0xff] }
 0x59b   : > { %1896 = vmatpush1.msra.mxu0 %v1817_v43  ;;  %v2064_v43 = vld [vmem:[#allocation5 + $0xeb8] sm:$0xff] }
 0x59c   : > { %1897 = vmatprep.subr.mxu0 %v1816_v45  ;;  %v2063_v45 = vld [vmem:[#allocation5 + $0xeb0] sm:$0xff] }
 0x59d   : > { %1898 = vmatpush1.msra.mxu0 %v1815_v46  ;;  %v2062_v46 = vld [vmem:[#allocation5 + $0xea8] sm:$0xff] }
 0x59e   : > { %1899 = vmatprep.subr.mxu0 %v1814_v16  ;;  %v2061_v16 = vld [vmem:[#allocation5 + $0xea0] sm:$0xff] }
 0x59f   : > { %1900 = vmatpush1.msra.mxu0 %v1813_v47  ;;  %v2060_v47 = vld [vmem:[#allocation5 + $0xe98] sm:$0xff] }
 0x5a0   : > { %1901 = vmatprep.subr.mxu0 %v1812_v19  ;;  %v2059_v19 = vld [vmem:[#allocation5 + $0xe90] sm:$0xff] }
 0x5a1   : > { %1902 = vmatpush1.msra.mxu0 %v1811_v48  ;;  %v2058_v48 = vld [vmem:[#allocation5 + $0xe88] sm:$0xff] }
 0x5a2   : > { %1903 = vmatprep.subr.mxu0 %v1810_v22  ;;  %v2057_v22 = vld [vmem:[#allocation5 + $0xe80] sm:$0xff] }
 0x5a3   : > { %1904 = vmatpush1.msra.mxu0 %v1809_v23  ;;  %v2056_v23 = vld [vmem:[#allocation5 + $0xe78] sm:$0xff] }
 0x5a4   : > { %1905 = vmatprep.subr.mxu0 %v1872_v49  ;;  %v2055_v49 = vld [vmem:[#allocation5 + $0xe70] sm:$0xff] }
 0x5a5   : > { %1906 = vmatpush2.msra.mxu0 %v1871_v50  ;;  %v2054_v50 = vld [vmem:[#allocation5 + $0xe68] sm:$0xff] }
 0x5a6   : > { %1907 = vmatprep.subr.mxu0 %v1870_v51  ;;  %v2053_v51 = vld [vmem:[#allocation5 + $0xe60] sm:$0xff] }
 0x5a7   : > { %1908 = vmatpush2.msra.mxu0 %v1869_v52  ;;  %v2052_v52 = vld [vmem:[#allocation5 + $0xe58] sm:$0xff] }
 0x5a8   : > { %1909 = vmatprep.subr.mxu0 %v1868_v54  ;;  %v2051_v54 = vld [vmem:[#allocation5 + $0xe50] sm:$0xff] }
 0x5a9   : > { %1910 = vmatpush2.msra.mxu0 %v1867_v57  ;;  %v2050_v57 = vld [vmem:[#allocation5 + $0xe48] sm:$0xff] }
 0x5aa   : > { %1911 = vmatprep.subr.mxu0 %v1866_v59  ;;  %v2049_v59 = vld [vmem:[#allocation5 + $0xe40] sm:$0xff] }
 0x5ab   : > { %1912 = vmatpush2.msra.mxu0 %v1865_v61  ;;  %v2048_v61 = vld [vmem:[#allocation5 + $0xe38] sm:$0xff] }
 0x5ac   : > { %1913 = vmatprep.subr.mxu0 %v1864_v56  ;;  %v2047_v56 = vld [vmem:[#allocation5 + $0xe30] sm:$0xff] }
 0x5ad   : > { %1914 = vmatpush2.msra.mxu0 %v1863_v62  ;;  %v2046_v62 = vld [vmem:[#allocation5 + $0xe28] sm:$0xff] }
 0x5ae   : > { %1915 = vmatprep.subr.mxu0 %v1862_v37  ;;  %v2045_v37 = vld [vmem:[#allocation5 + $0xe20] sm:$0xff] }
 0x5af   : > { %1916 = vmatpush2.msra.mxu0 %v1861_v0  ;;  %v2044_v0 = vld [vmem:[#allocation5 + $0xe18] sm:$0xff] }
 0x5b0   : > { %1917 = vmatprep.subr.mxu0 %v1860_v39  ;;  %v2043_v39 = vld [vmem:[#allocation5 + $0xe10] sm:$0xff] }
 0x5b1   : > { %1918 = vmatpush2.msra.mxu0 %v1859_v42  ;;  %v2042_v42 = vld [vmem:[#allocation5 + $0xe08] sm:$0xff] }
 0x5b2   : > { %1919 = vmatprep.subr.mxu0 %v1858_v44  ;;  %v2041_v44 = vld [vmem:[#allocation5 + $0xe00] sm:$0xff] }
 0x5b3   : > { %1920 = vmatpush2.msra.mxu0 %v1857_v1  ;;  %v2104_v1 = vld [vmem:[#allocation5 + $0xff8] sm:$0xff] }
 0x5b4   : > { %1921 = vmatprep.subr.mxu0 %v1856_v3  ;;  %v2103_v3 = vld [vmem:[#allocation5 + $0xff0] sm:$0xff] }
 0x5b5   : > { %1922 = vmatpush2.msra.mxu0 %v1855_v5  ;;  %v2102_v5 = vld [vmem:[#allocation5 + $0xfe8] sm:$0xff] }
 0x5b6   : > { %1923 = vmatprep.subr.mxu0 %v1854_v7  ;;  %v2101_v7 = vld [vmem:[#allocation5 + $0xfe0] sm:$0xff] }
 0x5b7   : > { %1924 = vmatpush2.msra.mxu0 %v1853_v9  ;;  %v2100_v9 = vld [vmem:[#allocation5 + $0xfd8] sm:$0xff] }
 0x5b8   : > { %1925 = vmatprep.subr.mxu0 %v1852_v11  ;;  %v2099_v11 = vld [vmem:[#allocation5 + $0xfd0] sm:$0xff] }
 0x5b9   : > { %1926 = vmatpush2.msra.mxu0 %v1851_v13  ;;  %v2098_v13 = vld [vmem:[#allocation5 + $0xfc8] sm:$0xff] }
 0x5ba   : > { %1927 = vmatprep.subr.mxu0 %v1850_v14  ;;  %v2097_v14 = vld [vmem:[#allocation5 + $0xfc0] sm:$0xff] }
 0x5bb   : > { %1928 = vmatpush2.msra.mxu0 %v1849_v15  ;;  %v2096_v15 = vld [vmem:[#allocation5 + $0xfb8] sm:$0xff] }
 0x5bc   : > { %1929 = vmatprep.subr.mxu0 %v1848_v53  ;;  %v2095_v53 = vld [vmem:[#allocation5 + $0xfb0] sm:$0xff] }
 0x5bd   : > { %1930 = vmatpush2.msra.mxu0 %v1847_v17  ;;  %v2094_v17 = vld [vmem:[#allocation5 + $0xfa8] sm:$0xff] }
 0x5be   : > { %1931 = vmatprep.subr.mxu0 %v1846_v55  ;;  %v2093_v55 = vld [vmem:[#allocation5 + $0xfa0] sm:$0xff] }
 0x5bf   : > { %1932 = vmatpush2.msra.mxu0 %v1845_v58  ;;  %v2092_v58 = vld [vmem:[#allocation5 + $0xf98] sm:$0xff] }
 0x5c0   : > { %1933 = vmatprep.subr.mxu0 %v1844_v60  ;;  %v2091_v60 = vld [vmem:[#allocation5 + $0xf90] sm:$0xff] }
 0x5c1   : > { %1934 = vmatpush2.msra.mxu0 %v1843_v18  ;;  %v2090_v18 = vld [vmem:[#allocation5 + $0xf88] sm:$0xff] }
 0x5c2   : > { %1935 = vmatprep.subr.mxu0 %v1842_v20  ;;  %v2089_v20 = vld [vmem:[#allocation5 + $0xf80] sm:$0xff] }
 0x5c3   : > { %1936 = vmatpush2.msra.mxu0 %v1841_v21  ;;  %v2088_v21 = vld [vmem:[#allocation5 + $0xf78] sm:$0xff] }
 0x5c4   : > { %1938 = vmatmul.mubr.f32.vlgmr.msra.gmra.mxu0 %v6942_v4 }
 0x5c5   : > { %2255 = vmatprep.mubr.f32.mxu0 %v6626_v2 }
 0x644   : > { %v1793_v24 = vpop.f32.mrf.mxu0 }
 0x645   : > { %v6973_v25 = vadd.f32 %v1793_v24, %v6947_v6  ;;  %v2072_v6 = vld [vmem:[#allocation5 + $0xef8] sm:$0xff]  ;;  %v2087_v24 = vld [vmem:[#allocation5 + $0xf70] sm:$0xff] }
 0x646   : > { %v1795_v26 = vpop.f32.mrf.mxu0 }
 0x647   : > { %v6976_v27 = vadd.f32 %v1795_v26, %v6950_v8  ;;  %v2070_v8 = vld [vmem:[#allocation5 + $0xee8] sm:$0xff] }
 0x648   : > { %v1799_v28 = vpop.f32.mrf.mxu0  ;;  %v2086_v26 = vld [vmem:[#allocation5 + $0xf68] sm:$0xff] }
 0x649   : > { %v6979_v29 = vadd.f32 %v1799_v28, %v6953_v10  ;;  %v2069_v10 = vld [vmem:[#allocation5 + $0xee0] sm:$0xff] }
 0x64a   : > { %v1801_v30 = vpop.f32.mrf.mxu0  ;;  %v2085_v28 = vld [vmem:[#allocation5 + $0xf60] sm:$0xff] }
 0x64b   : > { %v6982_v31 = vadd.f32 %v1801_v30, %v6956_v12  ;;  %v5409_v12 = vld [vmem:[%s7736_s2 + $0x68] sm:$0xff] }
 0x64c   : > { %v2084_v30 = vld [vmem:[#allocation5 + $0xf58] sm:$0xff] }
 0x684   : > { %v1939_v32 = vpop.f32.mrf.mxu0 }
 0x686   : > { %v1941_v33 = vpop.f32.mrf.mxu0 }
 0x687   : > { %5410 = vmatprep.subr.msk.mxu1 %vm707_vm0, %v1941_v33  ;;  %v2082_v33 = vld [vmem:[#allocation5 + $0xf48] sm:$0xff] }
 0x688   : > { %5411 = vmatpush1.msk.msra.mxu1 %vm707_vm0, %v1939_v32  ;;  %v2083_v32 = vld [vmem:[#allocation5 + $0xf50] sm:$0xff] }
 0x689   : > { %5412 = vmatmul.mubr.msk.f32.vlgmr.msra.gmra.mxu1 %vm700_vm1, %v5408_v34  ;;  %2105 = vmatprep.subr.mxu1 %v2072_v6  ;;  %v2081_v34 = vld [vmem:[#allocation5 + $0xf40] sm:$0xff]  ;;  %v2080_v6 = vld [vmem:[#allocation5 + $0xf38] sm:$0xff] }
 0x68a   : > { %2106 = vmatpush1.msra.mxu1 %v2071_v35  ;;  %2029 = vmatprep.mubr.f32.mxu1 %v6626_v2  ;;  %v2079_v35 = vld [vmem:[#allocation5 + $0xf30] sm:$0xff] }
 0x68b   : > { %2107 = vmatprep.subr.mxu1 %v2070_v8  ;;  %v2078_v8 = vld [vmem:[#allocation5 + $0xf28] sm:$0xff] }
 0x68c   : > { %2108 = vmatpush1.msra.mxu1 %v2069_v10  ;;  %v2077_v10 = vld [vmem:[#allocation5 + $0xf20] sm:$0xff] }
 0x68d   : > { %5413 = vmatmul.mubr.msk.f32.gmra.mxu1 %vm700_vm1, %v5409_v12  ;;  %2109 = vmatprep.subr.mxu1 %v2068_v36  ;;  %v2076_v12 = vld [vmem:[#allocation5 + $0xf18] sm:$0xff]  ;;  %v2075_v36 = vld [vmem:[#allocation5 + $0xf10] sm:$0xff] }
 0x68e   : > { %2110 = vmatpush1.msra.mxu1 %v2067_v38  ;;  %2169 = vmatprep.mubr.f32.mxu1 %v6835_v63  ;;  %v2074_v38 = vld [vmem:[#allocation5 + $0xf08] sm:$0xff] }
 0x68f   : > { %2111 = vmatprep.subr.mxu1 %v2066_v40  ;;  %v2073_v40 = vld [vmem:[#allocation5 + $0xf00] sm:$0xff] }
 0x690   : > { %2112 = vmatpush1.msra.mxu1 %v2065_v41 }
 0x691   : > { %2113 = vmatprep.subr.mxu1 %v2064_v43 }
 0x692   : > { %2114 = vmatpush1.msra.mxu1 %v2063_v45 }
 0x693   : > { %2115 = vmatprep.subr.mxu1 %v2062_v46 }
 0x694   : > { %2116 = vmatpush1.msra.mxu1 %v2061_v16 }
 0x695   : > { %2117 = vmatprep.subr.mxu1 %v2060_v47 }
 0x696   : > { %2118 = vmatpush1.msra.mxu1 %v2059_v19 }
 0x697   : > { %2119 = vmatprep.subr.mxu1 %v2058_v48 }
 0x698   : > { %2120 = vmatpush1.msra.mxu1 %v2057_v22 }
 0x699   : > { %2121 = vmatprep.subr.mxu1 %v2056_v23 }
 0x69a   : > { %2122 = vmatpush1.msra.mxu1 %v2055_v49  ;;  %v5414_v49 = vld [vmem:[%s7736_s2 + $0x70] sm:$0xff] }
 0x69b   : > { %2123 = vmatprep.subr.mxu1 %v2054_v50  ;;  %v2303_v50 = vld [vmem:[#allocation5 + $0x10f0] sm:$0xff] }
 0x69c   : > { %2124 = vmatpush1.msra.mxu1 %v2053_v51  ;;  %v2300_v51 = vld [vmem:[#allocation5 + $0x10d8] sm:$0xff] }
 0x69d   : > { %2125 = vmatprep.subr.mxu1 %v2052_v52  ;;  %v2299_v52 = vld [vmem:[#allocation5 + $0x10d0] sm:$0xff] }
 0x69e   : > { %2126 = vmatpush1.msra.mxu1 %v2051_v54  ;;  %v2298_v54 = vld [vmem:[#allocation5 + $0x10c8] sm:$0xff] }
 0x69f   : > { %2127 = vmatprep.subr.mxu1 %v2050_v57  ;;  %v2297_v57 = vld [vmem:[#allocation5 + $0x10c0] sm:$0xff] }
 0x6a0   : > { %2128 = vmatpush1.msra.mxu1 %v2049_v59  ;;  %v2296_v59 = vld [vmem:[#allocation5 + $0x10b8] sm:$0xff] }
 0x6a1   : > { %2129 = vmatprep.subr.mxu1 %v2048_v61  ;;  %v2295_v61 = vld [vmem:[#allocation5 + $0x10b0] sm:$0xff] }
 0x6a2   : > { %2130 = vmatpush1.msra.mxu1 %v2047_v56  ;;  %v2294_v56 = vld [vmem:[#allocation5 + $0x10a8] sm:$0xff] }
 0x6a3   : > { %2131 = vmatprep.subr.mxu1 %v2046_v62  ;;  %v2293_v62 = vld [vmem:[#allocation5 + $0x10a0] sm:$0xff] }
 0x6a4   : > { %2132 = vmatpush1.msra.mxu1 %v2045_v37  ;;  %v2292_v37 = vld [vmem:[#allocation5 + $0x1098] sm:$0xff] }
 0x6a5   : > { %2133 = vmatprep.subr.mxu1 %v2044_v0  ;;  %v2291_v0 = vld [vmem:[#allocation5 + $0x1090] sm:$0xff] }
 0x6a6   : > { %2134 = vmatpush1.msra.mxu1 %v2043_v39  ;;  %v2290_v39 = vld [vmem:[#allocation5 + $0x1088] sm:$0xff] }
 0x6a7   : > { %2135 = vmatprep.subr.mxu1 %v2042_v42  ;;  %v2289_v42 = vld [vmem:[#allocation5 + $0x1080] sm:$0xff] }
 0x6a8   : > { %2136 = vmatpush1.msra.mxu1 %v2041_v44  ;;  %v2288_v44 = vld [vmem:[#allocation5 + $0x1078] sm:$0xff] }
 0x6a9   : > { %2137 = vmatprep.subr.mxu1 %v2104_v1  ;;  %v2287_v1 = vld [vmem:[#allocation5 + $0x1070] sm:$0xff] }
 0x6aa   : > { %2138 = vmatpush2.msra.mxu1 %v2103_v3  ;;  %v2285_v3 = vld [vmem:[#allocation5 + $0x1060] sm:$0xff] }
 0x6ab   : > { %2139 = vmatprep.subr.mxu1 %v2102_v5  ;;  %v2284_v5 = vld [vmem:[#allocation5 + $0x1058] sm:$0xff] }
 0x6ac   : > { %2140 = vmatpush2.msra.mxu1 %v2101_v7  ;;  %v2283_v7 = vld [vmem:[#allocation5 + $0x1050] sm:$0xff] }
 0x6ad   : > { %2141 = vmatprep.subr.mxu1 %v2100_v9  ;;  %v2282_v9 = vld [vmem:[#allocation5 + $0x1048] sm:$0xff] }
 0x6ae   : > { %2142 = vmatpush2.msra.mxu1 %v2099_v11  ;;  %v2281_v11 = vld [vmem:[#allocation5 + $0x1040] sm:$0xff] }
 0x6af   : > { %2143 = vmatprep.subr.mxu1 %v2098_v13  ;;  %v2280_v13 = vld [vmem:[#allocation5 + $0x1038] sm:$0xff] }
 0x6b0   : > { %2144 = vmatpush2.msra.mxu1 %v2097_v14  ;;  %v2279_v14 = vld [vmem:[#allocation5 + $0x1030] sm:$0xff] }
 0x6b1   : > { %2145 = vmatprep.subr.mxu1 %v2096_v15  ;;  %v2278_v15 = vld [vmem:[#allocation5 + $0x1028] sm:$0xff] }
 0x6b2   : > { %2146 = vmatpush2.msra.mxu1 %v2095_v53  ;;  %v2277_v53 = vld [vmem:[#allocation5 + $0x1020] sm:$0xff] }
 0x6b3   : > { %2147 = vmatprep.subr.mxu1 %v2094_v17  ;;  %v2276_v17 = vld [vmem:[#allocation5 + $0x1018] sm:$0xff] }
 0x6b4   : > { %2148 = vmatpush2.msra.mxu1 %v2093_v55  ;;  %v2275_v55 = vld [vmem:[#allocation5 + $0x1010] sm:$0xff] }
 0x6b5   : > { %2149 = vmatprep.subr.mxu1 %v2092_v58  ;;  %v2274_v58 = vld [vmem:[#allocation5 + $0x1008] sm:$0xff] }
 0x6b6   : > { %2150 = vmatpush2.msra.mxu1 %v2091_v60  ;;  %v2273_v60 = vld [vmem:[#allocation5 + $0x1000] sm:$0xff] }
 0x6b7   : > { %2151 = vmatprep.subr.mxu1 %v2090_v18  ;;  %v2336_v18 = vld [vmem:[#allocation5 + $0x11f8] sm:$0xff] }
 0x6b8   : > { %2152 = vmatpush2.msra.mxu1 %v2089_v20  ;;  %v2335_v20 = vld [vmem:[#allocation5 + $0x11f0] sm:$0xff] }
 0x6b9   : > { %2153 = vmatprep.subr.mxu1 %v2088_v21  ;;  %v2334_v21 = vld [vmem:[#allocation5 + $0x11e8] sm:$0xff] }
 0x6ba   : > { %2154 = vmatpush2.msra.mxu1 %v2087_v24  ;;  %v2333_v24 = vld [vmem:[#allocation5 + $0x11e0] sm:$0xff] }
 0x6bb   : > { %2155 = vmatprep.subr.mxu1 %v2086_v26  ;;  %v2332_v26 = vld [vmem:[#allocation5 + $0x11d8] sm:$0xff] }
 0x6bc   : > { %2156 = vmatpush2.msra.mxu1 %v2085_v28  ;;  %v2331_v28 = vld [vmem:[#allocation5 + $0x11d0] sm:$0xff] }
 0x6bd   : > { %2157 = vmatprep.subr.mxu1 %v2084_v30  ;;  %v2330_v30 = vld [vmem:[#allocation5 + $0x11c8] sm:$0xff] }
 0x6be   : > { %2158 = vmatpush2.msra.mxu1 %v2083_v32  ;;  %v2329_v32 = vld [vmem:[#allocation5 + $0x11c0] sm:$0xff] }
 0x6bf   : > { %2159 = vmatprep.subr.mxu1 %v2082_v33  ;;  %v2328_v33 = vld [vmem:[#allocation5 + $0x11b8] sm:$0xff] }
 0x6c0   : > { %2160 = vmatpush2.msra.mxu1 %v2081_v34  ;;  %v2327_v34 = vld [vmem:[#allocation5 + $0x11b0] sm:$0xff] }
 0x6c1   : > { %2161 = vmatprep.subr.mxu1 %v2080_v6  ;;  %v2326_v6 = vld [vmem:[#allocation5 + $0x11a8] sm:$0xff] }
 0x6c2   : > { %2162 = vmatpush2.msra.mxu1 %v2079_v35  ;;  %v2325_v35 = vld [vmem:[#allocation5 + $0x11a0] sm:$0xff] }
 0x6c3   : > { %2163 = vmatprep.subr.mxu1 %v2078_v8  ;;  %v2324_v8 = vld [vmem:[#allocation5 + $0x1198] sm:$0xff] }
 0x6c4   : > { %2164 = vmatpush2.msra.mxu1 %v2077_v10  ;;  %v2323_v10 = vld [vmem:[#allocation5 + $0x1190] sm:$0xff] }
 0x6c5   : > { %2165 = vmatprep.subr.mxu1 %v2076_v12  ;;  %v2322_v12 = vld [vmem:[#allocation5 + $0x1188] sm:$0xff] }
 0x6c6   : > { %2166 = vmatpush2.msra.mxu1 %v2075_v36  ;;  %v2321_v36 = vld [vmem:[#allocation5 + $0x1180] sm:$0xff] }
 0x6c7   : > { %2167 = vmatprep.subr.mxu1 %v2074_v38  ;;  %v2320_v38 = vld [vmem:[#allocation5 + $0x1178] sm:$0xff] }
 0x6c8   : > { %2168 = vmatpush2.msra.mxu1 %v2073_v40  ;;  %v2319_v40 = vld [vmem:[#allocation5 + $0x1170] sm:$0xff] }
 0x6c9   : > { %2170 = vmatmul.mubr.f32.vlgmr.msra.gmra.mxu1 %v6942_v4 }
 0x6ca   : > { %2487 = vmatprep.mubr.f32.mxu1 %v6626_v2 }
 0x749   : > { %v2025_v41 = vpop.f32.mrf.mxu1 }
 0x74a   : > { %v6999_v43 = vadd.f32 %v2025_v41, %v6973_v25  ;;  %v2304_v25 = vld [vmem:[#allocation5 + $0x10f8] sm:$0xff]  ;;  %v2318_v41 = vld [vmem:[#allocation5 + $0x1168] sm:$0xff] }
 0x74b   : > { %v2027_v45 = vpop.f32.mrf.mxu1 }
 0x74c   : > { %v7002_v46 = vadd.f32 %v2027_v45, %v6976_v27  ;;  %v2302_v27 = vld [vmem:[#allocation5 + $0x10e8] sm:$0xff]  ;;  %v2317_v45 = vld [vmem:[#allocation5 + $0x1160] sm:$0xff] }
 0x74d   : > { %v2031_v16 = vpop.f32.mrf.mxu1 }
 0x74e   : > { %v7005_v47 = vadd.f32 %v2031_v16, %v6979_v29  ;;  %v2301_v29 = vld [vmem:[#allocation5 + $0x10e0] sm:$0xff]  ;;  %v2316_v16 = vld [vmem:[#allocation5 + $0x1158] sm:$0xff] }
 0x74f   : > { %v2033_v19 = vpop.f32.mrf.mxu1 }
 0x750   : > { %v7008_v48 = vadd.f32 %v2033_v19, %v6982_v31  ;;  %v5415_v31 = vld [vmem:[%s7736_s2 + $0x78] sm:$0xff]  ;;  %v2315_v19 = vld [vmem:[#allocation5 + $0x1150] sm:$0xff] }
 0x789   : > { %v2171_v22 = vpop.f32.mrf.mxu1 }
 0x78b   : > { %v2173_v23 = vpop.f32.mrf.mxu1 }
 0x78c   : > { %5416 = vmatprep.subr.msk.mxu0 %vm707_vm0, %v2173_v23  ;;  %v2313_v23 = vld [vmem:[#allocation5 + $0x1140] sm:$0xff] }
 0x78d   : > { %5417 = vmatpush1.msk.msra.mxu0 %vm707_vm0, %v2171_v22  ;;  %v2314_v22 = vld [vmem:[#allocation5 + $0x1148] sm:$0xff] }
 0x78e   : > { %5418 = vmatmul.mubr.msk.f32.vlgmr.msra.gmra.mxu0 %vm700_vm1, %v5414_v49  ;;  %2337 = vmatprep.subr.mxu0 %v2304_v25  ;;  %v2312_v49 = vld [vmem:[#allocation5 + $0x1138] sm:$0xff]  ;;  %v2311_v25 = vld [vmem:[#allocation5 + $0x1130] sm:$0xff] }
 0x78f   : > { %2338 = vmatpush1.msra.mxu0 %v2303_v50  ;;  %2261 = vmatprep.mubr.f32.mxu0 %v6626_v2  ;;  %v2310_v50 = vld [vmem:[#allocation5 + $0x1128] sm:$0xff] }
 0x790   : > { %2339 = vmatprep.subr.mxu0 %v2302_v27  ;;  %v2309_v27 = vld [vmem:[#allocation5 + $0x1120] sm:$0xff] }
 0x791   : > { %2340 = vmatpush1.msra.mxu0 %v2301_v29  ;;  %v2308_v29 = vld [vmem:[#allocation5 + $0x1118] sm:$0xff] }
 0x792   : > { %5419 = vmatmul.mubr.msk.f32.gmra.mxu0 %vm700_vm1, %v5415_v31  ;;  %2341 = vmatprep.subr.mxu0 %v2300_v51  ;;  %v2307_v31 = vld [vmem:[#allocation5 + $0x1110] sm:$0xff]  ;;  %v2306_v51 = vld [vmem:[#allocation5 + $0x1108] sm:$0xff] }
 0x793   : > { %2342 = vmatpush1.msra.mxu0 %v2299_v52  ;;  %2401 = vmatprep.mubr.f32.mxu0 %v6835_v63  ;;  %v2286_v63 = vld [vmem:[#allocation5 + $0x1068] sm:$0xff]  ;;  %v2305_v52 = vld [vmem:[#allocation5 + $0x1100] sm:$0xff] }
 0x794   : > { %2343 = vmatprep.subr.mxu0 %v2298_v54  ;;  %v2504_v54 = vld [vmem:[%s7737_s3] sm:$0xff] }
 0x795   : > { %2344 = vmatpush1.msra.mxu0 %v2297_v57  ;;  %v6627_v57 = vmov 0  }
 0x796   : > { %2345 = vmatprep.subr.mxu0 %v2296_v59  ;;  %6434 = vset.pattern.permute.xlu0 %v6627_v57  ;;  %v2505_v59 = vld [vmem:[%s7737_s3 + $0x8] sm:$0xff] }
 0x797   : > { %2346 = vmatpush1.msra.mxu0 %v2295_v61  ;;  %6435 = vset.pattern.permute.xlu1 %v6627_v57  ;;  %v3373_v61 = vld [vmem:[%s7740_s6 + $0x10] sm:$0xff] }
 0x798   : > { %2347 = vmatprep.subr.mxu0 %v2294_v56  ;;  %2508 = vperm.xlu0 %6434, %v2504_v54   ;;  %v5209_v56 = vld [vmem:[%s7743_s9 + $0x10] sm:$0xff] }
 0x799   : > { %2348 = vmatpush1.msra.mxu0 %v2293_v62 }
 0x79a   : > { %2349 = vmatprep.subr.mxu0 %v2292_v37 }
 0x79b   : > { %2350 = vmatpush1.msra.mxu0 %v2291_v0 }
 0x79c   : > { %2351 = vmatprep.subr.mxu0 %v2290_v39  ;;  %2513 = vperm.xlu0 %6434, %v2505_v59   ;;  %v5441_v59 = vld [vmem:[%s7738_s4 + $0x178] sm:$0xff] }
 0x79d   : > { %2352 = vmatpush1.msra.mxu0 %v2289_v42 }
 0x79e   : > { %2353 = vmatprep.subr.mxu0 %v2288_v44 }
 0x79f   : > { %2354 = vmatpush1.msra.mxu0 %v2287_v1 }
 0x7a0   : > { %2355 = vmatprep.subr.mxu0 %v2286_v63  ;;  %3387 = vperm.xlu0 %6434, %v3373_v61  }
 0x7a1   : > { %2356 = vmatpush1.msra.mxu0 %v2285_v3 }
 0x7a2   : > { %2357 = vmatprep.subr.mxu0 %v2284_v5 }
 0x7a3   : > { %2358 = vmatpush1.msra.mxu0 %v2283_v7  ;;  %v5420_v7 = vld [vmem:[%s7736_s2 + $0x80] sm:$0xff] }
 0x7a4   : > { %2359 = vmatprep.subr.mxu0 %v2282_v9  ;;  %v5421_v9 = vld [vmem:[%s7736_s2 + $0x88] sm:$0xff] }
 0x7a5   : > { %2360 = vmatpush1.msra.mxu0 %v2281_v11  ;;  %v2553_v11 = vld [vmem:[%s7738_s4 + $0xe8] sm:$0xff] }
 0x7a6   : > { %2361 = vmatprep.subr.mxu0 %v2280_v13  ;;  %v2537_v13 = vld [vmem:[%s7738_s4 + $0x68] sm:$0xff] }
 0x7a7   : > { %2362 = vmatpush1.msra.mxu0 %v2279_v14  ;;  %v2552_v14 = vld [vmem:[%s7738_s4 + $0xe0] sm:$0xff] }
 0x7a8   : > { %2363 = vmatprep.subr.mxu0 %v2278_v15  ;;  %v2551_v15 = vld [vmem:[%s7738_s4 + $0xd8] sm:$0xff] }
 0x7a9   : > { %2364 = vmatpush1.msra.mxu0 %v2277_v53  ;;  %v2535_v53 = vld [vmem:[%s7738_s4 + $0x58] sm:$0xff] }
 0x7aa   : > { %2365 = vmatprep.subr.mxu0 %v2276_v17  ;;  %v2550_v17 = vld [vmem:[%s7738_s4 + $0xd0] sm:$0xff] }
 0x7ab   : > { %2366 = vmatpush1.msra.mxu0 %v2275_v55  ;;  %v2534_v55 = vld [vmem:[%s7738_s4 + $0x50] sm:$0xff] }
 0x7ac   : > { %2367 = vmatprep.subr.mxu0 %v2274_v58  ;;  %v2549_v58 = vld [vmem:[%s7738_s4 + $0xc8] sm:$0xff] }
 0x7ad   : > { %2368 = vmatpush1.msra.mxu0 %v2273_v60  ;;  %v2533_v60 = vld [vmem:[%s7738_s4 + $0x48] sm:$0xff] }
 0x7ae   : > { %2369 = vmatprep.subr.mxu0 %v2336_v18  ;;  %v2548_v18 = vld [vmem:[%s7738_s4 + $0xc0] sm:$0xff] }
 0x7af   : > { %2370 = vmatpush2.msra.mxu0 %v2335_v20  ;;  %v2532_v20 = vld [vmem:[%s7738_s4 + $0x40] sm:$0xff] }
 0x7b0   : > { %2371 = vmatprep.subr.mxu0 %v2334_v21  ;;  %v2547_v21 = vld [vmem:[%s7738_s4 + $0xb8] sm:$0xff] }
 0x7b1   : > { %2372 = vmatpush2.msra.mxu0 %v2333_v24  ;;  %v2531_v24 = vld [vmem:[%s7738_s4 + $0x38] sm:$0xff] }
 0x7b2   : > { %2373 = vmatprep.subr.mxu0 %v2332_v26  ;;  %v2546_v26 = vld [vmem:[%s7738_s4 + $0xb0] sm:$0xff] }
 0x7b3   : > { %2374 = vmatpush2.msra.mxu0 %v2331_v28  ;;  %v2530_v28 = vld [vmem:[%s7738_s4 + $0x30] sm:$0xff] }
 0x7b4   : > { %2375 = vmatprep.subr.mxu0 %v2330_v30  ;;  %v2545_v30 = vld [vmem:[%s7738_s4 + $0xa8] sm:$0xff] }
 0x7b5   : > { %2376 = vmatpush2.msra.mxu0 %v2329_v32  ;;  %v2529_v32 = vld [vmem:[%s7738_s4 + $0x28] sm:$0xff] }
 0x7b6   : > { %2377 = vmatprep.subr.mxu0 %v2328_v33  ;;  %v2544_v33 = vld [vmem:[%s7738_s4 + $0xa0] sm:$0xff] }
 0x7b7   : > { %2378 = vmatpush2.msra.mxu0 %v2327_v34  ;;  %v2528_v34 = vld [vmem:[%s7738_s4 + $0x20] sm:$0xff] }
 0x7b8   : > { %2379 = vmatprep.subr.mxu0 %v2326_v6  ;;  %v2543_v6 = vld [vmem:[%s7738_s4 + $0x98] sm:$0xff] }
 0x7b9   : > { %2380 = vmatpush2.msra.mxu0 %v2325_v35  ;;  %v2527_v35 = vld [vmem:[%s7738_s4 + $0x18] sm:$0xff] }
 0x7ba   : > { %2381 = vmatprep.subr.mxu0 %v2324_v8  ;;  %v2542_v8 = vld [vmem:[%s7738_s4 + $0x90] sm:$0xff] }
 0x7bb   : > { %2382 = vmatpush2.msra.mxu0 %v2323_v10  ;;  %v2526_v10 = vld [vmem:[%s7738_s4 + $0x10] sm:$0xff] }
 0x7bc   : > { %2383 = vmatprep.subr.mxu0 %v2322_v12  ;;  %v2541_v12 = vld [vmem:[%s7738_s4 + $0x88] sm:$0xff] }
 0x7bd   : > { %2384 = vmatpush2.msra.mxu0 %v2321_v36  ;;  %v2525_v36 = vld [vmem:[%s7738_s4 + $0x8] sm:$0xff] }
 0x7be   : > { %2385 = vmatprep.subr.mxu0 %v2320_v38  ;;  %v2540_v38 = vld [vmem:[%s7738_s4 + $0x80] sm:$0xff] }
 0x7bf   : > { %2386 = vmatpush2.msra.mxu0 %v2319_v40  ;;  %v2524_v40 = vld [vmem:[%s7738_s4] sm:$0xff] }
 0x7c0   : > { %2387 = vmatprep.subr.mxu0 %v2318_v41  ;;  %v5457_v41 = vld [vmem:[%s7738_s4 + $0x1f8] sm:$0xff] }
 0x7c1   : > { %2388 = vmatpush2.msra.mxu0 %v2317_v45 }
 0x7c2   : > { %2389 = vmatprep.subr.mxu0 %v2316_v16 }
 0x7c3   : > { %2390 = vmatpush2.msra.mxu0 %v2315_v19 }
 0x7c4   : > { %2391 = vmatprep.subr.mxu0 %v2314_v22 }
 0x7c5   : > { %2392 = vmatpush2.msra.mxu0 %v2313_v23 }
 0x7c6   : > { %2393 = vmatprep.subr.mxu0 %v2312_v49 }
 0x7c7   : > { %2394 = vmatpush2.msra.mxu0 %v2311_v25 }
 0x7c8   : > { %2395 = vmatprep.subr.mxu0 %v2310_v50 }
 0x7c9   : > { %2396 = vmatpush2.msra.mxu0 %v2309_v27 }
 0x7ca   : > { %2397 = vmatprep.subr.mxu0 %v2308_v29 }
 0x7cb   : > { %2398 = vmatpush2.msra.mxu0 %v2307_v31 }
 0x7cc   : > { %2399 = vmatprep.subr.mxu0 %v2306_v51 }
 0x7cd   : > { %2400 = vmatpush2.msra.mxu0 %v2305_v52 }
 0x7ce   : > { %2402 = vmatmul.mubr.f32.vlgmr.msra.gmra.mxu0 %v6942_v4  ;;  %v5207_v4 = vld [vmem:[%s7743_s9] sm:$0xff] }
 0x7cf   : > { %5213 = vperm.xlu0 %6434, %v5207_v4   ;;  %v5456_v4 = vld [vmem:[%s7738_s4 + $0x1f0] sm:$0xff] }
 0x7d3   : > { %5223 = vperm.xlu0 %6434, %v5209_v56   ;;  %v5440_v56 = vld [vmem:[%s7738_s4 + $0x170] sm:$0xff] }
 0x813   : > { %v2509_v16 = vpop.permute.xlu0 %2508 }
 0x817   : > { %v2514_v31 = vpop.permute.xlu0 %2513 }
 0x84e   : > { %v2257_v62 = vpop.f32.mrf.mxu0 }
 0x84f   : > { %v7039_v37 = vadd.f32 %v2257_v62, %v6999_v43  ;;  %v2555_v43 = vld [vmem:[%s7738_s4 + $0xf8] sm:$0xff] }
 0x850   : > { %v2259_v0 = vpop.f32.mrf.mxu0 }
 0x851   : > { %v7042_v39 = vadd.f32 %v2259_v0, %v7002_v46  ;;  %v2539_v46 = vld [vmem:[%s7738_s4 + $0x78] sm:$0xff] }
 0x852   : > { %v2263_v42 = vpop.f32.mrf.mxu0 }
 0x853   : > { %v7045_v44 = vadd.f32 %v2263_v42, %v7005_v47  ;;  %v2554_v47 = vld [vmem:[%s7738_s4 + $0xf0] sm:$0xff]  ;;  %v5454_v42 = vld [vmem:[%s7738_s4 + $0x1e0] sm:$0xff] }
 0x854   : > { %v2265_v1 = vpop.f32.mrf.mxu0 }
 0x855   : > { %v7048_v63 = vadd.f32 %v2265_v1, %v7008_v48  ;;  %v2538_v48 = vld [vmem:[%s7738_s4 + $0x70] sm:$0xff]  ;;  %v5453_v1 = vld [vmem:[%s7738_s4 + $0x1d8] sm:$0xff] }
 0x88e   : > { %v2403_v3 = vpop.f32.mrf.mxu0 }
 0x890   : > { %v2405_v5 = vpop.f32.mrf.mxu0 }
 0x891   : > { %5422 = vmatprep.subr.msk.mxu1 %vm707_vm0, %v2405_v5  ;;  %v5436_v5 = vld [vmem:[%s7738_s4 + $0x150] sm:$0xff] }
 0x892   : > { %5423 = vmatpush1.msk.msra.mxu1 %vm707_vm0, %v2403_v3  ;;  %v5452_v3 = vld [vmem:[%s7738_s4 + $0x1d0] sm:$0xff] }
 0x893   : > { %5424 = vmatmul.mubr.msk.f32.vlgmr.msra.gmra.mxu1 %vm700_vm1, %v5420_v7  ;;  %5629 = vmatprep.subr.mxu1 %v2555_v43  ;;  %v5451_v7 = vld [vmem:[%s7738_s4 + $0x1c8] sm:$0xff] }
 0x894   : > { %2493 = vmatprep.mubr.f32.mxu1 %v6626_v2  ;;  %5630 = vmatpush3.msra.mxu1 %v2539_v46  ;;  %v2536_v2 = vld [vmem:[%s7738_s4 + $0x60] sm:$0xff]  ;;  %v5435_v43 = vld [vmem:[%s7738_s4 + $0x148] sm:$0xff] }
 0x895   : > { %5631 = vmatprep.subr.mxu1 %v2554_v47  ;;  %v5450_v46 = vld [vmem:[%s7738_s4 + $0x1c0] sm:$0xff] }
 0x896   : > { %5632 = vmatpush3.msra.mxu1 %v2538_v48  ;;  %v5434_v47 = vld [vmem:[%s7738_s4 + $0x140] sm:$0xff]  ;;  %v5449_v48 = vld [vmem:[%s7738_s4 + $0x1b8] sm:$0xff] }
 0x897   : > { %5425 = vmatmul.mubr.msk.f32.gmra.mxu1 %vm700_vm1, %v5421_v9  ;;  %5633 = vmatprep.subr.mxu1 %v2553_v11  ;;  %v5433_v9 = vld [vmem:[%s7738_s4 + $0x138] sm:$0xff]  ;;  %v5448_v11 = vld [vmem:[%s7738_s4 + $0x1b0] sm:$0xff] }
 0x898   : > { %5634 = vmatpush3.msra.mxu1 %v2537_v13  ;;  %v5432_v13 = vld [vmem:[%s7738_s4 + $0x130] sm:$0xff] }
 0x899   : > { %5635 = vmatprep.subr.mxu1 %v2552_v14  ;;  %v5447_v14 = vld [vmem:[%s7738_s4 + $0x1a8] sm:$0xff] }
 0x89a   : > { %5636 = vmatpush3.msra.mxu1 %v2536_v2  ;;  %v5431_v2 = vld [vmem:[%s7738_s4 + $0x128] sm:$0xff] }
 0x89b   : > { %5637 = vmatprep.subr.mxu1 %v2551_v15  ;;  %v5446_v15 = vld [vmem:[%s7738_s4 + $0x1a0] sm:$0xff] }
 0x89c   : > { %5638 = vmatpush3.msra.mxu1 %v2535_v53  ;;  %v5430_v53 = vld [vmem:[%s7738_s4 + $0x120] sm:$0xff] }
 0x89d   : > { %5639 = vmatprep.subr.mxu1 %v2550_v17  ;;  %v5445_v17 = vld [vmem:[%s7738_s4 + $0x198] sm:$0xff] }
 0x89e   : > { %5640 = vmatpush3.msra.mxu1 %v2534_v55  ;;  %v5429_v55 = vld [vmem:[%s7738_s4 + $0x118] sm:$0xff] }
 0x89f   : > { %5641 = vmatprep.subr.mxu1 %v2549_v58  ;;  %v5444_v58 = vld [vmem:[%s7738_s4 + $0x190] sm:$0xff] }
 0x8a0   : > { %5642 = vmatpush3.msra.mxu1 %v2533_v60  ;;  %v5428_v60 = vld [vmem:[%s7738_s4 + $0x110] sm:$0xff] }
 0x8a1   : > { %5643 = vmatprep.subr.mxu1 %v2548_v18  ;;  %v5443_v18 = vld [vmem:[%s7738_s4 + $0x188] sm:$0xff] }
 0x8a2   : > { %5644 = vmatpush3.msra.mxu1 %v2532_v20  ;;  %v5427_v20 = vld [vmem:[%s7738_s4 + $0x108] sm:$0xff] }
 0x8a3   : > { %5645 = vmatprep.subr.mxu1 %v2547_v21  ;;  %v5442_v21 = vld [vmem:[%s7738_s4 + $0x180] sm:$0xff] }
 0x8a4   : > { %5646 = vmatpush3.msra.mxu1 %v2531_v24  ;;  %v5426_v24 = vld [vmem:[%s7738_s4 + $0x100] sm:$0xff] }
 0x8a5   : > { %5647 = vmatprep.subr.mxu1 %v2546_v26  ;;  %v5501_v26 = vld [vmem:[%s7738_s4 + $0x2f8] sm:$0xff] }
 0x8a6   : > { %5648 = vmatpush3.msra.mxu1 %v2530_v28  ;;  %v5485_v28 = vld [vmem:[%s7738_s4 + $0x278] sm:$0xff] }
 0x8a7   : > { %5649 = vmatprep.subr.mxu1 %v2545_v30  ;;  %v5500_v30 = vld [vmem:[%s7738_s4 + $0x2f0] sm:$0xff] }
 0x8a8   : > { %5650 = vmatpush3.msra.mxu1 %v2529_v32  ;;  %v5484_v32 = vld [vmem:[%s7738_s4 + $0x270] sm:$0xff] }
 0x8a9   : > { %5651 = vmatprep.subr.mxu1 %v2544_v33  ;;  %v5499_v33 = vld [vmem:[%s7738_s4 + $0x2e8] sm:$0xff] }
 0x8aa   : > { %5652 = vmatpush3.msra.mxu1 %v2528_v34  ;;  %v5483_v34 = vld [vmem:[%s7738_s4 + $0x268] sm:$0xff] }
 0x8ab   : > { %5653 = vmatprep.subr.mxu1 %v2543_v6  ;;  %v5498_v6 = vld [vmem:[%s7738_s4 + $0x2e0] sm:$0xff] }
 0x8ac   : > { %5654 = vmatpush3.msra.mxu1 %v2527_v35  ;;  %v5482_v35 = vld [vmem:[%s7738_s4 + $0x260] sm:$0xff] }
 0x8ad   : > { %5655 = vmatprep.subr.mxu1 %v2542_v8  ;;  %v5497_v8 = vld [vmem:[%s7738_s4 + $0x2d8] sm:$0xff] }
 0x8ae   : > { %5656 = vmatpush3.msra.mxu1 %v2526_v10  ;;  %v5481_v10 = vld [vmem:[%s7738_s4 + $0x258] sm:$0xff] }
 0x8af   : > { %5657 = vmatprep.subr.mxu1 %v2541_v12  ;;  %v5496_v12 = vld [vmem:[%s7738_s4 + $0x2d0] sm:$0xff] }
 0x8b0   : > { %5658 = vmatpush3.msra.mxu1 %v2525_v36  ;;  %v5480_v36 = vld [vmem:[%s7738_s4 + $0x250] sm:$0xff] }
 0x8b1   : > { %5659 = vmatprep.subr.mxu1 %v2540_v38  ;;  %v5495_v38 = vld [vmem:[%s7738_s4 + $0x2c8] sm:$0xff] }
 0x8b2   : > { %5660 = vmatpush3.msra.mxu1 %v2524_v40  ;;  %v5479_v40 = vld [vmem:[%s7738_s4 + $0x248] sm:$0xff] }
 0x8b3   : > { %5667 = vmatprep.subr.mxu1 %v5457_v41  ;;  %v5494_v41 = vld [vmem:[%s7738_s4 + $0x2c0] sm:$0xff] }
 0x953   : > { %v2489_v45 = vpop.f32.mrf.mxu1 }
 0x954   : > { %v2500_v19 = vadd.f32 %v2489_v45, %v7039_v37  ;;  %v5455_v37 = vld [vmem:[%s7738_s4 + $0x1e8] sm:$0xff]  ;;  %v5478_v45 = vld [vmem:[%s7738_s4 + $0x240] sm:$0xff] }
 0x955   : > { %v2491_v22 = vpop.f32.mrf.mxu1 }
 0x956   : > { %v2501_v23 = vadd.f32 %v2491_v22, %v7042_v39  ;;  %v2516_v49 = vadd.f32 %v2509_v16, %v2500_v19  ;;  %v5439_v39 = vld [vmem:[%s7738_s4 + $0x168] sm:$0xff]  ;;  %v5477_v19 = vld [vmem:[%s7738_s4 + $0x238] sm:$0xff]  ;;  %v5492_v22 = vld [vmem:[%s7738_s4 + $0x2b0] sm:$0xff] }
 0x957   : > { %v2495_v25 = vpop.f32.mrf.mxu1 }
 0x958   : > { %v2517_v50 = vadd.f32 %v2509_v16, %v2501_v23  ;;  %v2502_v27 = vadd.f32 %v2495_v25, %v7045_v44  ;;  %v7166_v54 = vmax.f32 %v2516_v49, 0.0  ;;  %v5438_v44 = vld [vmem:[%s7738_s4 + $0x160] sm:$0xff]  ;;  %v5493_v16 = vld [vmem:[%s7738_s4 + $0x2b8] sm:$0xff]  ;;  %v5476_v23 = vld [vmem:[%s7738_s4 + $0x230] sm:$0xff] }
 0x959   : > { %v2497_v29 = vpop.f32.mrf.mxu1  ;;  %v5491_v49 = vld [vmem:[%s7738_s4 + $0x2a8] sm:$0xff] }
 0x95a   : > { %v7163_v51 = vmax.f32 %v2517_v50, 0.0  ;;  %v2503_v52 = vadd.f32 %v2497_v29, %v7048_v63  ;;  %v2518_v57 = vadd.f32 %v2514_v31, %v2502_v27  ;;  %v5437_v63 = vld [vmem:[%s7738_s4 + $0x158] sm:$0xff]  ;;  %v5475_v25 = vld [vmem:[%s7738_s4 + $0x228] sm:$0xff]  ;;  %v5490_v50 = vld [vmem:[%s7738_s4 + $0x2a0] sm:$0xff] }
 0x95b   : > { %v5474_v27 = vld [vmem:[%s7738_s4 + $0x220] sm:$0xff]  ;;  %v5489_v29 = vld [vmem:[%s7738_s4 + $0x298] sm:$0xff] }
 0x95c   : > { %v2519_v61 = vadd.f32 %v2514_v31, %v2503_v52  ;;  %2620 = vmatprep.mubr.f32.mxu1 %v7163_v51  ;;  %v7184_v0 = vmax.f32 %v2518_v57, 0.0  ;;  %v5473_v31 = vld [vmem:[%s7738_s4 + $0x218] sm:$0xff]  ;;  %v5488_v52 = vld [vmem:[%s7738_s4 + $0x290] sm:$0xff] }
 0x95d   : > { %2621 = vmatmul.mubr.f32.vlgmr.msra.gmra.mxu1 %v7166_v54  ;;  %v5472_v57 = vld [vmem:[%s7738_s4 + $0x210] sm:$0xff] }
 0x95e   : > { %v7179_v62 = vmax.f32 %v2519_v61, 0.0  ;;  %5668 = vmatpush3.msra.mxu1 %v5441_v59  ;;  %v5487_v59 = vld [vmem:[%s7738_s4 + $0x288] sm:$0xff] }
 0x95f   : > { %5669 = vmatprep.subr.mxu1 %v5456_v4  ;;  %v5471_v61 = vld [vmem:[%s7738_s4 + $0x208] sm:$0xff]  ;;  %v5486_v4 = vld [vmem:[%s7738_s4 + $0x280] sm:$0xff] }
 0x960   : > { %5670 = vmatpush3.msra.mxu1 %v5440_v56  ;;  %2625 = vmatprep.mubr.f32.mxu1 %v7179_v62  ;;  %v5470_v56 = vld [vmem:[%s7738_s4 + $0x200] sm:$0xff] }
 0x961   : > { %5671 = vmatprep.subr.mxu1 %v5455_v37  ;;  %2626 = vmatmul.mubr.f32.gmra.mxu1 %v7184_v0  ;;  %v5458_v37 = vld [vmem:[%s7739_s5 + $0x20] sm:$0xff] }
 0x962   : > { %5672 = vmatpush3.msra.mxu1 %v5439_v39  ;;  %2732 = vmatprep.mubr.f32.mxu1 %v7163_v51 }
 0x963   : > { %5673 = vmatprep.subr.mxu1 %v5454_v42  ;;  %5989 = vmatprep.mubr.msk.f32.mxu0 %vm2748_vm2, %v5458_v37  ;;  %v5510_v37 = vld [vmem:[%s7738_s4 + $0x300] sm:$0xff] }
 0x964   : > { %5674 = vmatpush3.msra.mxu1 %v5438_v44 }
 0x965   : > { %5675 = vmatprep.subr.mxu1 %v5453_v1 }
 0x966   : > { %5676 = vmatpush3.msra.mxu1 %v5437_v63 }
 0x967   : > { %5677 = vmatprep.subr.mxu1 %v5452_v3 }
 0x968   : > { %5678 = vmatpush3.msra.mxu1 %v5436_v5 }
 0x969   : > { %5679 = vmatprep.subr.mxu1 %v5451_v7 }
 0x96a   : > { %5680 = vmatpush3.msra.mxu1 %v5435_v43 }
 0x96b   : > { %5681 = vmatprep.subr.mxu1 %v5450_v46 }
 0x96c   : > { %5682 = vmatpush3.msra.mxu1 %v5434_v47  ;;  %v5459_v47 = vld [vmem:[%s7739_s5 + $0x28] sm:$0xff] }
 0x96d   : > { %5683 = vmatprep.subr.mxu1 %v5449_v48 }
 0x96e   : > { %5684 = vmatpush3.msra.mxu1 %v5433_v9  ;;  %v5460_v9 = vld [vmem:[%s7739_s5 + $0x30] sm:$0xff] }
 0x96f   : > { %5685 = vmatprep.subr.mxu1 %v5448_v11 }
 0x970   : > { %5686 = vmatpush3.msra.mxu1 %v5432_v13  ;;  %v5461_v13 = vld [vmem:[%s7739_s5 + $0x38] sm:$0xff] }
 0x971   : > { %5687 = vmatprep.subr.mxu1 %v5447_v14  ;;  %v2631_v14 = vld [vmem:[%s7739_s5] sm:$0xff] }
 0x972   : > { %5688 = vmatpush3.msra.mxu1 %v5431_v2  ;;  %v2632_v2 = vld [vmem:[%s7739_s5 + $0x8] sm:$0xff] }
 0x973   : > { %5689 = vmatprep.subr.mxu1 %v5446_v15  ;;  %v2633_v15 = vld [vmem:[%s7739_s5 + $0x10] sm:$0xff] }
 0x974   : > { %5690 = vmatpush3.msra.mxu1 %v5430_v53  ;;  %v2634_v53 = vld [vmem:[%s7739_s5 + $0x18] sm:$0xff] }
 0x975   : > { %5691 = vmatprep.subr.mxu1 %v5445_v17  ;;  %v5502_v17 = vld [vmem:[%s7739_s5 + $0x40] sm:$0xff] }
 0x976   : > { %5692 = vmatpush3.msra.mxu1 %v5429_v55 }
 0x977   : > { %5693 = vmatprep.subr.mxu1 %v5444_v58 }
 0x978   : > { %5694 = vmatpush3.msra.mxu1 %v5428_v60 }
 0x979   : > { %5695 = vmatprep.subr.mxu1 %v5443_v18 }
 0x97a   : > { %5696 = vmatpush3.msra.mxu1 %v5427_v20 }
 0x97b   : > { %5697 = vmatprep.subr.mxu1 %v5442_v21 }
 0x97c   : > { %5698 = vmatpush3.msra.mxu1 %v5426_v24  ;;  %v5503_v24 = vld [vmem:[%s7739_s5 + $0x48] sm:$0xff] }
 0x97d   : > { %2733 = vmatmul.mubr.f32.vlgmr.msra.gmra.mxu1 %v7166_v54  ;;  %5717 = vmatprep.subr.mxu1 %v5501_v26  ;;  %v5541_v26 = vld [vmem:[%s7738_s4 + $0x3f8] sm:$0xff] }
 0x97e   : > { %2737 = vmatprep.mubr.f32.mxu1 %v7179_v62  ;;  %5718 = vmatpush3.msra.mxu1 %v5485_v28  ;;  %v5525_v28 = vld [vmem:[%s7738_s4 + $0x378] sm:$0xff] }
 0x97f   : > { %5719 = vmatprep.subr.mxu1 %v5500_v30  ;;  %v5504_v30 = vld [vmem:[%s7739_s5 + $0x50] sm:$0xff] }
 0x980   : > { %5720 = vmatpush3.msra.mxu1 %v5484_v32  ;;  %v5540_v32 = vld [vmem:[%s7738_s4 + $0x3f0] sm:$0xff] }
 0x981   : > { %2738 = vmatmul.mubr.f32.gmra.mxu1 %v7184_v0  ;;  %5721 = vmatprep.subr.mxu1 %v5499_v33  ;;  %v5524_v33 = vld [vmem:[%s7738_s4 + $0x370] sm:$0xff] }
 0x982   : > { %5722 = vmatpush3.msra.mxu1 %v5483_v34  ;;  %3040 = vmatprep.mubr.f32.mxu1 %v7163_v51  ;;  %v5505_v34 = vld [vmem:[%s7739_s5 + $0x58] sm:$0xff] }
 0x983   : > { %5723 = vmatprep.subr.mxu1 %v5498_v6  ;;  %v5539_v6 = vld [vmem:[%s7738_s4 + $0x3e8] sm:$0xff] }
 0x984   : > { %5724 = vmatpush3.msra.mxu1 %v5482_v35  ;;  %v5523_v35 = vld [vmem:[%s7738_s4 + $0x368] sm:$0xff] }
 0x985   : > { %5725 = vmatprep.subr.mxu1 %v5497_v8  ;;  %v5538_v8 = vld [vmem:[%s7738_s4 + $0x3e0] sm:$0xff] }
 0x986   : > { %5726 = vmatpush3.msra.mxu1 %v5481_v10  ;;  %v5522_v10 = vld [vmem:[%s7738_s4 + $0x360] sm:$0xff] }
 0x987   : > { %5727 = vmatprep.subr.mxu1 %v5496_v12  ;;  %v5537_v12 = vld [vmem:[%s7738_s4 + $0x3d8] sm:$0xff] }
 0x988   : > { %5728 = vmatpush3.msra.mxu1 %v5480_v36  ;;  %v5521_v36 = vld [vmem:[%s7738_s4 + $0x358] sm:$0xff] }
 0x989   : > { %5729 = vmatprep.subr.mxu1 %v5495_v38  ;;  %v5536_v38 = vld [vmem:[%s7738_s4 + $0x3d0] sm:$0xff] }
 0x98a   : > { %5730 = vmatpush3.msra.mxu1 %v5479_v40  ;;  %v5520_v40 = vld [vmem:[%s7738_s4 + $0x350] sm:$0xff] }
 0x98b   : > { %5731 = vmatprep.subr.mxu1 %v5494_v41  ;;  %v5519_v41 = vld [vmem:[%s7738_s4 + $0x348] sm:$0xff] }
 0x98c   : > { %5732 = vmatpush3.msra.mxu1 %v5478_v45  ;;  %v5534_v45 = vld [vmem:[%s7738_s4 + $0x3c0] sm:$0xff] }
 0x98d   : > { %5733 = vmatprep.subr.mxu1 %v5493_v16  ;;  %v5518_v16 = vld [vmem:[%s7738_s4 + $0x340] sm:$0xff] }
 0x98e   : > { %5734 = vmatpush3.msra.mxu1 %v5477_v19  ;;  %v5533_v19 = vld [vmem:[%s7738_s4 + $0x3b8] sm:$0xff] }
 0x98f   : > { %5735 = vmatprep.subr.mxu1 %v5492_v22  ;;  %v5517_v22 = vld [vmem:[%s7738_s4 + $0x338] sm:$0xff] }
 0x990   : > { %5736 = vmatpush3.msra.mxu1 %v5476_v23  ;;  %v5532_v23 = vld [vmem:[%s7738_s4 + $0x3b0] sm:$0xff] }
 0x991   : > { %5737 = vmatprep.subr.mxu1 %v5491_v49  ;;  %v5516_v49 = vld [vmem:[%s7738_s4 + $0x330] sm:$0xff] }
 0x992   : > { %5738 = vmatpush3.msra.mxu1 %v5475_v25  ;;  %v5531_v25 = vld [vmem:[%s7738_s4 + $0x3a8] sm:$0xff] }
 0x993   : > { %5739 = vmatprep.subr.mxu1 %v5490_v50  ;;  %v5515_v50 = vld [vmem:[%s7738_s4 + $0x328] sm:$0xff] }
 0x994   : > { %5740 = vmatpush3.msra.mxu1 %v5474_v27  ;;  %v5530_v27 = vld [vmem:[%s7738_s4 + $0x3a0] sm:$0xff] }
 0x995   : > { %5741 = vmatprep.subr.mxu1 %v5489_v29  ;;  %v5514_v29 = vld [vmem:[%s7738_s4 + $0x320] sm:$0xff] }
 0x996   : > { %5742 = vmatpush3.msra.mxu1 %v5473_v31  ;;  %v5529_v31 = vld [vmem:[%s7738_s4 + $0x398] sm:$0xff] }
 0x997   : > { %5743 = vmatprep.subr.mxu1 %v5488_v52  ;;  %v5513_v52 = vld [vmem:[%s7738_s4 + $0x318] sm:$0xff] }
 0x998   : > { %5744 = vmatpush3.msra.mxu1 %v5472_v57  ;;  %v5528_v57 = vld [vmem:[%s7738_s4 + $0x390] sm:$0xff] }
 0x999   : > { %5745 = vmatprep.subr.mxu1 %v5487_v59  ;;  %v5512_v59 = vld [vmem:[%s7738_s4 + $0x310] sm:$0xff] }
 0x99a   : > { %5746 = vmatpush3.msra.mxu1 %v5471_v61  ;;  %v5527_v61 = vld [vmem:[%s7738_s4 + $0x388] sm:$0xff] }
 0x99b   : > { %5747 = vmatprep.subr.mxu1 %v5486_v4  ;;  %v5511_v4 = vld [vmem:[%s7738_s4 + $0x308] sm:$0xff] }
 0x99c   : > { %5748 = vmatpush3.msra.mxu1 %v5470_v56  ;;  %v5526_v56 = vld [vmem:[%s7738_s4 + $0x380] sm:$0xff] }
 0x99d   : > { %3041 = vmatmul.mubr.f32.vlgmr.msra.gmra.mxu1 %v7166_v54 }
 0x99e   : > { %3045 = vmatprep.mubr.f32.mxu1 %v7179_v62 }
 0x9a1   : > { %3046 = vmatmul.mubr.f32.gmra.mxu1 %v7184_v0 }
 0xa1d   : > { %v5661_v39 = vpop.f32.mrf.mxu1 }
 0xa1f   : > { %v5662_v42 = vpop.f32.mrf.mxu1 }
 0xa20   : > { %v5663_v11 = vadd.f32 %v5662_v42, %v5661_v39  ;;  %v5542_v39 = vld [vmem:[%s7739_s5 + $0x60] sm:$0xff] }
 0xa21   : > { %v5664_v44 = vpop.f32.mrf.mxu1  ;;  %6019 = vmatprep.mubr.msk.f32.mxu1 %vm2748_vm2, %v5542_v39  ;;  %v3371_v42 = vld [vmem:[%s7740_s6] sm:$0xff] }
 0xa22   : > { %3377 = vperm.xlu1 %6435, %v3371_v42   ;;  %v3388_v42 = vpop.permute.xlu0 %3387 }
 0xa23   : > { %v5665_v1 = vpop.f32.mrf.mxu1 }
 0xa24   : > { %v5666_v48 = vadd.f32 %v5665_v1, %v5664_v44  ;;  %v3372_v44 = vld [vmem:[%s7740_s6 + $0x8] sm:$0xff]  ;;  %v3520_v1 = vld [vmem:[#allocation7 + $0x70] sm:$0xff] }
 0xa26   : > { %3382 = vperm.xlu1 %6435, %v3372_v44  }
 0xa3d   : > { %v5699_v63 = vpop.f32.mrf.mxu1 }
 0xa3f   : > { %v5700_v3 = vpop.f32.mrf.mxu1 }
 0xa40   : > { %v5701_v46 = vadd.f32 %v5700_v3, %v5699_v63  ;;  %v5208_v63 = vld [vmem:[%s7743_s9 + $0x8] sm:$0xff]  ;;  %v5210_v3 = vld [vmem:[%s7743_s9 + $0x18] sm:$0xff] }
 0xa41   : > { %v5702_v5 = vpop.f32.mrf.mxu1 }
 0xa43   : > { %v5703_v7 = vpop.f32.mrf.mxu1 }
 0xa44   : > { %v5704_v43 = vadd.f32 %v5703_v7, %v5702_v5 }
 0xa46   : > { %5985 = vmatprep.subr.mxu0 %v5704_v43 }
 0xa47   : > { %5986 = vmatpush3.msra.mxu0 %v5704_v43 }
 0xa48   : > { %5987 = vmatprep.subr.mxu0 %v5701_v46 }
 0xa49   : > { %5988 = vmatpush3.msra.mxu0 %v5701_v46 }
 0xa4a   : > { %5995 = vmatprep.subr.mxu0 %v5666_v48  ;;  %5990 = vmatmul.mubr.msk.f32.vlgmr.msra.gmra.mxu0 %vm2748_vm2, %v5459_v47 }
 0xa4b   : > { %5996 = vmatpush3.msra.mxu0 %v5666_v48  ;;  %5992 = vmatprep.mubr.msk.f32.mxu0 %vm2748_vm2, %v5460_v9 }
 0xa4c   : > { %5997 = vmatprep.subr.mxu0 %v5663_v11 }
 0xa4d   : > { %5998 = vmatpush3.msra.mxu0 %v5663_v11 }
 0xa4e   : > { %5993 = vmatmul.mubr.msk.f32.gmra.mxu0 %vm2748_vm2, %v5461_v13 }
 0xa4f   : > { %5999 = vmatprep.mubr.msk.f32.mxu0 %vm2748_vm2, %v2631_v14 }
 0xa52   : > { %6000 = vmatmul.mubr.msk.f32.vlgmr.msra.gmra.mxu0 %vm2748_vm2, %v2632_v2 }
 0xa53   : > { %6002 = vmatprep.mubr.msk.f32.mxu0 %vm2748_vm2, %v2633_v15 }
 0xa56   : > { %6003 = vmatmul.mubr.msk.f32.gmra.mxu0 %vm2748_vm2, %v2634_v53 }
 0xa57   : > { %6009 = vmatprep.mubr.msk.f32.mxu0 %vm2748_vm2, %v5502_v17 }
 0xa5d   : > { %v5749_v55 = vpop.f32.mrf.mxu1 }
 0xa5f   : > { %v5750_v58 = vpop.f32.mrf.mxu1 }
 0xa60   : > { %v5751_v21 = vadd.f32 %v5750_v58, %v5749_v55 }
 0xa61   : > { %v5752_v60 = vpop.f32.mrf.mxu1 }
 0xa63   : > { %v5753_v18 = vpop.f32.mrf.mxu1 }
 0xa64   : > { %v5754_v20 = vadd.f32 %v5753_v18, %v5752_v60 }
 0xa66   : > { %6005 = vmatprep.subr.mxu0 %v5754_v20 }
 0xa67   : > { %6006 = vmatpush3.msra.mxu0 %v5754_v20 }
 0xa68   : > { %6007 = vmatprep.subr.mxu0 %v5751_v21 }
 0xa69   : > { %6008 = vmatpush3.msra.mxu0 %v5751_v21 }
 0xa6a   : > { %6010 = vmatmul.mubr.msk.f32.vlgmr.msra.gmra.mxu0 %vm2748_vm2, %v5503_v24  ;;  %5761 = vmatprep.subr.mxu0 %v5541_v26 }
 0xa6b   : > { %5762 = vmatpush3.msra.mxu0 %v5525_v28  ;;  %6012 = vmatprep.mubr.msk.f32.mxu0 %vm2748_vm2, %v5504_v30 }
 0xa6c   : > { %5763 = vmatprep.subr.mxu0 %v5540_v32 }
 0xa6d   : > { %5764 = vmatpush3.msra.mxu0 %v5524_v33 }
 0xa6e   : > { %6013 = vmatmul.mubr.msk.f32.gmra.mxu0 %vm2748_vm2, %v5505_v34  ;;  %5765 = vmatprep.subr.mxu0 %v5539_v6  ;;  %v5543_v34 = vld [vmem:[%s7739_s5 + $0x68] sm:$0xff] }
 0xa6f   : > { %5766 = vmatpush3.msra.mxu0 %v5523_v35  ;;  %3254 = vmatprep.mubr.f32.mxu0 %v7163_v51  ;;  %v5535_v51 = vld [vmem:[%s7738_s4 + $0x3c8] sm:$0xff]  ;;  %v5544_v35 = vld [vmem:[%s7739_s5 + $0x70] sm:$0xff] }
 0xa70   : > { %5767 = vmatprep.subr.mxu0 %v5538_v8  ;;  %v3410_v6 = vld [vmem:[#allocation7 + $0x38] sm:$0xff]  ;;  %v3409_v8 = vld [vmem:[#allocation7 + $0x30] sm:$0xff] }
 0xa71   : > { %5768 = vmatpush3.msra.mxu0 %v5522_v10  ;;  %v5545_v10 = vld [vmem:[%s7739_s5 + $0x78] sm:$0xff] }
 0xa72   : > { %5769 = vmatprep.subr.mxu0 %v5537_v12  ;;  %v3408_v12 = vld [vmem:[#allocation7 + $0x28] sm:$0xff] }
 0xa73   : > { %5770 = vmatpush3.msra.mxu0 %v5521_v36  ;;  %v3407_v36 = vld [vmem:[#allocation7 + $0x20] sm:$0xff] }
 0xa74   : > { %5771 = vmatprep.subr.mxu0 %v5536_v38  ;;  %v3518_v38 = vld [vmem:[#allocation7 + $0x60] sm:$0xff] }
 0xa75   : > { %5772 = vmatpush3.msra.mxu0 %v5520_v40  ;;  %v3406_v40 = vld [vmem:[#allocation7 + $0x18] sm:$0xff] }
 0xa76   : > { %5773 = vmatprep.subr.mxu0 %v5535_v51  ;;  %v3517_v51 = vld [vmem:[#allocation7 + $0x58] sm:$0xff] }
 0xa77   : > { %5774 = vmatpush3.msra.mxu0 %v5519_v41  ;;  %v3405_v41 = vld [vmem:[#allocation7 + $0x10] sm:$0xff] }
 0xa78   : > { %5775 = vmatprep.subr.mxu0 %v5534_v45  ;;  %v3516_v45 = vld [vmem:[#allocation7 + $0x50] sm:$0xff] }
 0xa79   : > { %5776 = vmatpush3.msra.mxu0 %v5518_v16  ;;  %v3404_v16 = vld [vmem:[#allocation7 + $0x8] sm:$0xff] }
 0xa7a   : > { %5777 = vmatprep.subr.mxu0 %v5533_v19  ;;  %v3515_v19 = vld [vmem:[#allocation7 + $0x48] sm:$0xff] }
 0xa7b   : > { %5778 = vmatpush3.msra.mxu0 %v5517_v22  ;;  %v3403_v22 = vld [vmem:[#allocation7] sm:$0xff] }
 0xa7c   : > { %5779 = vmatprep.subr.mxu0 %v5532_v23  ;;  %v3514_v23 = vld [vmem:[#allocation7 + $0x40] sm:$0xff] }
 0xa7d   : > { %5780 = vmatpush3.msra.mxu0 %v5516_v49 }
 0xa7e   : > { %5781 = vmatprep.subr.mxu0 %v5531_v25 }
 0xa7f   : > { %5782 = vmatpush3.msra.mxu0 %v5515_v50 }
 0xa80   : > { %5783 = vmatprep.subr.mxu0 %v5530_v27 }
 0xa81   : > { %5784 = vmatpush3.msra.mxu0 %v5514_v29 }
 0xa82   : > { %5785 = vmatprep.subr.mxu0 %v5529_v31 }
 0xa83   : > { %5786 = vmatpush3.msra.mxu0 %v5513_v52 }
 0xa84   : > { %5787 = vmatprep.subr.mxu0 %v5528_v57 }
 0xa85   : > { %5788 = vmatpush3.msra.mxu0 %v5512_v59 }
 0xa86   : > { %5789 = vmatprep.subr.mxu0 %v5527_v61 }
 0xa87   : > { %5790 = vmatpush3.msra.mxu0 %v5511_v4 }
 0xa88   : > { %5791 = vmatprep.subr.mxu0 %v5526_v56 }
 0xa89   : > { %5792 = vmatpush3.msra.mxu0 %v5510_v37 }
 0xa8a   : > { %3255 = vmatmul.mubr.f32.vlgmr.msra.gmra.mxu0 %v7166_v54  ;;  %v3521_v54 = vld [vmem:[#allocation7 + $0x78] sm:$0xff] }
 0xa8b   : > { %3259 = vmatprep.mubr.f32.mxu0 %v7179_v62  ;;  %6047 = vmatprep.subr.mxu0 %v3521_v54  ;;  %v3519_v62 = vld [vmem:[#allocation7 + $0x68] sm:$0xff] }
 0xa8c   : > { %6048 = vmatpush3.msra.mxu0 %v3521_v54 }
 0xa8d   : > { %6049 = vmatprep.subr.mxu0 %v3520_v1 }
 0xa8e   : > { %3260 = vmatmul.mubr.f32.gmra.mxu0 %v7184_v0  ;;  %v3374_v0 = vld [vmem:[%s7740_s6 + $0x18] sm:$0xff] }
 0xa8f   : > { %6050 = vmatpush3.msra.mxu0 %v3520_v1  ;;  %3392 = vperm.xlu1 %6435, %v3374_v0  }
 0xa90   : > { %6051 = vmatprep.subr.mxu0 %v3519_v62 }
 0xa91   : > { %6052 = vmatpush3.msra.mxu0 %v3519_v62 }
 0xa92   : > { %6053 = vmatprep.subr.mxu0 %v3518_v38 }
 0xa93   : > { %5218 = vperm.xlu1 %6435, %v5208_v63   ;;  %6054 = vmatpush3.msra.mxu0 %v3518_v38  ;;  %v3608_v63 = vld [vmem:[#allocation8 + $0x20] sm:$0xff] }
 0xa94   : > { %6055 = vmatprep.subr.mxu0 %v3517_v51 }
 0xa95   : > { %6056 = vmatpush3.msra.mxu0 %v3517_v51 }
 0xa96   : > { %6057 = vmatprep.subr.mxu0 %v3516_v45 }
 0xa97   : > { %5228 = vperm.xlu1 %6435, %v5210_v3   ;;  %6058 = vmatpush3.msra.mxu0 %v3516_v45  ;;  %v3509_v3 = vld [vmem:[#allocation8] sm:$0xff]  ;;  %v3903_v45 = vld [vmem:[#allocation8 + $0x48] sm:$0xff] }
 0xa98   : > { %6059 = vmatprep.subr.mxu0 %v3515_v19 }
 0xa99   : > { %6060 = vmatpush3.msra.mxu0 %v3515_v19  ;;  %v3904_v19 = vld [vmem:[#allocation8 + $0x50] sm:$0xff] }
 0xa9a   : > { %6061 = vmatprep.subr.mxu0 %v3514_v23 }
 0xa9b   : > { %6062 = vmatpush3.msra.mxu0 %v3514_v23  ;;  %v3905_v23 = vld [vmem:[#allocation8 + $0x58] sm:$0xff] }
 0xa9d   : > { %v3378_v49 = vpop.permute.xlu1 %3377 }
 0xaa1   : > { %v3383_v50 = vpop.permute.xlu1 %3382 }
 0xb0a   : > { %v5991_v5 = vpop.f32.mrf.mxu0  ;;  %v3393_v56 = vpop.permute.xlu1 %3392 }
 0xb0c   : > { %v2827_v7 = vpop.f32.mrf.mxu0 }
 0xb0e   : > { %v5994_v43 = vpop.f32.mrf.mxu0 }
 0xb10   : > { %v2837_v46 = vpop.f32.mrf.mxu0 }
 0xb12   : > { %v6001_v47 = vpop.f32.mrf.mxu0 }
 0xb13   : > { %v2930_v48 = vadd.f32 %v6001_v47, %v5991_v5 }
 0xb14   : > { %v2924_v9 = vpop.f32.mrf.mxu0 }
 0xb15   : > { %v2925_v11 = vadd.f32 %v2924_v9, %v2827_v7 }
 0xb16   : > { %v6004_v13 = vpop.f32.mrf.mxu0 }
 0xb17   : > { %v2940_v14 = vadd.f32 %v6004_v13, %v5994_v43  ;;  %v3609_v13 = vld [vmem:[#allocation8 + $0x28] sm:$0xff] }
 0xb18   : > { %v2934_v2 = vpop.f32.mrf.mxu0 }
 0xb19   : > { %v2935_v15 = vadd.f32 %v2934_v2, %v2837_v46  ;;  %v3610_v2 = vld [vmem:[#allocation8 + $0x30] sm:$0xff] }
 0xb2a   : > { %v6011_v53 = vpop.f32.mrf.mxu0 }
 0xb2b   : > { %v7540_v17 = vadd.f32 %v6011_v53, %v2930_v48  ;;  %v3510_v53 = vld [vmem:[#allocation8 + $0x8] sm:$0xff] }
 0xb2c   : > { %v3134_v55 = vpop.f32.mrf.mxu0 }
 0xb2d   : > { %v7542_v58 = vadd.f32 %v3134_v55, %v2925_v11  ;;  %v3611_v55 = vld [vmem:[#allocation8 + $0x38] sm:$0xff] }
 0xb2e   : > { %v6014_v60 = vpop.f32.mrf.mxu0 }
 0xb2f   : > { %v7544_v18 = vadd.f32 %v6014_v60, %v2940_v14  ;;  %v3815_v14 = vld [vmem:[#allocation7 + $0xb8] sm:$0xff]  ;;  %v3812_v60 = vld [vmem:[#allocation7 + $0xa0] sm:$0xff] }
 0xb30   : > { %v3144_v20 = vpop.f32.mrf.mxu0 }
 0xb31   : > { %v7546_v21 = vadd.f32 %v3144_v20, %v2935_v15  ;;  %v3814_v15 = vld [vmem:[#allocation7 + $0xb0] sm:$0xff]  ;;  %v3811_v20 = vld [vmem:[#allocation7 + $0x98] sm:$0xff] }
 0xb4a   : > { %v5793_v24 = vpop.f32.mrf.mxu0 }
 0xb4c   : > { %v5794_v26 = vpop.f32.mrf.mxu0 }
 0xb4d   : > { %v5795_v33 = vadd.f32 %v5794_v26, %v5793_v24  ;;  %v3809_v24 = vld [vmem:[#allocation7 + $0x88] sm:$0xff]  ;;  %v3808_v26 = vld [vmem:[#allocation7 + $0x80] sm:$0xff] }
 0xb4e   : > { %v5796_v28 = vpop.f32.mrf.mxu0 }
 0xb50   : > { %v5797_v30 = vpop.f32.mrf.mxu0 }
 0xb51   : > { %v5798_v32 = vadd.f32 %v5797_v30, %v5796_v28  ;;  %v3902_v28 = vld [vmem:[#allocation8 + $0x40] sm:$0xff] }
 0xb53   : > { %6015 = vmatprep.subr.mxu1 %v5798_v32 }
 0xb54   : > { %6016 = vmatpush3.msra.mxu1 %v5798_v32 }
 0xb55   : > { %6017 = vmatprep.subr.mxu1 %v5795_v33 }
 0xb56   : > { %6018 = vmatpush3.msra.mxu1 %v5795_v33 }
 0xb57   : > { %6020 = vmatmul.mubr.msk.f32.vlgmr.msra.gmra.mxu1 %vm2748_vm2, %v5543_v34  ;;  %6025 = vmatprep.subr.mxu1 %v3410_v6 }
 0xb58   : > { %6022 = vmatprep.mubr.msk.f32.mxu1 %vm2748_vm2, %v5544_v35  ;;  %6026 = vmatpush3.msra.mxu1 %v3410_v6 }
 0xb59   : > { %6027 = vmatprep.subr.mxu1 %v3409_v8 }
 0xb5a   : > { %6028 = vmatpush3.msra.mxu1 %v3409_v8 }
 0xb5b   : > { %6023 = vmatmul.mubr.msk.f32.gmra.mxu1 %vm2748_vm2, %v5545_v10  ;;  %6029 = vmatprep.subr.mxu1 %v3408_v12 }
 0xb5c   : > { %6030 = vmatpush3.msra.mxu1 %v3408_v12 }
 0xb5d   : > { %6031 = vmatprep.subr.mxu1 %v3407_v36 }
 0xb5e   : > { %6032 = vmatpush3.msra.mxu1 %v3407_v36 }
 0xb5f   : > { %6033 = vmatprep.subr.mxu1 %v3406_v40 }
 0xb60   : > { %6034 = vmatpush3.msra.mxu1 %v3406_v40 }
 0xb61   : > { %6035 = vmatprep.subr.mxu1 %v3405_v41 }
 0xb62   : > { %6036 = vmatpush3.msra.mxu1 %v3405_v41 }
 0xb63   : > { %6037 = vmatprep.subr.mxu1 %v3404_v16 }
 0xb64   : > { %6038 = vmatpush3.msra.mxu1 %v3404_v16  ;;  %v4015_v16 = vld [vmem:[#allocation7 + $0xf8] sm:$0xff] }
 0xb65   : > { %6039 = vmatprep.subr.mxu1 %v3403_v22 }
 0xb66   : > { %6040 = vmatpush3.msra.mxu1 %v3403_v22  ;;  %v4014_v22 = vld [vmem:[#allocation7 + $0xf0] sm:$0xff] }
 0xc17   : > { %v6021_v25 = vpop.f32.mrf.mxu1 }
 0xc18   : > { %v3368_v27 = vadd.f32 %v6021_v25, %v7540_v17  ;;  %v3511_v17 = vld [vmem:[#allocation8 + $0x10] sm:$0xff]  ;;  %v4012_v25 = vld [vmem:[#allocation7 + $0xe0] sm:$0xff] }
 0xc19   : > { %v3348_v29 = vpop.f32.mrf.mxu1 }
 0xc1a   : > { %v3367_v31 = vadd.f32 %v3348_v29, %v7542_v58  ;;  %v3396_v52 = vadd.f32 %v3383_v50, %v3368_v27  ;;  %v3813_v58 = vld [vmem:[#allocation7 + $0xa8] sm:$0xff]  ;;  %v4011_v50 = vld [vmem:[#allocation7 + $0xd8] sm:$0xff]  ;;  %v4010_v27 = vld [vmem:[#allocation7 + $0xd0] sm:$0xff] }
 0xc1b   : > { %v6024_v57 = vpop.f32.mrf.mxu1  ;;  %v4009_v29 = vld [vmem:[#allocation7 + $0xc8] sm:$0xff] }
 0xc1c   : > { %v3395_v59 = vadd.f32 %v3378_v49, %v3367_v31  ;;  %v3370_v61 = vadd.f32 %v6024_v57, %v7544_v18  ;;  %v7566_v44 = vmax.f32 %v3396_v52, 0.0  ;;  %v3512_v18 = vld [vmem:[#allocation8 + $0x18] sm:$0xff]  ;;  %v4013_v49 = vld [vmem:[#allocation7 + $0xe8] sm:$0xff]  ;;  %v4008_v31 = vld [vmem:[#allocation7 + $0xc0] sm:$0xff] }
 0xc1d   : > { %v3358_v4 = vpop.f32.mrf.mxu1  ;;  %v4102_v52 = vld [vmem:[#allocation8 + $0x60] sm:$0xff] }
 0xc1e   : > { %v7563_v37 = vmax.f32 %v3395_v59, 0.0  ;;  %v3369_v39 = vadd.f32 %v3358_v4, %v7546_v21  ;;  %v3398_v54 = vadd.f32 %v3393_v56, %v3370_v61  ;;  %v3810_v21 = vld [vmem:[#allocation7 + $0x90] sm:$0xff] }
 0xc20   : > { %v3397_v1 = vadd.f32 %v3388_v42, %v3369_v39  ;;  %6041 = vmatprep.mubr.msk.f32.mxu1 %vm3411_vm3, %v7563_v37  ;;  %6063 = vmatprep.mubr.msk.f32.mxu0 %vm3411_vm3, %v7563_v37  ;;  %v7578_v0 = vmax.f32 %v3398_v54, 0.0 }
 0xc21   : > { %6042 = vmatmul.mubr.msk.f32.vlgmr.msra.gmra.mxu1 %vm3411_vm3, %v7566_v44  ;;  %6064 = vmatmul.mubr.msk.f32.vlgmr.msra.gmra.mxu0 %vm3411_vm3, %v7566_v44 }
 0xc22   : > { %v7576_v62 = vmax.f32 %v3397_v1, 0.0 }
 0xc24   : > { %6044 = vmatprep.mubr.msk.f32.mxu1 %vm3411_vm3, %v7576_v62  ;;  %6066 = vmatprep.mubr.msk.f32.mxu0 %vm3411_vm3, %v7576_v62 }
 0xc25   : > { %6045 = vmatmul.mubr.msk.f32.gmra.mxu1 %vm3411_vm3, %v7578_v0  ;;  %6067 = vmatmul.mubr.msk.f32.gmra.mxu0 %vm3411_vm3, %v7578_v0 }
 0xc26   : > { %6077 = vmatprep.mubr.msk.f32.mxu1 %vm3612_vm4, %v3608_v63  ;;  %6091 = vmatprep.mubr.msk.f32.mxu0 %vm3612_vm4, %v3509_v3 }
 0xce1   : > { %v6043_v5 = vpop.f32.mrf.mxu1  ;;  %v6065_v7 = vpop.f32.mrf.mxu0 }
 0xce3   : > { %v3490_v43 = vpop.f32.mrf.mxu1  ;;  %v3588_v46 = vpop.f32.mrf.mxu0 }
 0xce5   : > { %v6046_v47 = vpop.f32.mrf.mxu1  ;;  %v6068_v48 = vpop.f32.mrf.mxu0 }
 0xce6   : > { %6069 = vmatprep.subr.mxu1 %v6068_v48  ;;  %6083 = vmatprep.subr.mxu0 %v6046_v47 }
 0xce7   : > { %v3500_v9 = vpop.f32.mrf.mxu1  ;;  %v3598_v11 = vpop.f32.mrf.mxu0  ;;  %6070 = vmatpush3.msra.mxu1 %v6068_v48  ;;  %6084 = vmatpush3.msra.mxu0 %v6046_v47  ;;  %v4215_v47 = vld [vmem:[#allocation7 + $0x138] sm:$0xff]  ;;  %v4104_v48 = vld [vmem:[#allocation8 + $0x70] sm:$0xff] }
 0xce8   : > { %6071 = vmatprep.subr.mxu1 %v3598_v11  ;;  %6085 = vmatprep.subr.mxu0 %v3500_v9 }
 0xce9   : > { %6072 = vmatpush3.msra.mxu1 %v3598_v11  ;;  %6086 = vmatpush3.msra.mxu0 %v3500_v9  ;;  %v4214_v9 = vld [vmem:[#allocation7 + $0x130] sm:$0xff]  ;;  %v4105_v11 = vld [vmem:[#allocation8 + $0x78] sm:$0xff] }
 0xcea   : > { %6073 = vmatprep.subr.mxu1 %v6065_v7  ;;  %6087 = vmatprep.subr.mxu0 %v6043_v5 }
 0xceb   : > { %6074 = vmatpush3.msra.mxu1 %v6065_v7  ;;  %6088 = vmatpush3.msra.mxu0 %v6043_v5 }
 0xcec   : > { %6075 = vmatprep.subr.mxu1 %v3588_v46  ;;  %6089 = vmatprep.subr.mxu0 %v3490_v43 }
 0xced   : > { %6076 = vmatpush3.msra.mxu1 %v3588_v46  ;;  %6090 = vmatpush3.msra.mxu0 %v3490_v43  ;;  %v4103_v46 = vld [vmem:[#allocation8 + $0x68] sm:$0xff] }
 0xcee   : > { %6078 = vmatmul.mubr.msk.f32.vlgmr.msra.gmra.mxu1 %vm3612_vm4, %v3609_v13  ;;  %6097 = vmatprep.subr.mxu1 %v3815_v14  ;;  %v4213_v13 = vld [vmem:[#allocation7 + $0x128] sm:$0xff] }
 0xcef   : > { %6098 = vmatpush3.msra.mxu1 %v3815_v14  ;;  %6080 = vmatprep.mubr.msk.f32.mxu1 %vm3612_vm4, %v3610_v2  ;;  %v4212_v14 = vld [vmem:[#allocation7 + $0x120] sm:$0xff]  ;;  %v4211_v2 = vld [vmem:[#allocation7 + $0x118] sm:$0xff] }
 0xcf0   : > { %6099 = vmatprep.subr.mxu1 %v3814_v15  ;;  %6092 = vmatmul.mubr.msk.f32.vlgmr.msra.gmra.mxu0 %vm3612_vm4, %v3510_v53  ;;  %v4209_v53 = vld [vmem:[#allocation7 + $0x108] sm:$0xff] }
 0xcf1   : > { %6100 = vmatpush3.msra.mxu1 %v3814_v15  ;;  %6094 = vmatprep.mubr.msk.f32.mxu0 %vm3612_vm4, %v3511_v17  ;;  %v4210_v15 = vld [vmem:[#allocation7 + $0x110] sm:$0xff]  ;;  %v4208_v17 = vld [vmem:[#allocation7 + $0x100] sm:$0xff] }
 0xcf2   : > { %6081 = vmatmul.mubr.msk.f32.gmra.mxu1 %vm3612_vm4, %v3611_v55  ;;  %6101 = vmatprep.subr.mxu1 %v3813_v58  ;;  %v4302_v55 = vld [vmem:[#allocation8 + $0x80] sm:$0xff] }
 0xcf3   : > { %6102 = vmatpush3.msra.mxu1 %v3813_v58  ;;  %6113 = vmatprep.mubr.msk.f32.mxu1 %vm3411_vm3, %v7563_v37 }
 0xcf4   : > { %6103 = vmatprep.subr.mxu1 %v3812_v60  ;;  %6095 = vmatmul.mubr.msk.f32.gmra.mxu0 %vm3612_vm4, %v3512_v18 }
 0xcf5   : > { %6104 = vmatpush3.msra.mxu1 %v3812_v60  ;;  %6127 = vmatprep.mubr.msk.f32.mxu0 %vm3612_vm4, %v3902_v28 }
 0xcf6   : > { %6105 = vmatprep.subr.mxu1 %v3811_v20 }
 0xcf7   : > { %6106 = vmatpush3.msra.mxu1 %v3811_v20 }
 0xcf8   : > { %6107 = vmatprep.subr.mxu1 %v3810_v21 }
 0xcf9   : > { %6108 = vmatpush3.msra.mxu1 %v3810_v21 }
 0xcfa   : > { %6109 = vmatprep.subr.mxu1 %v3809_v24 }
 0xcfb   : > { %6110 = vmatpush3.msra.mxu1 %v3809_v24 }
 0xcfc   : > { %6111 = vmatprep.subr.mxu1 %v3808_v26 }
 0xcfd   : > { %6112 = vmatpush3.msra.mxu1 %v3808_v26 }
 0xcfe   : > { %6114 = vmatmul.mubr.msk.f32.vlgmr.msra.gmra.mxu1 %vm3411_vm3, %v7566_v44 }
 0xcff   : > { %6116 = vmatprep.mubr.msk.f32.mxu1 %vm3411_vm3, %v7576_v62 }
 0xd02   : > { %6117 = vmatmul.mubr.msk.f32.gmra.mxu1 %vm3411_vm3, %v7578_v0 }
 0xd03   : > { %6163 = vmatprep.mubr.msk.f32.mxu1 %vm3612_vm4, %v4102_v52 }
 0xdae   : > { %v6079_v30 = vpop.f32.mrf.mxu1 }
 0xdb0   : > { %v6093_v32 = vpop.f32.mrf.mxu0  ;;  %v3691_v33 = vpop.f32.mrf.mxu1 }
 0xdb1   : > { %v3794_v34 = vadd.f32 %v6093_v32, %v6079_v30 }
 0xdb2   : > { %v3788_v6 = vpop.f32.mrf.mxu0  ;;  %v6082_v8 = vpop.f32.mrf.mxu1 }
 0xdb3   : > { %v3789_v35 = vadd.f32 %v3788_v6, %v3691_v33  ;;  %v4303_v6 = vld [vmem:[#allocation8 + $0x88] sm:$0xff] }
 0xdb4   : > { %v6096_v10 = vpop.f32.mrf.mxu0  ;;  %v3701_v36 = vpop.f32.mrf.mxu1 }
 0xdb5   : > { %v3804_v12 = vadd.f32 %v6096_v10, %v6082_v8  ;;  %v4304_v8 = vld [vmem:[#allocation8 + $0x90] sm:$0xff] }
 0xdb6   : > { %v3798_v57 = vpop.f32.mrf.mxu0  ;;  %v4414_v10 = vld [vmem:[#allocation7 + $0x170] sm:$0xff] }
 0xdb7   : > { %v3799_v42 = vadd.f32 %v3798_v57, %v3701_v36  ;;  %v4413_v36 = vld [vmem:[#allocation7 + $0x168] sm:$0xff] }
 0xdbe   : > { %v6115_v38 = vpop.f32.mrf.mxu1 }
 0xdc0   : > { %v3882_v40 = vpop.f32.mrf.mxu1 }
 0xdc2   : > { %v6118_v51 = vpop.f32.mrf.mxu1 }
 0xdc3   : > { %6119 = vmatprep.subr.mxu0 %v6118_v51 }
 0xdc4   : > { %v3892_v41 = vpop.f32.mrf.mxu1  ;;  %6120 = vmatpush3.msra.mxu0 %v6118_v51  ;;  %v4410_v51 = vld [vmem:[#allocation7 + $0x150] sm:$0xff] }
 0xdc5   : > { %6121 = vmatprep.subr.mxu0 %v3892_v41 }
 0xdc6   : > { %6122 = vmatpush3.msra.mxu0 %v3892_v41  ;;  %v4409_v41 = vld [vmem:[#allocation7 + $0x148] sm:$0xff] }
 0xdc7   : > { %6123 = vmatprep.subr.mxu0 %v6115_v38 }
 0xdc8   : > { %6124 = vmatpush3.msra.mxu0 %v6115_v38  ;;  %v4412_v38 = vld [vmem:[#allocation7 + $0x160] sm:$0xff] }
 0xdc9   : > { %6125 = vmatprep.subr.mxu0 %v3882_v40 }
 0xdca   : > { %6126 = vmatpush3.msra.mxu0 %v3882_v40  ;;  %v4411_v40 = vld [vmem:[#allocation7 + $0x158] sm:$0xff] }
 0xdcb   : > { %6128 = vmatmul.mubr.msk.f32.vlgmr.msra.gmra.mxu0 %vm3612_vm4, %v3903_v45  ;;  %6133 = vmatprep.subr.mxu0 %v4015_v16  ;;  %v4408_v45 = vld [vmem:[#allocation7 + $0x140] sm:$0xff] }
 0xdcc   : > { %6134 = vmatpush3.msra.mxu0 %v4015_v16  ;;  %6130 = vmatprep.mubr.msk.f32.mxu0 %vm3612_vm4, %v3904_v19  ;;  %v4502_v16 = vld [vmem:[#allocation8 + $0xa0] sm:$0xff] }
 0xdcd   : > { %6135 = vmatprep.subr.mxu0 %v4014_v22 }
 0xdce   : > { %6136 = vmatpush3.msra.mxu0 %v4014_v22 }
 0xdcf   : > { %6131 = vmatmul.mubr.msk.f32.gmra.mxu0 %vm3612_vm4, %v3905_v23  ;;  %6137 = vmatprep.subr.mxu0 %v4013_v49 }
 0xdd0   : > { %6138 = vmatpush3.msra.mxu0 %v4013_v49  ;;  %6149 = vmatprep.mubr.msk.f32.mxu0 %vm3411_vm3, %v7563_v37 }
 0xdd1   : > { %6139 = vmatprep.subr.mxu0 %v4012_v25 }
 0xdd2   : > { %6140 = vmatpush3.msra.mxu0 %v4012_v25 }
 0xdd3   : > { %6141 = vmatprep.subr.mxu0 %v4011_v50 }
 0xdd4   : > { %6142 = vmatpush3.msra.mxu0 %v4011_v50 }
 0xdd5   : > { %6143 = vmatprep.subr.mxu0 %v4010_v27 }
 0xdd6   : > { %6144 = vmatpush3.msra.mxu0 %v4010_v27 }
 0xdd7   : > { %6145 = vmatprep.subr.mxu0 %v4009_v29 }
 0xdd8   : > { %6146 = vmatpush3.msra.mxu0 %v4009_v29 }
 0xdd9   : > { %6147 = vmatprep.subr.mxu0 %v4008_v31 }
 0xdda   : > { %6148 = vmatpush3.msra.mxu0 %v4008_v31 }
 0xddb   : > { %6150 = vmatmul.mubr.msk.f32.vlgmr.msra.gmra.mxu0 %vm3411_vm3, %v7566_v44 }
 0xddc   : > { %6152 = vmatprep.mubr.msk.f32.mxu0 %vm3411_vm3, %v7576_v62 }
 0xddf   : > { %6153 = vmatmul.mubr.msk.f32.gmra.mxu0 %vm3411_vm3, %v7578_v0 }
 0xde0   : > { %6199 = vmatprep.mubr.msk.f32.mxu0 %vm3612_vm4, %v4302_v55 }
 0xe8b   : > { %v6129_v59 = vpop.f32.mrf.mxu0 }
 0xe8c   : > { %v4004_v61 = vadd.f32 %v6129_v59, %v3794_v34 }
 0xe8d   : > { %v3984_v4 = vpop.f32.mrf.mxu0 }
 0xe8e   : > { %v4003_v56 = vadd.f32 %v3984_v4, %v3789_v35  ;;  %v4415_v35 = vld [vmem:[#allocation7 + $0x178] sm:$0xff] }
 0xe8f   : > { %v6132_v39 = vpop.f32.mrf.mxu0  ;;  %v4615_v4 = vld [vmem:[#allocation7 + $0x1b8] sm:$0xff] }
 0xe90   : > { %v4006_v54 = vadd.f32 %v6132_v39, %v3804_v12  ;;  %v4305_v12 = vld [vmem:[#allocation8 + $0x98] sm:$0xff]  ;;  %v4614_v39 = vld [vmem:[#allocation7 + $0x1b0] sm:$0xff] }
 0xe91   : > { %v3994_v1 = vpop.f32.mrf.mxu0 }
 0xe92   : > { %v4005_v63 = vadd.f32 %v3994_v1, %v3799_v42  ;;  %v4505_v42 = vld [vmem:[#allocation8 + $0xb8] sm:$0xff]  ;;  %v4612_v1 = vld [vmem:[#allocation7 + $0x1a0] sm:$0xff] }
 0xe9b   : > { %v6151_v3 = vpop.f32.mrf.mxu0 }
 0xe9d   : > { %v4082_v5 = vpop.f32.mrf.mxu0 }
 0xe9f   : > { %v6154_v7 = vpop.f32.mrf.mxu0 }
 0xea0   : > { %6155 = vmatprep.subr.mxu1 %v6154_v7 }
 0xea1   : > { %v4092_v43 = vpop.f32.mrf.mxu0  ;;  %6156 = vmatpush3.msra.mxu1 %v6154_v7  ;;  %v4608_v7 = vld [vmem:[#allocation7 + $0x180] sm:$0xff] }
 0xea2   : > { %6157 = vmatprep.subr.mxu1 %v4092_v43 }
 0xea3   : > { %6158 = vmatpush3.msra.mxu1 %v4092_v43  ;;  %v4702_v43 = vld [vmem:[#allocation8 + $0xc0] sm:$0xff] }
 0xea4   : > { %6159 = vmatprep.subr.mxu1 %v6151_v3 }
 0xea5   : > { %6160 = vmatpush3.msra.mxu1 %v6151_v3  ;;  %v4610_v3 = vld [vmem:[#allocation7 + $0x190] sm:$0xff] }
 0xea6   : > { %6161 = vmatprep.subr.mxu1 %v4082_v5 }
 0xea7   : > { %6162 = vmatpush3.msra.mxu1 %v4082_v5  ;;  %v4609_v5 = vld [vmem:[#allocation7 + $0x188] sm:$0xff] }
 0xea8   : > { %6164 = vmatmul.mubr.msk.f32.vlgmr.msra.gmra.mxu1 %vm3612_vm4, %v4103_v46  ;;  %6169 = vmatprep.subr.mxu1 %v4215_v47 }
 0xea9   : > { %6170 = vmatpush3.msra.mxu1 %v4215_v47  ;;  %6166 = vmatprep.mubr.msk.f32.mxu1 %vm3612_vm4, %v4104_v48 }
 0xeaa   : > { %6171 = vmatprep.subr.mxu1 %v4214_v9 }
 0xeab   : > { %6172 = vmatpush3.msra.mxu1 %v4214_v9 }
 0xeac   : > { %6167 = vmatmul.mubr.msk.f32.gmra.mxu1 %vm3612_vm4, %v4105_v11  ;;  %6173 = vmatprep.subr.mxu1 %v4213_v13 }
 0xead   : > { %6174 = vmatpush3.msra.mxu1 %v4213_v13  ;;  %6185 = vmatprep.mubr.msk.f32.mxu1 %vm3411_vm3, %v7563_v37 }
 0xeae   : > { %6175 = vmatprep.subr.mxu1 %v4212_v14 }
 0xeaf   : > { %6176 = vmatpush3.msra.mxu1 %v4212_v14 }
 0xeb0   : > { %6177 = vmatprep.subr.mxu1 %v4211_v2 }
 0xeb1   : > { %6178 = vmatpush3.msra.mxu1 %v4211_v2 }
 0xeb2   : > { %6179 = vmatprep.subr.mxu1 %v4210_v15 }
 0xeb3   : > { %6180 = vmatpush3.msra.mxu1 %v4210_v15 }
 0xeb4   : > { %6181 = vmatprep.subr.mxu1 %v4209_v53 }
 0xeb5   : > { %6182 = vmatpush3.msra.mxu1 %v4209_v53 }
 0xeb6   : > { %6183 = vmatprep.subr.mxu1 %v4208_v17 }
 0xeb7   : > { %6184 = vmatpush3.msra.mxu1 %v4208_v17 }
 0xeb8   : > { %6186 = vmatmul.mubr.msk.f32.vlgmr.msra.gmra.mxu1 %vm3411_vm3, %v7566_v44 }
 0xeb9   : > { %6188 = vmatprep.mubr.msk.f32.mxu1 %vm3411_vm3, %v7576_v62 }
 0xebc   : > { %6189 = vmatmul.mubr.msk.f32.gmra.mxu1 %vm3411_vm3, %v7578_v0 }
 0xebd   : > { %6235 = vmatprep.mubr.msk.f32.mxu1 %vm3612_vm4, %v4502_v16 }
 0xf68   : > { %v6165_v58 = vpop.f32.mrf.mxu1 }
 0xf69   : > { %v4204_v60 = vadd.f32 %v6165_v58, %v4004_v61  ;;  %v4503_v61 = vld [vmem:[#allocation8 + $0xa8] sm:$0xff] }
 0xf6a   : > { %v4184_v18 = vpop.f32.mrf.mxu1  ;;  %v4703_v58 = vld [vmem:[#allocation8 + $0xc8] sm:$0xff] }
 0xf6b   : > { %v4203_v20 = vadd.f32 %v4184_v18, %v4003_v56  ;;  %v4504_v56 = vld [vmem:[#allocation8 + $0xb0] sm:$0xff] }
 0xf6c   : > { %v6168_v21 = vpop.f32.mrf.mxu1  ;;  %v4704_v18 = vld [vmem:[#allocation8 + $0xd0] sm:$0xff] }
 0xf6d   : > { %v4206_v24 = vadd.f32 %v6168_v21, %v4006_v54  ;;  %v4613_v54 = vld [vmem:[#allocation7 + $0x1a8] sm:$0xff]  ;;  %v4705_v21 = vld [vmem:[#allocation8 + $0xd8] sm:$0xff] }
 0xf6e   : > { %v4194_v26 = vpop.f32.mrf.mxu1 }
 0xf6f   : > { %v4205_v28 = vadd.f32 %v4194_v26, %v4005_v63  ;;  %v4611_v63 = vld [vmem:[#allocation7 + $0x198] sm:$0xff]  ;;  %v4812_v26 = vld [vmem:[#allocation7 + $0x1e0] sm:$0xff] }
 0xf78   : > { %v6187_v30 = vpop.f32.mrf.mxu1 }
 0xf7a   : > { %v4282_v32 = vpop.f32.mrf.mxu1 }
 0xf7c   : > { %v6190_v33 = vpop.f32.mrf.mxu1 }
 0xf7d   : > { %6191 = vmatprep.subr.mxu0 %v6190_v33 }
 0xf7e   : > { %v4292_v34 = vpop.f32.mrf.mxu1  ;;  %6192 = vmatpush3.msra.mxu0 %v6190_v33  ;;  %v4808_v33 = vld [vmem:[#allocation7 + $0x1c0] sm:$0xff] }
 0xf7f   : > { %6193 = vmatprep.subr.mxu0 %v4292_v34 }
 0xf80   : > { %6194 = vmatpush3.msra.mxu0 %v4292_v34  ;;  %v4902_v34 = vld [vmem:[#allocation8 + $0xe0] sm:$0xff] }
 0xf81   : > { %6195 = vmatprep.subr.mxu0 %v6187_v30 }
 0xf82   : > { %6196 = vmatpush3.msra.mxu0 %v6187_v30  ;;  %v4810_v30 = vld [vmem:[#allocation7 + $0x1d0] sm:$0xff] }
 0xf83   : > { %6197 = vmatprep.subr.mxu0 %v4282_v32 }
 0xf84   : > { %6198 = vmatpush3.msra.mxu0 %v4282_v32  ;;  %v4809_v32 = vld [vmem:[#allocation7 + $0x1c8] sm:$0xff] }
 0xf85   : > { %6200 = vmatmul.mubr.msk.f32.vlgmr.msra.gmra.mxu0 %vm3612_vm4, %v4303_v6  ;;  %6205 = vmatprep.subr.mxu0 %v4415_v35 }
 0xf86   : > { %6206 = vmatpush3.msra.mxu0 %v4415_v35  ;;  %6202 = vmatprep.mubr.msk.f32.mxu0 %vm3612_vm4, %v4304_v8 }
 0xf87   : > { %6207 = vmatprep.subr.mxu0 %v4414_v10 }
 0xf88   : > { %6208 = vmatpush3.msra.mxu0 %v4414_v10 }
 0xf89   : > { %6203 = vmatmul.mubr.msk.f32.gmra.mxu0 %vm3612_vm4, %v4305_v12  ;;  %6209 = vmatprep.subr.mxu0 %v4413_v36 }
 0xf8a   : > { %6210 = vmatpush3.msra.mxu0 %v4413_v36  ;;  %6221 = vmatprep.mubr.msk.f32.mxu0 %vm3411_vm3, %v7563_v37 }
 0xf8b   : > { %6211 = vmatprep.subr.mxu0 %v4412_v38 }
 0xf8c   : > { %6212 = vmatpush3.msra.mxu0 %v4412_v38 }
 0xf8d   : > { %6213 = vmatprep.subr.mxu0 %v4411_v40 }
 0xf8e   : > { %6214 = vmatpush3.msra.mxu0 %v4411_v40 }
 0xf8f   : > { %6215 = vmatprep.subr.mxu0 %v4410_v51 }
 0xf90   : > { %6216 = vmatpush3.msra.mxu0 %v4410_v51 }
 0xf91   : > { %6217 = vmatprep.subr.mxu0 %v4409_v41 }
 0xf92   : > { %6218 = vmatpush3.msra.mxu0 %v4409_v41 }
 0xf93   : > { %6219 = vmatprep.subr.mxu0 %v4408_v45 }
 0xf94   : > { %6220 = vmatpush3.msra.mxu0 %v4408_v45 }
 0xf95   : > { %6222 = vmatmul.mubr.msk.f32.vlgmr.msra.gmra.mxu0 %vm3411_vm3, %v7566_v44 }
 0xf96   : > { %6224 = vmatprep.mubr.msk.f32.mxu0 %vm3411_vm3, %v7576_v62 }
 0xf99   : > { %6225 = vmatmul.mubr.msk.f32.gmra.mxu0 %vm3411_vm3, %v7578_v0 }
 0xf9a   : > { %6271 = vmatprep.mubr.msk.f32.mxu0 %vm3612_vm4, %v4702_v43  ;;  %v5219_v43 = vpop.permute.xlu1 %5218 }
0x1045   : > { %v6201_v19 = vpop.f32.mrf.mxu0 }
0x1046   : > { %v4404_v22 = vadd.f32 %v6201_v19, %v4204_v60  ;;  %v4815_v60 = vld [vmem:[#allocation7 + $0x1f8] sm:$0xff]  ;;  %v4903_v19 = vld [vmem:[#allocation8 + $0xe8] sm:$0xff] }
0x1047   : > { %v4384_v23 = vpop.f32.mrf.mxu0 }
0x1048   : > { %v4403_v49 = vadd.f32 %v4384_v23, %v4203_v20  ;;  %v4814_v20 = vld [vmem:[#allocation7 + $0x1f0] sm:$0xff] }
0x1049   : > { %v6204_v25 = vpop.f32.mrf.mxu0  ;;  %v4904_v23 = vld [vmem:[#allocation8 + $0xf0] sm:$0xff] }
0x104a   : > { %v4406_v50 = vadd.f32 %v6204_v25, %v4206_v24  ;;  %v4813_v24 = vld [vmem:[#allocation7 + $0x1e8] sm:$0xff]  ;;  %v4905_v25 = vld [vmem:[#allocation8 + $0xf8] sm:$0xff] }
0x104b   : > { %v4394_v27 = vpop.f32.mrf.mxu0 }
0x104c   : > { %v4405_v29 = vadd.f32 %v4394_v27, %v4205_v28  ;;  %v4811_v28 = vld [vmem:[#allocation7 + $0x1d8] sm:$0xff]  ;;  %v5012_v27 = vld [vmem:[#allocation7 + $0x220] sm:$0xff] }
0x1055   : > { %v6223_v31 = vpop.f32.mrf.mxu0 }
0x1057   : > { %v4482_v52 = vpop.f32.mrf.mxu0 }
0x1059   : > { %v6226_v57 = vpop.f32.mrf.mxu0 }
0x105a   : > { %6227 = vmatprep.subr.mxu1 %v6226_v57 }
0x105b   : > { %v4492_v59 = vpop.f32.mrf.mxu0  ;;  %6228 = vmatpush3.msra.mxu1 %v6226_v57  ;;  %v5008_v57 = vld [vmem:[#allocation7 + $0x200] sm:$0xff] }
0x105c   : > { %6229 = vmatprep.subr.mxu1 %v4492_v59 }
0x105d   : > { %6230 = vmatpush3.msra.mxu1 %v4492_v59 }
0x105e   : > { %6231 = vmatprep.subr.mxu1 %v6223_v31 }
0x105f   : > { %6232 = vmatpush3.msra.mxu1 %v6223_v31  ;;  %v5010_v31 = vld [vmem:[#allocation7 + $0x210] sm:$0xff] }
0x1060   : > { %6233 = vmatprep.subr.mxu1 %v4482_v52 }
0x1061   : > { %6234 = vmatpush3.msra.mxu1 %v4482_v52  ;;  %v5009_v52 = vld [vmem:[#allocation7 + $0x208] sm:$0xff] }
0x1062   : > { %6236 = vmatmul.mubr.msk.f32.vlgmr.msra.gmra.mxu1 %vm3612_vm4, %v4503_v61  ;;  %6241 = vmatprep.subr.mxu1 %v4615_v4 }
0x1063   : > { %6242 = vmatpush3.msra.mxu1 %v4615_v4  ;;  %6238 = vmatprep.mubr.msk.f32.mxu1 %vm3612_vm4, %v4504_v56 }
0x1064   : > { %6243 = vmatprep.subr.mxu1 %v4614_v39 }
0x1065   : > { %6244 = vmatpush3.msra.mxu1 %v4614_v39 }
0x1066   : > { %6239 = vmatmul.mubr.msk.f32.gmra.mxu1 %vm3612_vm4, %v4505_v42  ;;  %6245 = vmatprep.subr.mxu1 %v4613_v54 }
0x1067   : > { %6246 = vmatpush3.msra.mxu1 %v4613_v54  ;;  %6257 = vmatprep.mubr.msk.f32.mxu1 %vm3411_vm3, %v7563_v37 }
0x1068   : > { %6247 = vmatprep.subr.mxu1 %v4612_v1 }
0x1069   : > { %6248 = vmatpush3.msra.mxu1 %v4612_v1 }
0x106a   : > { %6249 = vmatprep.subr.mxu1 %v4611_v63 }
0x106b   : > { %6250 = vmatpush3.msra.mxu1 %v4611_v63 }
0x106c   : > { %6251 = vmatprep.subr.mxu1 %v4610_v3 }
0x106d   : > { %6252 = vmatpush3.msra.mxu1 %v4610_v3 }
0x106e   : > { %6253 = vmatprep.subr.mxu1 %v4609_v5 }
0x106f   : > { %6254 = vmatpush3.msra.mxu1 %v4609_v5 }
0x1070   : > { %6255 = vmatprep.subr.mxu1 %v4608_v7 }
0x1071   : > { %6256 = vmatpush3.msra.mxu1 %v4608_v7  ;;  %v5105_v7 = vld [vmem:[#allocation8 + $0x118] sm:$0xff] }
0x1072   : > { %6258 = vmatmul.mubr.msk.f32.vlgmr.msra.gmra.mxu1 %vm3411_vm3, %v7566_v44 }
0x1073   : > { %6260 = vmatprep.mubr.msk.f32.mxu1 %vm3411_vm3, %v7576_v62 }
0x1076   : > { %6261 = vmatmul.mubr.msk.f32.gmra.mxu1 %vm3411_vm3, %v7578_v0 }
0x1077   : > { %6307 = vmatprep.mubr.msk.f32.mxu1 %vm3612_vm4, %v4902_v34 }
0x1122   : > { %v6237_v46 = vpop.f32.mrf.mxu1 }
0x1123   : > { %v4604_v47 = vadd.f32 %v6237_v46, %v4404_v22  ;;  %v5015_v22 = vld [vmem:[#allocation7 + $0x238] sm:$0xff] }
0x1124   : > { %v4584_v48 = vpop.f32.mrf.mxu1 }
0x1125   : > { %v4603_v9 = vadd.f32 %v4584_v48, %v4403_v49  ;;  %v5014_v49 = vld [vmem:[#allocation7 + $0x230] sm:$0xff]  ;;  %v5214_v48 = vpop.permute.xlu0 %5213 }
0x1126   : > { %v6240_v11 = vpop.f32.mrf.mxu1 }
0x1127   : > { %v4606_v13 = vadd.f32 %v6240_v11, %v4406_v50  ;;  %v5013_v50 = vld [vmem:[#allocation7 + $0x228] sm:$0xff] }
0x1128   : > { %v4594_v14 = vpop.f32.mrf.mxu1 }
0x1129   : > { %v4605_v2 = vadd.f32 %v4594_v14, %v4405_v29  ;;  %v5011_v29 = vld [vmem:[#allocation7 + $0x218] sm:$0xff] }
0x1132   : > { %v6259_v15 = vpop.f32.mrf.mxu1 }
0x1134   : > { %v4682_v53 = vpop.f32.mrf.mxu1 }
0x1136   : > { %v6262_v17 = vpop.f32.mrf.mxu1 }
0x1137   : > { %6263 = vmatprep.subr.mxu0 %v6262_v17 }
0x1138   : > { %v4692_v55 = vpop.f32.mrf.mxu1  ;;  %6264 = vmatpush3.msra.mxu0 %v6262_v17  ;;  %v5229_v17 = vpop.permute.xlu1 %5228 }
0x1139   : > { %6265 = vmatprep.subr.mxu0 %v4692_v55 }
0x113a   : > { %6266 = vmatpush3.msra.mxu0 %v4692_v55 }
0x113b   : > { %6267 = vmatprep.subr.mxu0 %v6259_v15 }
0x113c   : > { %6268 = vmatpush3.msra.mxu0 %v6259_v15 }
0x113d   : > { %6269 = vmatprep.subr.mxu0 %v4682_v53 }
0x113e   : > { %6270 = vmatpush3.msra.mxu0 %v4682_v53 }
0x113f   : > { %6272 = vmatmul.mubr.msk.f32.vlgmr.msra.gmra.mxu0 %vm3612_vm4, %v4703_v58  ;;  %6277 = vmatprep.subr.mxu0 %v4815_v60 }
0x1140   : > { %6278 = vmatpush3.msra.mxu0 %v4815_v60  ;;  %6274 = vmatprep.mubr.msk.f32.mxu0 %vm3612_vm4, %v4704_v18 }
0x1141   : > { %6279 = vmatprep.subr.mxu0 %v4814_v20 }
0x1142   : > { %6280 = vmatpush3.msra.mxu0 %v4814_v20  ;;  %v5224_v20 = vpop.permute.xlu0 %5223 }
0x1143   : > { %6275 = vmatmul.mubr.msk.f32.gmra.mxu0 %vm3612_vm4, %v4705_v21  ;;  %6281 = vmatprep.subr.mxu0 %v4813_v24 }
0x1144   : > { %6282 = vmatpush3.msra.mxu0 %v4813_v24  ;;  %6293 = vmatprep.mubr.msk.f32.mxu0 %vm3411_vm3, %v7563_v37 }
0x1145   : > { %6283 = vmatprep.subr.mxu0 %v4812_v26 }
0x1146   : > { %6284 = vmatpush3.msra.mxu0 %v4812_v26 }
0x1147   : > { %6285 = vmatprep.subr.mxu0 %v4811_v28 }
0x1148   : > { %6286 = vmatpush3.msra.mxu0 %v4811_v28 }
0x1149   : > { %6287 = vmatprep.subr.mxu0 %v4810_v30 }
0x114a   : > { %6288 = vmatpush3.msra.mxu0 %v4810_v30 }
0x114b   : > { %6289 = vmatprep.subr.mxu0 %v4809_v32 }
0x114c   : > { %6290 = vmatpush3.msra.mxu0 %v4809_v32 }
0x114d   : > { %6291 = vmatprep.subr.mxu0 %v4808_v33 }
0x114e   : > { %6292 = vmatpush3.msra.mxu0 %v4808_v33 }
0x114f   : > { %6294 = vmatmul.mubr.msk.f32.vlgmr.msra.gmra.mxu0 %vm3411_vm3, %v7566_v44 }
0x1150   : > { %6296 = vmatprep.mubr.msk.f32.mxu0 %vm3411_vm3, %v7576_v62 }
0x1153   : > { %6297 = vmatmul.mubr.msk.f32.gmra.mxu0 %vm3411_vm3, %v7578_v0 }
0x11ff   : > { %v6273_v6 = vpop.f32.mrf.mxu0 }
0x1200   : > { %v4804_v35 = vadd.f32 %v6273_v6, %v4604_v47 }
0x1201   : > { %v4784_v8 = vpop.f32.mrf.mxu0 }
0x1202   : > { %v4803_v10 = vadd.f32 %v4784_v8, %v4603_v9 }
0x1203   : > { %v6276_v12 = vpop.f32.mrf.mxu0 }
0x1204   : > { %v4806_v36 = vadd.f32 %v6276_v12, %v4606_v13 }
0x1205   : > { %v4794_v38 = vpop.f32.mrf.mxu0 }
0x1206   : > { %v4805_v40 = vadd.f32 %v4794_v38, %v4605_v2 }
0x120f   : > { %v6295_v51 = vpop.f32.mrf.mxu0 }
0x1211   : > { %v4882_v41 = vpop.f32.mrf.mxu0 }
0x1213   : > { %v6298_v45 = vpop.f32.mrf.mxu0 }
0x1214   : > { %6299 = vmatprep.subr.mxu1 %v6298_v45 }
0x1215   : > { %v4892_v16 = vpop.f32.mrf.mxu0  ;;  %6300 = vmatpush3.msra.mxu1 %v6298_v45 }
0x1216   : > { %6301 = vmatprep.subr.mxu1 %v4892_v16 }
0x1217   : > { %6302 = vmatpush3.msra.mxu1 %v4892_v16 }
0x1218   : > { %6303 = vmatprep.subr.mxu1 %v6295_v51 }
0x1219   : > { %6304 = vmatpush3.msra.mxu1 %v6295_v51 }
0x121a   : > { %6305 = vmatprep.subr.mxu1 %v4882_v41 }
0x121b   : > { %6306 = vmatpush3.msra.mxu1 %v4882_v41 }
0x121c   : > { %6308 = vmatmul.mubr.msk.f32.vlgmr.msra.gmra.mxu1 %vm3612_vm4, %v4903_v19  ;;  %6313 = vmatprep.subr.mxu1 %v5015_v22 }
0x121d   : > { %6314 = vmatpush3.msra.mxu1 %v5015_v22  ;;  %6310 = vmatprep.mubr.msk.f32.mxu1 %vm3612_vm4, %v4904_v23 }
0x121e   : > { %6315 = vmatprep.subr.mxu1 %v5014_v49 }
0x121f   : > { %6316 = vmatpush3.msra.mxu1 %v5014_v49 }
0x1220   : > { %6311 = vmatmul.mubr.msk.f32.gmra.mxu1 %vm3612_vm4, %v4905_v25  ;;  %6317 = vmatprep.subr.mxu1 %v5013_v50 }
0x1221   : > { %6318 = vmatpush3.msra.mxu1 %v5013_v50  ;;  %6329 = vmatprep.mubr.msk.f32.mxu1 %vm3411_vm3, %v7563_v37  ;;  %v5102_v37 = vld [vmem:[#allocation8 + $0x100] sm:$0xff] }
0x1222   : > { %6319 = vmatprep.subr.mxu1 %v5012_v27  ;;  %6343 = vmatprep.mubr.msk.f32.mxu0 %vm3612_vm4, %v5102_v37 }
0x1223   : > { %6320 = vmatpush3.msra.mxu1 %v5012_v27 }
0x1224   : > { %6321 = vmatprep.subr.mxu1 %v5011_v29 }
0x1225   : > { %6322 = vmatpush3.msra.mxu1 %v5011_v29 }
0x1226   : > { %6323 = vmatprep.subr.mxu1 %v5010_v31 }
0x1227   : > { %6324 = vmatpush3.msra.mxu1 %v5010_v31 }
0x1228   : > { %6325 = vmatprep.subr.mxu1 %v5009_v52 }
0x1229   : > { %6326 = vmatpush3.msra.mxu1 %v5009_v52 }
0x122a   : > { %6327 = vmatprep.subr.mxu1 %v5008_v57 }
0x122b   : > { %6328 = vmatpush3.msra.mxu1 %v5008_v57 }
0x122c   : > { %6330 = vmatmul.mubr.msk.f32.vlgmr.msra.gmra.mxu1 %vm3411_vm3, %v7566_v44 }
0x122d   : > { %6332 = vmatprep.mubr.msk.f32.mxu1 %vm3411_vm3, %v7576_v62  ;;  %v5103_v62 = vld [vmem:[#allocation8 + $0x108] sm:$0xff] }
0x1230   : > { %6333 = vmatmul.mubr.msk.f32.gmra.mxu1 %vm3411_vm3, %v7578_v0  ;;  %v5104_v0 = vld [vmem:[#allocation8 + $0x110] sm:$0xff] }
0x12dc   : > { %v6309_v59 = vpop.f32.mrf.mxu1 }
0x12dd   : > { %v5004_v61 = vadd.f32 %v6309_v59, %v4804_v35 }
0x12de   : > { %v4984_v4 = vpop.f32.mrf.mxu1 }
0x12df   : > { %v5003_v56 = vadd.f32 %v4984_v4, %v4803_v10 }
0x12e0   : > { %v6312_v39 = vpop.f32.mrf.mxu1 }
0x12e1   : > { %v5006_v42 = vadd.f32 %v6312_v39, %v4806_v36 }
0x12e2   : > { %v4994_v54 = vpop.f32.mrf.mxu1 }
0x12e3   : > { %v5005_v1 = vadd.f32 %v4994_v54, %v4805_v40 }
0x12ec   : > { %v6331_v63 = vpop.f32.mrf.mxu1 }
0x12ee   : > { %v5082_v3 = vpop.f32.mrf.mxu1 }
0x12f0   : > { %v6334_v44 = vpop.f32.mrf.mxu1 }
0x12f1   : > { %6335 = vmatprep.subr.mxu0 %v6334_v44 }
0x12f2   : > { %v5092_v5 = vpop.f32.mrf.mxu1  ;;  %6336 = vmatpush3.msra.mxu0 %v6334_v44 }
0x12f3   : > { %6337 = vmatprep.subr.mxu0 %v5092_v5 }
0x12f4   : > { %6338 = vmatpush3.msra.mxu0 %v5092_v5 }
0x12f5   : > { %6339 = vmatprep.subr.mxu0 %v6331_v63 }
0x12f6   : > { %6340 = vmatpush3.msra.mxu0 %v6331_v63 }
0x12f7   : > { %6341 = vmatprep.subr.mxu0 %v5082_v3 }
0x12f8   : > { %6342 = vmatpush3.msra.mxu0 %v5082_v3 }
0x12f9   : > { %6344 = vmatmul.mubr.msk.f32.vlgmr.msra.gmra.mxu0 %vm3612_vm4, %v5103_v62 }
0x12fa   : > { %6346 = vmatprep.mubr.msk.f32.mxu0 %vm3612_vm4, %v5104_v0 }
0x12fd   : > { %6347 = vmatmul.mubr.msk.f32.gmra.mxu0 %vm3612_vm4, %v5105_v7 }
0x13b9   : > { %v6345_v46 = vpop.f32.mrf.mxu0 }
0x13ba   : > { %v5204_v47 = vadd.f32 %v6345_v46, %v5004_v61 }
0x13bb   : > { %v5184_v9 = vpop.f32.mrf.mxu0 }
0x13bc   : > { %v5232_v11 = vadd.f32 %v5219_v43, %v5204_v47  ;;  %v5203_v13 = vadd.f32 %v5184_v9, %v5003_v56 }
0x13bd   : > { %v6348_v14 = vpop.f32.mrf.mxu0 }
0x13be   : > { %v5236_v2 = vmax.f32 %v5232_v11, 0.0  ;;  %v5231_v15 = vadd.f32 %v5214_v48, %v5203_v13  ;;  %v5206_v53 = vadd.f32 %v6348_v14, %v5006_v42 }
0x13bf   : > { %v5194_v55 = vpop.f32.mrf.mxu0 }
0x13c0   : > { %5240 = vst.msk [vmem:[%s419_s19 + $0x8] sm:$0xff] %vm3411_vm3, %v5236_v2  ;;  %v5235_v58 = vmax.f32 %v5231_v15, 0.0  ;;  %v5234_v60 = vadd.f32 %v5229_v17, %v5206_v53  ;;  %v5205_v18 = vadd.f32 %v5194_v55, %v5005_v1 }
0x13c2   : > { %5239 = vst.msk [vmem:[%s419_s19] sm:$0xff] %vm3411_vm3, %v5235_v58  ;;  %v5238_v21 = vmax.f32 %v5234_v60, 0.0  ;;  %v5233_v24 = vadd.f32 %v5224_v20, %v5205_v18 }
0x13c4   : > { %5242 = vst.msk [vmem:[%s419_s19 + $0x18] sm:$0xff] %vm3411_vm3, %v5238_v21  ;;  %v5237_v26 = vmax.f32 %v5233_v24, 0.0 }
0x13c6   : > { %5241 = vst.msk [vmem:[%s419_s19 + $0x10] sm:$0xff] %vm3411_vm3, %v5237_v26 }
0x13c7   : > { %6557 = shalt.err (!%p6554_p9)
}
0x13c8   : > { %s6558_s22 = scalar_lea.hbm %s7689_s24, 512  ;;  %s6562_s1 = scalar_lea.hbm %s7744_s10, 1024 }
0x13c9   : > { %p6559_p13 = scmp.ne.s32.totalorder %s7689_s24, %s6558_s22  ;;  %p6563_p8 = scmp.lt.s32.totalorder %s7689_s24, %s7744_s10 }
0x13ca   : > { %p6564_p6 = scmp.lt.s32.totalorder %s6562_s1, %s6558_s22 }
0x13cb   : > { %p6560_p7 = pnand %p6559_p13, %p7771_p0 }
0x13cc   : > { %p6565_p11 = por %p6564_p6, %p6563_p8 }
0x13cd   : > { %p6561_p4 = pneg %p6560_p7 }
0x13cf   : > { %p6566_p12 = pnand %p6565_p11, %p6561_p4 }
0x13d1   : > { %6569 = shalt.err (!%p6566_p12)
}
0x13d2   : > { %s6629_s18 = smov 128   ;;  %s6630_s28 = smov 8  }
0x13d3   : > { %6363 = dma.vmem_to_hbm [thread:$0]  (%p7771_p0), %s7683_s21, 512, %s7689_s24, %s5244_s17, %s6629_s18, %s6629_s18, %s6630_s28  }
0x13d4 PF: > { %s5272_s12 = sand.u32 1, %s6604_s13   ;;  %p7772_p5 = scmp.ne.s32.totalorder %s7755_s20, 0 }
0x13d5   : > { %p7773_p10 = scmp.ge.s32.totalorder %s6616_s16, 2  ;;  %s5273_s25 = scalar_lea.sflag [#allocation4], %s5272_s12 }
0x13d7   : > { %p6380_p1 = pnand %p7773_p10, %p7772_p5 }
0x13d9   : > { %p6381_p2 = pneg %p6380_p1 }
0x13db   : > { %6599 = dma.done.wait (%p6381_p2), %s5273_s25, 512  }
0x13dc   : > { %6601 = vsyncadd (%p6381_p2), %s5273_s25, 4294966784  ;;  %s7774_s30 = sld [smem:[#allocation15_spill]]  ;;  %p25_p3 = scmp.ge.s32.totalorder %s6758_s29, 4  }
0x13dd   : > { %s7775_s15 = sld [smem:[#allocation16_spill]]  ;;  %s7776_s13 = smov %s6608_s14 }
0x13de   : > { %s7778_s16 = smov %s6758_s29  ;;  %27 = sbr.rel (!%p25_p3) target bundleno = 11 (0xb), region = 155 }
0x13e2   : > { %s7777_s14 = smov %s7774_s30 }
0x13e3   :  { %5278 = vsyncpa [#allocation3], 1 }
0x13e4   :  { %5280 = vsyncpa [#allocation3 + $0x1], 1 }
0x13e5   :  { %5281 = vsyncpa [#allocation6], 1 }
0x13e6   :  { %5282 = vsyncpa [#allocation9], 1 }
0x13e7   :  { %5283 = vsyncpa [#allocation4], 1 }
0x13e8   :  { %5285 = vsyncpa [#allocation4 + $0x1], 1 }

</bundles_post_ra>
